<compile_context>
chip_gen: v7x
topology: tpu7x:2x2x1
jax: 0.10.0
libtpu: 0.0.40
codegen_flags: <defaults>
</compile_context>

<pallas_src>
import functools
import math

import jax
import jax.numpy as jnp
from jax import lax
from jax.experimental import pallas as pl
from jax.experimental.pallas import tpu as pltpu

LN_EPS = 1e-5


# --------------------------------------------------------------------------
# fused kernel: one ResidualAttentionBlock per (batch_block, layer) grid step
# --------------------------------------------------------------------------
def _fused_resblock_kernel(
    x_ref,
    ln1_w, ln1_b, wqkv, bqkv, wo, bo,
    ln2_w, ln2_b, wfc, bfc, wpr, bpr,
    o_ref, res_ref,
    *, n_heads, e_real, head_mode, approx_recip):
    layer = pl.program_id(1)
    n_layers = pl.num_programs(1)

    # Layer 0: seed the resident f32 residual stream (scratch persists across the
    # innermost 'arbitrary' layer axis).
    @pl.when(layer == 0)
    def _():
        res_ref[...] = x_ref[...].astype(jnp.float32)

    Bt, L, Ep = res_ref.shape
    H = n_heads
    Dhp = Ep // H
    R = Bt * L
    cdt = wqkv.dtype                       # compute dtype for MXU operands

    x32 = res_ref[...].reshape(R, Ep)      # fold batch into rows for the GEMMs

    # LayerNorm over the *real* embedding width; padded lanes of the residual
    # stream are exactly zero by construction (zero-padded weights / biases).
    if Ep == e_real:
        def layer_norm(z, w_ref, b_ref):
            mu = jnp.mean(z, axis=-1, keepdims=True)
            d = z - mu
            var = jnp.mean(d * d, axis=-1, keepdims=True)
            return d * lax.rsqrt(var + LN_EPS) * w_ref[0, 0] + b_ref[0, 0]
    else:
        inv_e = 1.0 / e_real
        lane = lax.broadcasted_iota(jnp.int32, (1, Ep), 1)
        lane_mask = (lane < e_real).astype(jnp.float32)

        def layer_norm(z, w_ref, b_ref):
            mu = jnp.sum(z, axis=-1, keepdims=True) * inv_e
            d = (z - mu) * lane_mask
            var = jnp.sum(d * d, axis=-1, keepdims=True) * inv_e
            return d * lax.rsqrt(var + LN_EPS) * w_ref[0, 0] + b_ref[0, 0]

    def split_heads(t):                    # (R, Ep) -> (H*Bt, L, Dhp)
        if head_mode == "einshape":
            t3 = pltpu.einshape("rhd->hrd", t.reshape(R, H, Dhp))
            return t3.reshape(H * Bt, L, Dhp).astype(cdt)
        t3 = t.reshape(Bt, L, Ep)          # fallback: per-head lane slices
        parts = [t3[:, :, h * Dhp:(h + 1) * Dhp] for h in range(H)]
        return jnp.stack(parts, axis=0).reshape(H * Bt, L, Dhp).astype(cdt)

    def merge_heads(a):                    # (H*Bt, L, Dhp) -> (R, Ep)
        if head_mode == "einshape":
            return pltpu.einshape("hrd->rhd", a.reshape(H, R, Dhp)).reshape(R, Ep)
        a4 = a.reshape(H, Bt, L, Dhp)
        return jnp.concatenate([a4[h] for h in range(H)], axis=-1).reshape(R, Ep)

    # ---------------- multi-head self-attention (pre-LN) ----------------
    xn = layer_norm(x32, ln1_w, ln1_b).astype(cdt)
    # fused QKV GEMM; 1/sqrt(Dh) already folded into Wq / bq on the host
    qkv = jnp.dot(xn, wqkv[0], preferred_element_type=jnp.float32) + bqkv[0, 0]
    qh = split_heads(qkv[:, 0 * Ep:1 * Ep])
    kh = split_heads(qkv[:, 1 * Ep:2 * Ep])
    vh = split_heads(qkv[:, 2 * Ep:3 * Ep])

    # batched QK^T / softmax / PV over all (head, sample) pairs
    s = jnp.einsum('bld,bmd->blm', qh, kh,
                   preferred_element_type=jnp.float32)          # (H*Bt, L, L) f32
    s = s - jnp.max(s, axis=-1, keepdims=True)
    p = jnp.exp(s)
    p = p * pl.reciprocal(jnp.sum(p, axis=-1, keepdims=True), approx=approx_recip)
    a = jnp.einsum('blm,bmd->bld', p.astype(cdt), vh,
                   preferred_element_type=jnp.float32)          # (H*Bt, L, Dhp) f32

    a2d = merge_heads(a).astype(cdt)
    attn = jnp.dot(a2d, wo[0], preferred_element_type=jnp.float32) + bo[0, 0]
    x32 = x32 + attn

    # ---------------- MLP: c_fc -> QuickGELU -> c_proj (pre-LN) ----------------
    xn2 = layer_norm(x32, ln2_w, ln2_b).astype(cdt)
    h1 = jnp.dot(xn2, wfc[0], preferred_element_type=jnp.float32) + bfc[0, 0]
    h1 = h1 * jax.nn.sigmoid(1.702 * h1)                        # QuickGELU in f32
    h2 = jnp.dot(h1.astype(cdt), wpr[0],
                 preferred_element_type=jnp.float32) + bpr[0, 0]
    x32 = x32 + h2

    res_ref[...] = x32.reshape(Bt, L, Ep)                       # stays f32 across layers

    @pl.when(layer == n_layers - 1)
    def _():
        o_ref[...] = res_ref[...].astype(o_ref.dtype)


# --------------------------------------------------------------------------
# host-side packing: stack layers, pre-transpose, fuse QKV, fold scale, pad E
# --------------------------------------------------------------------------
def _round_up(v, m):
    return ((v + m - 1) // m) * m


def _padded_dims(emb_dim, n_heads):
    """Padded embed dim: multiple of 128 and divisible by n_heads."""
    ep = _round_up(emb_dim, 128)
    while ep % n_heads:
        ep += 128
    return ep, ep // n_heads


def _pack_params(layer_params, n_heads, compute_dtype):
    Ly = len(layer_params)
    E = layer_params[0]['wo'].shape[0]
    H = n_heads
    Dh = E // H
    Ep, Dhp = _padded_dims(E, H)
    F = 4 * E
    Fp = _round_up(F, 128)
    scale = 1.0 / math.sqrt(Dh)
    f32 = jnp.float32

    def stack(name):
        return jnp.stack([p[name] for p in layer_params], axis=0)

    def pad_last(a, new):
        return jnp.pad(a, [(0, 0)] * (a.ndim - 1) + [(0, new - a.shape[-1])])

    def head_pad_cols(w):       # (Ly, In, E) -> (Ly, In, Ep)  head-major lanes
        lw, inn, _ = w.shape
        w = w.reshape(lw, inn, H, Dh)
        w = jnp.pad(w, ((0, 0), (0, 0), (0, 0), (0, Dhp - Dh)))
        return w.reshape(lw, inn, Ep)

    def head_pad_vec(b):        # (Ly, E) -> (Ly, Ep)
        b = b.reshape(Ly, H, Dh)
        b = jnp.pad(b, ((0, 0), (0, 0), (0, Dhp - Dh)))
        return b.reshape(Ly, Ep)

    wqkv = stack('wqkv')        # (Ly, 3E, E)  torch in_proj_weight
    bqkv = stack('bqkv')        # (Ly, 3E)

    def prep_qkv(rows, fold_scale):
        w_t = jnp.swapaxes(wqkv[:, rows, :], 1, 2)            # (Ly, E_in, E_out)
        if fold_scale:
            w_t = w_t * scale                                 # fold 1/sqrt(Dh) into Wq
        w_t = head_pad_cols(w_t)                              # (Ly, E, Ep)
        return jnp.pad(w_t, ((0, 0), (0, Ep - E), (0, 0)))    # (Ly, Ep, Ep)

    wqkv_p = jnp.concatenate(
        [prep_qkv(slice(0, E), True),
         prep_qkv(slice(E, 2 * E), False),
         prep_qkv(slice(2 * E, 3 * E), False)], axis=-1).astype(compute_dtype)
    bqkv_p = jnp.concatenate(
        [head_pad_vec(bqkv[:, 0:E] * scale),
         head_pad_vec(bqkv[:, E:2 * E]),
         head_pad_vec(bqkv[:, 2 * E:3 * E])], axis=-1
    ).reshape(Ly, 1, 3 * Ep).astype(f32)

    # out_proj: rows of Wo^T are in merged-head layout -> head-pad rows, pad cols
    wo_t = jnp.swapaxes(stack('wo'), 1, 2).reshape(Ly, H, Dh, E)
    wo_p = jnp.pad(wo_t, ((0, 0), (0, 0), (0, Dhp - Dh), (0, Ep - E))
                   ).reshape(Ly, Ep, Ep).astype(compute_dtype)
    bo_p = pad_last(stack('bo'), Ep).reshape(Ly, 1, Ep).astype(f32)

    wfc_p = jnp.pad(jnp.swapaxes(stack('wfc'), 1, 2),
                    ((0, 0), (0, Ep - E), (0, Fp - F))).astype(compute_dtype)
    bfc_p = pad_last(stack('bfc'), Fp).reshape(Ly, 1, Fp).astype(f32)
    wpr_p = jnp.pad(jnp.swapaxes(stack('wpr'), 1, 2),
                    ((0, 0), (0, Fp - F), (0, Ep - E))).astype(compute_dtype)
    bpr_p = pad_last(stack('bpr'), Ep).reshape(Ly, 1, Ep).astype(f32)

    ln1_w = pad_last(stack('ln1_w'), Ep).reshape(Ly, 1, Ep).astype(f32)
    ln1_b = pad_last(stack('ln1_b'), Ep).reshape(Ly, 1, Ep).astype(f32)
    ln2_w = pad_last(stack('ln2_w'), Ep).reshape(Ly, 1, Ep).astype(f32)
    ln2_b = pad_last(stack('ln2_b'), Ep).reshape(Ly, 1, Ep).astype(f32)

    packed = (ln1_w, ln1_b, wqkv_p, bqkv_p, wo_p, bo_p,
              ln2_w, ln2_b, wfc_p, bfc_p, wpr_p, bpr_p)
    return packed, Ep, Fp


def _tpu_budget():
    """Generation-aware row-tile target and scoped-VMEM budget."""
    cap = None
    try:
        cap = int(pltpu.get_tpu_info().vmem_capacity_bytes)
    except Exception:
        cap = None
    if cap is None:
        cap = 64 * 1024 * 1024                     # unknown -> assume v7x-class
    if cap >= 100 * 1024 * 1024:                   # v5e / v6e: 128 MiB per core
        return dict(target_rows=768, vmem_limit=100 * 1024 * 1024)
    # v7x-class: 64 MiB physical per core -> keep headroom
    limit = max(32 * 1024 * 1024, min(cap - 8 * 1024 * 1024, 56 * 1024 * 1024))
    return dict(target_rows=512, vmem_limit=int(limit))


def _pick_batch_block(n_batch, seq_len, target_rows, fits):
    bt = max(1, min(n_batch, target_rows // max(seq_len, 1)))
    if n_batch >= 2:
        # keep >=2 batch blocks so the 'parallel' axis can feed both v7x TensorCores
        bt = min(bt, max(1, n_batch // 2))
    while bt > 1 and (n_batch % bt or not fits(bt)):
        bt -= 1
    return max(bt, 1)


def temporal_transformer_pallas(x_lne, layer_params, n_heads, *,
                                compute_dtype=jnp.bfloat16, batch_block=None):
    """x_lne: (L, N, E) seq-first, matching the PyTorch module's layout."""
    L, N, E = x_lne.shape
    n_layers = len(layer_params)
    in_dtype = x_lne.dtype

    packed, Ep, Fp = _pack_params(layer_params, n_heads, compute_dtype)
    x = jnp.transpose(x_lne, (1, 0, 2))                       # (N, L, E)
    if Ep != E:
        x = jnp.pad(x, ((0, 0), (0, 0), (0, Ep - E)))         # zero-padded lanes

    budget = _tpu_budget()
    w_bytes = 2 * sum(int(math.prod(a.shape[1:])) * a.dtype.itemsize
                      for a in packed)                        # double-buffered weights

    def fits(bt):
        r = bt * L
        act = ((10 * r * Ep + 2 * r * Fp + 2 * n_heads * bt * L * L) * 4
               + 3 * bt * L * Ep * jnp.dtype(in_dtype).itemsize)
        return w_bytes + act <= int(0.85 * budget['vmem_limit'])

    Bt = batch_block or _pick_batch_block(N, L, budget['target_rows'], fits)
    nb = N // Bt

    act_spec = pl.BlockSpec((Bt, L, Ep), lambda b, l: (b, 0, 0))

    def w_spec(a):
        return pl.BlockSpec((1,) + a.shape[1:], lambda b, l: (l, 0, 0))

    def run(head_mode):
        kern = functools.partial(
            _fused_resblock_kernel, n_heads=n_heads, e_real=E,
            head_mode=head_mode,
            approx_recip=(compute_dtype != jnp.float32))
        return pl.pallas_call(
            kern,
            out_shape=jax.ShapeDtypeStruct((N, L, Ep), in_dtype),
            grid=(nb, n_layers),
            in_specs=[act_spec] + [w_spec(a) for a in packed],
            out_specs=act_spec,
            scratch_shapes=[pltpu.VMEM((Bt, L, Ep), jnp.float32)],
            compiler_params=pltpu.CompilerParams(
                dimension_semantics=("parallel", "arbitrary"),
                vmem_limit_bytes=int(budget['vmem_limit'])),
        )(x, *packed)

    try:
        out = jax.block_until_ready(run("einshape"))
    except Exception:       # fallback if the einshape relayout is unsupported
        out = run("concat")

    if Ep != E:
        out = out[..., :E]
    return jnp.transpose(out, (1, 0, 2))


# --------------------------------------------------------------------------
# parameter init (PyTorch layout) and pure-JAX reference for verification
# --------------------------------------------------------------------------
def init_resblock_params(key, emb_dim):
    ks = jax.random.split(key, 12)
    s = 0.05
    f32 = jnp.float32
    E = emb_dim
    return dict(
        ln1_w=1.0 + 0.01 * jax.random.normal(ks[0], (E,), f32),
        ln1_b=0.01 * jax.random.normal(ks[1], (E,), f32),
        wqkv=s * jax.random.normal(ks[2], (3 * E, E), f32),      # in_proj_weight
        bqkv=s * jax.random.normal(ks[3], (3 * E,), f32),
        wo=s * jax.random.normal(ks[4], (E, E), f32),            # out_proj.weight
        bo=s * jax.random.normal(ks[5], (E,), f32),
        ln2_w=1.0 + 0.01 * jax.random.normal(ks[6], (E,), f32),
        ln2_b=0.01 * jax.random.normal(ks[7], (E,), f32),
        wfc=s * jax.random.normal(ks[8], (4 * E, E), f32),       # c_fc.weight
        bfc=s * jax.random.normal(ks[9], (4 * E,), f32),
        wpr=s * jax.random.normal(ks[10], (E, 4 * E), f32),      # c_proj.weight
        bpr=s * jax.random.normal(ks[11], (E,), f32),
    )


def _ref_resblock(x, p, n_heads):
    N, L, E = x.shape
    dh = E // n_heads

    def ln(z, w, b):
        mu = z.mean(-1, keepdims=True)
        var = ((z - mu) ** 2).mean(-1, keepdims=True)
        return (z - mu) / jnp.sqrt(var + LN_EPS) * w + b

    xn = ln(x, p['ln1_w'], p['ln1_b'])
    qkv = xn @ p['wqkv'].T + p['bqkv']
    q, k, v = jnp.split(qkv, 3, axis=-1)
    q = q.reshape(N, L, n_heads, dh) / math.sqrt(dh)
    k = k.reshape(N, L, n_heads, dh)
    v = v.reshape(N, L, n_heads, dh)
    s = jnp.einsum('nlhd,nmhd->nhlm', q, k)
    a = jnp.einsum('nhlm,nmhd->nlhd', jax.nn.softmax(s, axis=-1), v)
    x = x + (a.reshape(N, L, E) @ p['wo'].T + p['bo'])
    xn2 = ln(x, p['ln2_w'], p['ln2_b'])
    h = xn2 @ p['wfc'].T + p['bfc']
    h = h * jax.nn.sigmoid(1.702 * h)
    return x + (h @ p['wpr'].T + p['bpr'])


def _ref_transformer(x_lne, layer_params, n_heads):
    x = jnp.transpose(x_lne, (1, 0, 2))
    for p in layer_params:
        x = _ref_resblock(x, p, n_heads)
    return jnp.transpose(x, (1, 0, 2))


if __name__ == "__main__":
    # Small config: emb_dim=32, layers=2, n_heads=4, seq=8, batch=2
    emb_dim, layers, n_heads = 32, 2, 4
    seq_len, batch = 8, 2

    key = jax.random.PRNGKey(0)
    kx, *kls = jax.random.split(key, layers + 1)
    x = jax.random.normal(kx, (seq_len, batch, emb_dim), jnp.float32)
    layer_params = [init_resblock_params(kl, emb_dim) for kl in kls]

    ref = _ref_transformer(x, layer_params, n_heads)

    # f32 compute path: tight check against the pure-JAX reference
    out = temporal_transformer_pallas(x, layer_params, n_heads,
                                      compute_dtype=jnp.float32)
    out = jax.block_until_ready(out)
    assert out.shape == (seq_len, batch, emb_dim)
    assert out.dtype == x.dtype
    assert jnp.allclose(out, ref, atol=2e-4, rtol=2e-4), "f32 mismatch vs reference"

    # default bf16 compute path (f32 residual / LN / softmax / accumulation)
    out_bf16 = temporal_transformer_pallas(x, layer_params, n_heads)
    out_bf16 = jax.block_until_ready(out_bf16)
    assert jnp.allclose(out_bf16, ref, atol=2e-1, rtol=1e-1), "bf16 mismatch vs reference"

    print("KERNEL_OK")
</pallas_src>

<mosaic_0001>
module attributes {stable_mosaic.version = 11 : i64} {
  func.func @_fused_resblock_kernel(%arg0: i32, %arg1: i32, %arg2: memref<1x8x128xf32, #tpu.memory_space<vmem>>, %arg3: memref<1x1x128xf32, #tpu.memory_space<vmem>>, %arg4: memref<1x1x128xf32, #tpu.memory_space<vmem>>, %arg5: memref<1x128x384xf32, #tpu.memory_space<vmem>>, %arg6: memref<1x1x384xf32, #tpu.memory_space<vmem>>, %arg7: memref<1x128x128xf32, #tpu.memory_space<vmem>>, %arg8: memref<1x1x128xf32, #tpu.memory_space<vmem>>, %arg9: memref<1x1x128xf32, #tpu.memory_space<vmem>>, %arg10: memref<1x1x128xf32, #tpu.memory_space<vmem>>, %arg11: memref<1x128x128xf32, #tpu.memory_space<vmem>>, %arg12: memref<1x1x128xf32, #tpu.memory_space<vmem>>, %arg13: memref<1x128x128xf32, #tpu.memory_space<vmem>>, %arg14: memref<1x1x128xf32, #tpu.memory_space<vmem>>, %arg15: memref<1x8x128xf32, #tpu.memory_space<vmem>>, %arg16: memref<1x8x128xf32, #tpu.memory_space<vmem>>) attributes {dimension_semantics = [#tpu.dimension_semantics<parallel>, #tpu.dimension_semantics<arbitrary>], iteration_bounds = array<i64: 2, 2>, scalar_prefetch = 0 : i64, scratch_operands = 1 : i64, tpu.core_type = #tpu.core_type<tc>, window_params = [{transform_indices = @transform_0, window_bounds = array<i64: 1, 8, 128>}, {transform_indices = @transform_1, window_bounds = array<i64: 1, 1, 128>}, {transform_indices = @transform_2, window_bounds = array<i64: 1, 1, 128>}, {transform_indices = @transform_3, window_bounds = array<i64: 1, 128, 384>}, {transform_indices = @transform_4, window_bounds = array<i64: 1, 1, 384>}, {transform_indices = @transform_5, window_bounds = array<i64: 1, 128, 128>}, {transform_indices = @transform_6, window_bounds = array<i64: 1, 1, 128>}, {transform_indices = @transform_7, window_bounds = array<i64: 1, 1, 128>}, {transform_indices = @transform_8, window_bounds = array<i64: 1, 1, 128>}, {transform_indices = @transform_9, window_bounds = array<i64: 1, 128, 128>}, {transform_indices = @transform_10, window_bounds = array<i64: 1, 1, 128>}, {transform_indices = @transform_11, window_bounds = array<i64: 1, 128, 128>}, {transform_indices = @transform_12, window_bounds = array<i64: 1, 1, 128>}, {transform_indices = @transform_13, window_bounds = array<i64: 1, 8, 128>}]} {
    %c0_i32 = arith.constant 0 : i32
    %0 = arith.cmpi eq, %arg1, %c0_i32 : i32
    %1 = arith.extui %0 : i1 to i32
    %c0_i32_0 = arith.constant 0 : i32
    %2 = arith.cmpi ne, %1, %c0_i32_0 : i32
    scf.if %2 {
      %c0_62 = arith.constant 0 : index
      %c0_63 = arith.constant 0 : index
      %c0_64 = arith.constant 0 : index
      %136 = vector.load %arg2[%c0_62, %c0_63, %c0_64] : memref<1x8x128xf32, #tpu.memory_space<vmem>>, vector<1x8x128xf32>
      %c0_65 = arith.constant 0 : index
      %c0_66 = arith.constant 0 : index
      %c0_67 = arith.constant 0 : index
      %137 = vector.load %arg16[%c0_65, %c0_66, %c0_67] : memref<1x8x128xf32, #tpu.memory_space<vmem>>, vector<1x8x128xf32>
      tpu.vector_store %arg16[%c0_65, %c0_66, %c0_67], %136 {strides = array<i32>} : memref<1x8x128xf32, #tpu.memory_space<vmem>>, vector<1x8x128xf32>,
    } else {
    }
    %c0 = arith.constant 0 : index
    %c0_1 = arith.constant 0 : index
    %c0_2 = arith.constant 0 : index
    %3 = vector.load %arg16[%c0, %c0_1, %c0_2] : memref<1x8x128xf32, #tpu.memory_space<vmem>>, vector<1x8x128xf32>
    %4 = vector.shape_cast %3 : vector<1x8x128xf32> to vector<8x128xf32>
    %5 = tpu.iota {dimensions = array<i32: 1>} : vector<1x128xi32>
    %c32_i32 = arith.constant 32 : i32
    %6 = vector.broadcast %c32_i32 : i32 to vector<1x128xi32>
    %7 = arith.cmpi slt, %5, %6 : vector<1x128xi32>
    %8 = arith.extui %7 : vector<1x128xi1> to vector<1x128xi32>
    %9 = arith.sitofp %8 : vector<1x128xi32> to vector<1x128xf32>
    %cst = arith.constant dense<0.000000e+00> : vector<8xf32>
    %10 = vector.multi_reduction <add>, %4, %cst [1] : vector<8x128xf32> to vector<8xf32>
    %11 = vector.shape_cast %10 : vector<8xf32> to vector<8x1xf32>
    %cst_3 = arith.constant 3.125000e-02 : f32
    %12 = vector.broadcast %cst_3 : f32 to vector<8x1xf32>
    %13 = arith.mulf %11, %12 : vector<8x1xf32>
    %14 = vector.broadcast %13 : vector<8x1xf32> to vector<8x128xf32>
    %15 = arith.subf %4, %14 : vector<8x128xf32>
    %16 = vector.broadcast %9 : vector<1x128xf32> to vector<8x128xf32>
    %17 = arith.mulf %15, %16 : vector<8x128xf32>
    %18 = arith.mulf %17, %17 : vector<8x128xf32>
    %cst_4 = arith.constant dense<0.000000e+00> : vector<8xf32>
    %19 = vector.multi_reduction <add>, %18, %cst_4 [1] : vector<8x128xf32> to vector<8xf32>
    %20 = vector.shape_cast %19 : vector<8xf32> to vector<8x1xf32>
    %cst_5 = arith.constant 3.125000e-02 : f32
    %21 = vector.broadcast %cst_5 : f32 to vector<8x1xf32>
    %22 = arith.mulf %20, %21 : vector<8x1xf32>
    %cst_6 = arith.constant 9.99999974E-6 : f32
    %23 = vector.broadcast %cst_6 : f32 to vector<8x1xf32>
    %24 = arith.addf %22, %23 : vector<8x1xf32>
    %25 = math.rsqrt %24 : vector<8x1xf32>
    %26 = vector.broadcast %25 : vector<8x1xf32> to vector<8x128xf32>
    %27 = arith.mulf %17, %26 : vector<8x128xf32>
    %c0_7 = arith.constant 0 : index
    %c0_8 = arith.constant 0 : index
    %c0_9 = arith.constant 0 : index
    %28 = vector.load %arg3[%c0_7, %c0_8, %c0_9] : memref<1x1x128xf32, #tpu.memory_space<vmem>>, vector<1x1x128xf32>
    %29 = vector.shape_cast %28 : vector<1x1x128xf32> to vector<128xf32>
    %30 = vector.shape_cast %29 : vector<128xf32> to vector<1x128xf32>
    %31 = vector.broadcast %30 : vector<1x128xf32> to vector<8x128xf32>
    %32 = arith.mulf %27, %31 : vector<8x128xf32>
    %c0_10 = arith.constant 0 : index
    %c0_11 = arith.constant 0 : index
    %c0_12 = arith.constant 0 : index
    %33 = vector.load %arg4[%c0_10, %c0_11, %c0_12] : memref<1x1x128xf32, #tpu.memory_space<vmem>>, vector<1x1x128xf32>
    %34 = vector.shape_cast %33 : vector<1x1x128xf32> to vector<128xf32>
    %35 = vector.shape_cast %34 : vector<128xf32> to vector<1x128xf32>
    %36 = vector.broadcast %35 : vector<1x128xf32> to vector<8x128xf32>
    %37 = arith.addf %32, %36 : vector<8x128xf32>
    %c0_13 = arith.constant 0 : index
    %c0_14 = arith.constant 0 : index
    %c0_15 = arith.constant 0 : index
    %38 = vector.load %arg5[%c0_13, %c0_14, %c0_15] : memref<1x128x384xf32, #tpu.memory_space<vmem>>, vector<1x128x384xf32>
    %39 = vector.shape_cast %38 : vector<1x128x384xf32> to vector<128x384xf32>
    %cst_16 = arith.constant dense<0.000000e+00> : vector<8x384xf32>
    %40 = tpu.matmul %37, %39, %cst_16 {dimension_numbers = #tpu.dot_dimension_numbers<[1], [0], [0], [1], [0, 0, 1, 1], [], []>} : vector<8x128xf32>, vector<128x384xf32>, vector<8x384xf32> -> vector<8x384xf32>
    %c0_17 = arith.constant 0 : index
    %c0_18 = arith.constant 0 : index
    %c0_19 = arith.constant 0 : index
    %41 = vector.load %arg6[%c0_17, %c0_18, %c0_19] : memref<1x1x384xf32, #tpu.memory_space<vmem>>, vector<1x1x384xf32>
    %42 = vector.shape_cast %41 : vector<1x1x384xf32> to vector<384xf32>
    %43 = vector.shape_cast %42 : vector<384xf32> to vector<1x384xf32>
    %44 = vector.broadcast %43 : vector<1x384xf32> to vector<8x384xf32>
    %45 = arith.addf %40, %44 : vector<8x384xf32>
    %46 = vector.extract_strided_slice %45 {offsets = [0, 0], sizes = [8, 128], strides = [1, 1]} : vector<8x384xf32> to vector<8x128xf32>
    %47 = vector.shape_cast %46 : vector<8x128xf32> to vector<8x4x32xf32>
    %48 = tpu.transpose %47, [1, 0, 2] : vector<8x4x32xf32> -> vector<4x8x32xf32>
    %49 = vector.extract_strided_slice %45 {offsets = [0, 128], sizes = [8, 128], strides = [1, 1]} : vector<8x384xf32> to vector<8x128xf32>
    %50 = vector.shape_cast %49 : vector<8x128xf32> to vector<8x4x32xf32>
    %51 = tpu.transpose %50, [1, 0, 2] : vector<8x4x32xf32> -> vector<4x8x32xf32>
    %52 = vector.extract_strided_slice %45 {offsets = [0, 256], sizes = [8, 128], strides = [1, 1]} : vector<8x384xf32> to vector<8x128xf32>
    %53 = vector.shape_cast %52 : vector<8x128xf32> to vector<8x4x32xf32>
    %54 = tpu.transpose %53, [1, 0, 2] : vector<8x4x32xf32> -> vector<4x8x32xf32>
    "tpu.trace_start"() <{level = 10 : i32, message = "bld,bmd->blm"}> : () -> ()
    %cst_20 = arith.constant dense<0.000000e+00> : vector<4x8x8xf32>
    %55 = tpu.matmul %48, %51, %cst_20 {dimension_numbers = #tpu.dot_dimension_numbers<[2], [2], [1], [1], [0, 0, 0, 1, 1, 1], [0], [0]>} : vector<4x8x32xf32>, vector<4x8x32xf32>, vector<4x8x8xf32> -> vector<4x8x8xf32>
    "tpu.trace_stop"() : () -> ()
    %cst_21 = arith.constant dense<0xFF800000> : vector<4x8xf32>
    %56 = vector.multi_reduction <maximumf>, %55, %cst_21 [2] : vector<4x8x8xf32> to vector<4x8xf32>
    %57 = vector.shape_cast %56 : vector<4x8xf32> to vector<4x8x1xf32>
    %58 = vector.broadcast %57 : vector<4x8x1xf32> to vector<4x8x8xf32>
    %59 = arith.subf %55, %58 : vector<4x8x8xf32>
    %60 = math.exp %59 : vector<4x8x8xf32>
    %cst_22 = arith.constant dense<0.000000e+00> : vector<4x8xf32>
    %61 = vector.multi_reduction <add>, %60, %cst_22 [2] : vector<4x8x8xf32> to vector<4x8xf32>
    %62 = vector.shape_cast %61 : vector<4x8xf32> to vector<4x8x1xf32>
    %63 = tpu.reciprocal %62 : vector<4x8x1xf32> -> vector<4x8x1xf32>
    %64 = vector.broadcast %63 : vector<4x8x1xf32> to vector<4x8x8xf32>
    %65 = arith.mulf %60, %64 : vector<4x8x8xf32>
    "tpu.trace_start"() <{level = 10 : i32, message = "blm,bmd->bld"}> : () -> ()
    %cst_23 = arith.constant dense<0.000000e+00> : vector<4x8x32xf32>
    %66 = tpu.matmul %65, %54, %cst_23 {dimension_numbers = #tpu.dot_dimension_numbers<[2], [1], [1], [2], [0, 0, 0, 1, 1, 2], [0], [0]>} : vector<4x8x8xf32>, vector<4x8x32xf32>, vector<4x8x32xf32> -> vector<4x8x32xf32>
    "tpu.trace_stop"() : () -> ()
    %67 = tpu.transpose %66, [1, 0, 2] : vector<4x8x32xf32> -> vector<8x4x32xf32>
    %68 = vector.shape_cast %67 : vector<8x4x32xf32> to vector<8x128xf32>
    %c0_24 = arith.constant 0 : index
    %c0_25 = arith.constant 0 : index
    %c0_26 = arith.constant 0 : index
    %69 = vector.load %arg7[%c0_24, %c0_25, %c0_26] : memref<1x128x128xf32, #tpu.memory_space<vmem>>, vector<1x128x128xf32>
    %70 = vector.shape_cast %69 : vector<1x128x128xf32> to vector<128x128xf32>
    %cst_27 = arith.constant dense<0.000000e+00> : vector<8x128xf32>
    %71 = tpu.matmul %68, %70, %cst_27 {dimension_numbers = #tpu.dot_dimension_numbers<[1], [0], [0], [1], [0, 0, 1, 1], [], []>} : vector<8x128xf32>, vector<128x128xf32>, vector<8x128xf32> -> vector<8x128xf32>
    %c0_28 = arith.constant 0 : index
    %c0_29 = arith.constant 0 : index
    %c0_30 = arith.constant 0 : index
    %72 = vector.load %arg8[%c0_28, %c0_29, %c0_30] : memref<1x1x128xf32, #tpu.memory_space<vmem>>, vector<1x1x128xf32>
    %73 = vector.shape_cast %72 : vector<1x1x128xf32> to vector<128xf32>
    %74 = vector.shape_cast %73 : vector<128xf32> to vector<1x128xf32>
    %75 = vector.broadcast %74 : vector<1x128xf32> to vector<8x128xf32>
    %76 = arith.addf %71, %75 : vector<8x128xf32>
    %77 = arith.addf %4, %76 : vector<8x128xf32>
    %cst_31 = arith.constant dense<0.000000e+00> : vector<8xf32>
    %78 = vector.multi_reduction <add>, %77, %cst_31 [1] : vector<8x128xf32> to vector<8xf32>
    %79 = vector.shape_cast %78 : vector<8xf32> to vector<8x1xf32>
    %cst_32 = arith.constant 3.125000e-02 : f32
    %80 = vector.broadcast %cst_32 : f32 to vector<8x1xf32>
    %81 = arith.mulf %79, %80 : vector<8x1xf32>
    %82 = vector.broadcast %81 : vector<8x1xf32> to vector<8x128xf32>
    %83 = arith.subf %77, %82 : vector<8x128xf32>
    %84 = vector.broadcast %9 : vector<1x128xf32> to vector<8x128xf32>
    %85 = arith.mulf %83, %84 : vector<8x128xf32>
    %86 = arith.mulf %85, %85 : vector<8x128xf32>
    %cst_33 = arith.constant dense<0.000000e+00> : vector<8xf32>
    %87 = vector.multi_reduction <add>, %86, %cst_33 [1] : vector<8x128xf32> to vector<8xf32>
    %88 = vector.shape_cast %87 : vector<8xf32> to vector<8x1xf32>
    %cst_34 = arith.constant 3.125000e-02 : f32
    %89 = vector.broadcast %cst_34 : f32 to vector<8x1xf32>
    %90 = arith.mulf %88, %89 : vector<8x1xf32>
    %cst_35 = arith.constant 9.99999974E-6 : f32
    %91 = vector.broadcast %cst_35 : f32 to vector<8x1xf32>
    %92 = arith.addf %90, %91 : vector<8x1xf32>
    %93 = math.rsqrt %92 : vector<8x1xf32>
    %94 = vector.broadcast %93 : vector<8x1xf32> to vector<8x128xf32>
    %95 = arith.mulf %85, %94 : vector<8x128xf32>
    %c0_36 = arith.constant 0 : index
    %c0_37 = arith.constant 0 : index
    %c0_38 = arith.constant 0 : index
    %96 = vector.load %arg9[%c0_36, %c0_37, %c0_38] : memref<1x1x128xf32, #tpu.memory_space<vmem>>, vector<1x1x128xf32>
    %97 = vector.shape_cast %96 : vector<1x1x128xf32> to vector<128xf32>
    %98 = vector.shape_cast %97 : vector<128xf32> to vector<1x128xf32>
    %99 = vector.broadcast %98 : vector<1x128xf32> to vector<8x128xf32>
    %100 = arith.mulf %95, %99 : vector<8x128xf32>
    %c0_39 = arith.constant 0 : index
    %c0_40 = arith.constant 0 : index
    %c0_41 = arith.constant 0 : index
    %101 = vector.load %arg10[%c0_39, %c0_40, %c0_41] : memref<1x1x128xf32, #tpu.memory_space<vmem>>, vector<1x1x128xf32>
    %102 = vector.shape_cast %101 : vector<1x1x128xf32> to vector<128xf32>
    %103 = vector.shape_cast %102 : vector<128xf32> to vector<1x128xf32>
    %104 = vector.broadcast %103 : vector<1x128xf32> to vector<8x128xf32>
    %105 = arith.addf %100, %104 : vector<8x128xf32>
    %c0_42 = arith.constant 0 : index
    %c0_43 = arith.constant 0 : index
    %c0_44 = arith.constant 0 : index
    %106 = vector.load %arg11[%c0_42, %c0_43, %c0_44] : memref<1x128x128xf32, #tpu.memory_space<vmem>>, vector<1x128x128xf32>
    %107 = vector.shape_cast %106 : vector<1x128x128xf32> to vector<128x128xf32>
    %cst_45 = arith.constant dense<0.000000e+00> : vector<8x128xf32>
    %108 = tpu.matmul %105, %107, %cst_45 {dimension_numbers = #tpu.dot_dimension_numbers<[1], [0], [0], [1], [0, 0, 1, 1], [], []>} : vector<8x128xf32>, vector<128x128xf32>, vector<8x128xf32> -> vector<8x128xf32>
    %c0_46 = arith.constant 0 : index
    %c0_47 = arith.constant 0 : index
    %c0_48 = arith.constant 0 : index
    %109 = vector.load %arg12[%c0_46, %c0_47, %c0_48] : memref<1x1x128xf32, #tpu.memory_space<vmem>>, vector<1x1x128xf32>
    %110 = vector.shape_cast %109 : vector<1x1x128xf32> to vector<128xf32>
    %111 = vector.shape_cast %110 : vector<128xf32> to vector<1x128xf32>
    %112 = vector.broadcast %111 : vector<1x128xf32> to vector<8x128xf32>
    %113 = arith.addf %108, %112 : vector<8x128xf32>
    %cst_49 = arith.constant 1.702000e+00 : f32
    %114 = vector.broadcast %cst_49 : f32 to vector<8x128xf32>
    %115 = arith.mulf %114, %113 : vector<8x128xf32>
    %116 = arith.negf %115 : vector<8x128xf32>
    %117 = math.exp %116 : vector<8x128xf32>
    %cst_50 = arith.constant 1.000000e+00 : f32
    %118 = vector.broadcast %cst_50 : f32 to vector<8x128xf32>
    %119 = arith.addf %118, %117 : vector<8x128xf32>
    %120 = arith.divf %118, %119 : vector<8x128xf32>
    %121 = arith.mulf %113, %120 : vector<8x128xf32>
    %c0_51 = arith.constant 0 : index
    %c0_52 = arith.constant 0 : index
    %c0_53 = arith.constant 0 : index
    %122 = vector.load %arg13[%c0_51, %c0_52, %c0_53] : memref<1x128x128xf32, #tpu.memory_space<vmem>>, vector<1x128x128xf32>
    %123 = vector.shape_cast %122 : vector<1x128x128xf32> to vector<128x128xf32>
    %cst_54 = arith.constant dense<0.000000e+00> : vector<8x128xf32>
    %124 = tpu.matmul %121, %123, %cst_54 {dimension_numbers = #tpu.dot_dimension_numbers<[1], [0], [0], [1], [0, 0, 1, 1], [], []>} : vector<8x128xf32>, vector<128x128xf32>, vector<8x128xf32> -> vector<8x128xf32>
    %c0_55 = arith.constant 0 : index
    %c0_56 = arith.constant 0 : index
    %c0_57 = arith.constant 0 : index
    %125 = vector.load %arg14[%c0_55, %c0_56, %c0_57] : memref<1x1x128xf32, #tpu.memory_space<vmem>>, vector<1x1x128xf32>
    %126 = vector.shape_cast %125 : vector<1x1x128xf32> to vector<128xf32>
    %127 = vector.shape_cast %126 : vector<128xf32> to vector<1x128xf32>
    %128 = vector.broadcast %127 : vector<1x128xf32> to vector<8x128xf32>
    %129 = arith.addf %124, %128 : vector<8x128xf32>
    %130 = arith.addf %77, %129 : vector<8x128xf32>
    %131 = vector.shape_cast %130 : vector<8x128xf32> to vector<1x8x128xf32>
    %c0_58 = arith.constant 0 : index
    %c0_59 = arith.constant 0 : index
    %c0_60 = arith.constant 0 : index
    %132 = vector.load %arg16[%c0_58, %c0_59, %c0_60] : memref<1x8x128xf32, #tpu.memory_space<vmem>>, vector<1x8x128xf32>
    tpu.vector_store %arg16[%c0_58, %c0_59, %c0_60], %131 {strides = array<i32>} : memref<1x8x128xf32, #tpu.memory_space<vmem>>, vector<1x8x128xf32>,
    %c1_i32 = arith.constant 1 : i32
    %133 = arith.cmpi eq, %arg1, %c1_i32 : i32
    %134 = arith.extui %133 : i1 to i32
    %c0_i32_61 = arith.constant 0 : i32
    %135 = arith.cmpi ne, %134, %c0_i32_61 : i32
    scf.if %135 {
      %c0_62 = arith.constant 0 : index
      %c0_63 = arith.constant 0 : index
      %c0_64 = arith.constant 0 : index
      %136 = vector.load %arg16[%c0_62, %c0_63, %c0_64] : memref<1x8x128xf32, #tpu.memory_space<vmem>>, vector<1x8x128xf32>
      %c0_65 = arith.constant 0 : index
      %c0_66 = arith.constant 0 : index
      %c0_67 = arith.constant 0 : index
      %137 = vector.load %arg15[%c0_65, %c0_66, %c0_67] : memref<1x8x128xf32, #tpu.memory_space<vmem>>, vector<1x8x128xf32>
      tpu.vector_store %arg15[%c0_65, %c0_66, %c0_67], %136 {strides = array<i32>} : memref<1x8x128xf32, #tpu.memory_space<vmem>>, vector<1x8x128xf32>,
    } else {
    }
    return
  }
  func.func @transform_0(%arg0: i32, %arg1: i32) -> (i32, i32, i32) {
    %c0_i32 = arith.constant 0 : i32
    %c0_i32_0 = arith.constant 0 : i32
    %c0_i32_1 = arith.constant 0 : i32
    return %arg0, %c0_i32, %c0_i32_0 : i32, i32, i32
  }
  func.func @transform_1(%arg0: i32, %arg1: i32) -> (i32, i32, i32) {
    %c0_i32 = arith.constant 0 : i32
    %c0_i32_0 = arith.constant 0 : i32
    %c0_i32_1 = arith.constant 0 : i32
    return %arg1, %c0_i32, %c0_i32_0 : i32, i32, i32
  }
  func.func @transform_2(%arg0: i32, %arg1: i32) -> (i32, i32, i32) {
    %c0_i32 = arith.constant 0 : i32
    %c0_i32_0 = arith.constant 0 : i32
    %c0_i32_1 = arith.constant 0 : i32
    return %arg1, %c0_i32, %c0_i32_0 : i32, i32, i32
  }
  func.func @transform_3(%arg0: i32, %arg1: i32) -> (i32, i32, i32) {
    %c0_i32 = arith.constant 0 : i32
    %c0_i32_0 = arith.constant 0 : i32
    %c0_i32_1 = arith.constant 0 : i32
    return %arg1, %c0_i32, %c0_i32_0 : i32, i32, i32
  }
  func.func @transform_4(%arg0: i32, %arg1: i32) -> (i32, i32, i32) {
    %c0_i32 = arith.constant 0 : i32
    %c0_i32_0 = arith.constant 0 : i32
    %c0_i32_1 = arith.constant 0 : i32
    return %arg1, %c0_i32, %c0_i32_0 : i32, i32, i32
  }
  func.func @transform_5(%arg0: i32, %arg1: i32) -> (i32, i32, i32) {
    %c0_i32 = arith.constant 0 : i32
    %c0_i32_0 = arith.constant 0 : i32
    %c0_i32_1 = arith.constant 0 : i32
    return %arg1, %c0_i32, %c0_i32_0 : i32, i32, i32
  }
  func.func @transform_6(%arg0: i32, %arg1: i32) -> (i32, i32, i32) {
    %c0_i32 = arith.constant 0 : i32
    %c0_i32_0 = arith.constant 0 : i32
    %c0_i32_1 = arith.constant 0 : i32
    return %arg1, %c0_i32, %c0_i32_0 : i32, i32, i32
  }
  func.func @transform_7(%arg0: i32, %arg1: i32) -> (i32, i32, i32) {
    %c0_i32 = arith.constant 0 : i32
    %c0_i32_0 = arith.constant 0 : i32
    %c0_i32_1 = arith.constant 0 : i32
    return %arg1, %c0_i32, %c0_i32_0 : i32, i32, i32
  }
  func.func @transform_8(%arg0: i32, %arg1: i32) -> (i32, i32, i32) {
    %c0_i32 = arith.constant 0 : i32
    %c0_i32_0 = arith.constant 0 : i32
    %c0_i32_1 = arith.constant 0 : i32
    return %arg1, %c0_i32, %c0_i32_0 : i32, i32, i32
  }
  func.func @transform_9(%arg0: i32, %arg1: i32) -> (i32, i32, i32) {
    %c0_i32 = arith.constant 0 : i32
    %c0_i32_0 = arith.constant 0 : i32
    %c0_i32_1 = arith.constant 0 : i32
    return %arg1, %c0_i32, %c0_i32_0 : i32, i32, i32
  }
  func.func @transform_10(%arg0: i32, %arg1: i32) -> (i32, i32, i32) {
    %c0_i32 = arith.constant 0 : i32
    %c0_i32_0 = arith.constant 0 : i32
    %c0_i32_1 = arith.constant 0 : i32
    return %arg1, %c0_i32, %c0_i32_0 : i32, i32, i32
  }
  func.func @transform_11(%arg0: i32, %arg1: i32) -> (i32, i32, i32) {
    %c0_i32 = arith.constant 0 : i32
    %c0_i32_0 = arith.constant 0 : i32
    %c0_i32_1 = arith.constant 0 : i32
    return %arg1, %c0_i32, %c0_i32_0 : i32, i32, i32
  }
  func.func @transform_12(%arg0: i32, %arg1: i32) -> (i32, i32, i32) {
    %c0_i32 = arith.constant 0 : i32
    %c0_i32_0 = arith.constant 0 : i32
    %c0_i32_1 = arith.constant 0 : i32
    return %arg1, %c0_i32, %c0_i32_0 : i32, i32, i32
  }
  func.func @transform_13(%arg0: i32, %arg1: i32) -> (i32, i32, i32) {
    %c0_i32 = arith.constant 0 : i32
    %c0_i32_0 = arith.constant 0 : i32
    %c0_i32_1 = arith.constant 0 : i32
    return %arg0, %c0_i32, %c0_i32_0 : i32, i32, i32
  }
}

module attributes {stable_mosaic.version = 11 : i64} {
  func.func @_fused_resblock_kernel(%arg0: i32, %arg1: i32, %arg2: memref<1x8x128xf32, #tpu.memory_space<vmem>>, %arg3: memref<1x1x128xf32, #tpu.memory_space<vmem>>, %arg4: memref<1x1x128xf32, #tpu.memory_space<vmem>>, %arg5: memref<1x128x384xf32, #tpu.memory_space<vmem>>, %arg6: memref<1x1x384xf32, #tpu.memory_space<vmem>>, %arg7: memref<1x128x128xf32, #tpu.memory_space<vmem>>, %arg8: memref<1x1x128xf32, #tpu.memory_space<vmem>>, %arg9: memref<1x1x128xf32, #tpu.memory_space<vmem>>, %arg10: memref<1x1x128xf32, #tpu.memory_space<vmem>>, %arg11: memref<1x128x128xf32, #tpu.memory_space<vmem>>, %arg12: memref<1x1x128xf32, #tpu.memory_space<vmem>>, %arg13: memref<1x128x128xf32, #tpu.memory_space<vmem>>, %arg14: memref<1x1x128xf32, #tpu.memory_space<vmem>>, %arg15: memref<1x8x128xf32, #tpu.memory_space<vmem>>, %arg16: memref<1x8x128xf32, #tpu.memory_space<vmem>>) attributes {dimension_semantics = [#tpu.dimension_semantics<parallel>, #tpu.dimension_semantics<arbitrary>], iteration_bounds = array<i64: 2, 2>, scalar_prefetch = 0 : i64, scratch_operands = 1 : i64, tpu.core_type = #tpu.core_type<tc>, window_params = [{transform_indices = @transform_0, window_bounds = array<i64: 1, 8, 128>}, {transform_indices = @transform_1, window_bounds = array<i64: 1, 1, 128>}, {transform_indices = @transform_2, window_bounds = array<i64: 1, 1, 128>}, {transform_indices = @transform_3, window_bounds = array<i64: 1, 128, 384>}, {transform_indices = @transform_4, window_bounds = array<i64: 1, 1, 384>}, {transform_indices = @transform_5, window_bounds = array<i64: 1, 128, 128>}, {transform_indices = @transform_6, window_bounds = array<i64: 1, 1, 128>}, {transform_indices = @transform_7, window_bounds = array<i64: 1, 1, 128>}, {transform_indices = @transform_8, window_bounds = array<i64: 1, 1, 128>}, {transform_indices = @transform_9, window_bounds = array<i64: 1, 128, 128>}, {transform_indices = @transform_10, window_bounds = array<i64: 1, 1, 128>}, {transform_indices = @transform_11, window_bounds = array<i64: 1, 128, 128>}, {transform_indices = @transform_12, window_bounds = array<i64: 1, 1, 128>}, {transform_indices = @transform_13, window_bounds = array<i64: 1, 8, 128>}]} {
    %c0_i32 = arith.constant 0 : i32
    %0 = arith.cmpi eq, %arg1, %c0_i32 : i32
    %1 = arith.extui %0 : i1 to i32
    %c0_i32_0 = arith.constant 0 : i32
    %2 = arith.cmpi ne, %1, %c0_i32_0 : i32
    scf.if %2 {
      %c0_62 = arith.constant 0 : index
      %c0_63 = arith.constant 0 : index
      %c0_64 = arith.constant 0 : index
      %172 = vector.load %arg2[%c0_62, %c0_63, %c0_64] : memref<1x8x128xf32, #tpu.memory_space<vmem>>, vector<1x8x128xf32>
      %c0_65 = arith.constant 0 : index
      %c0_66 = arith.constant 0 : index
      %c0_67 = arith.constant 0 : index
      %173 = vector.load %arg16[%c0_65, %c0_66, %c0_67] : memref<1x8x128xf32, #tpu.memory_space<vmem>>, vector<1x8x128xf32>
      tpu.vector_store %arg16[%c0_65, %c0_66, %c0_67], %172 {strides = array<i32>} : memref<1x8x128xf32, #tpu.memory_space<vmem>>, vector<1x8x128xf32>,
    } else {
    }
    %c0 = arith.constant 0 : index
    %c0_1 = arith.constant 0 : index
    %c0_2 = arith.constant 0 : index
    %3 = vector.load %arg16[%c0, %c0_1, %c0_2] : memref<1x8x128xf32, #tpu.memory_space<vmem>>, vector<1x8x128xf32>
    %4 = vector.shape_cast %3 : vector<1x8x128xf32> to vector<8x128xf32>
    %5 = tpu.iota {dimensions = array<i32: 1>} : vector<1x128xi32>
    %c32_i32 = arith.constant 32 : i32
    %6 = vector.broadcast %c32_i32 : i32 to vector<1x128xi32>
    %7 = arith.cmpi slt, %5, %6 : vector<1x128xi32>
    %8 = arith.extui %7 : vector<1x128xi1> to vector<1x128xi32>
    %9 = arith.sitofp %8 : vector<1x128xi32> to vector<1x128xf32>
    %cst = arith.constant dense<0.000000e+00> : vector<8xf32>
    %10 = vector.multi_reduction <add>, %4, %cst [1] : vector<8x128xf32> to vector<8xf32>
    %11 = vector.shape_cast %10 : vector<8xf32> to vector<8x1xf32>
    %cst_3 = arith.constant 3.125000e-02 : f32
    %12 = vector.broadcast %cst_3 : f32 to vector<8x1xf32>
    %13 = arith.mulf %11, %12 : vector<8x1xf32>
    %14 = vector.broadcast %13 : vector<8x1xf32> to vector<8x128xf32>
    %15 = arith.subf %4, %14 : vector<8x128xf32>
    %16 = vector.broadcast %9 : vector<1x128xf32> to vector<8x128xf32>
    %17 = arith.mulf %15, %16 : vector<8x128xf32>
    %18 = arith.mulf %17, %17 : vector<8x128xf32>
    %cst_4 = arith.constant dense<0.000000e+00> : vector<8xf32>
    %19 = vector.multi_reduction <add>, %18, %cst_4 [1] : vector<8x128xf32> to vector<8xf32>
    %20 = vector.shape_cast %19 : vector<8xf32> to vector<8x1xf32>
    %cst_5 = arith.constant 3.125000e-02 : f32
    %21 = vector.broadcast %cst_5 : f32 to vector<8x1xf32>
    %22 = arith.mulf %20, %21 : vector<8x1xf32>
    %cst_6 = arith.constant 9.99999974E-6 : f32
    %23 = vector.broadcast %cst_6 : f32 to vector<8x1xf32>
    %24 = arith.addf %22, %23 : vector<8x1xf32>
    %25 = math.rsqrt %24 : vector<8x1xf32>
    %26 = vector.broadcast %25 : vector<8x1xf32> to vector<8x128xf32>
    %27 = arith.mulf %17, %26 : vector<8x128xf32>
    %c0_7 = arith.constant 0 : index
    %c0_8 = arith.constant 0 : index
    %c0_9 = arith.constant 0 : index
    %28 = vector.load %arg3[%c0_7, %c0_8, %c0_9] : memref<1x1x128xf32, #tpu.memory_space<vmem>>, vector<1x1x128xf32>
    %29 = vector.shape_cast %28 : vector<1x1x128xf32> to vector<128xf32>
    %30 = vector.shape_cast %29 : vector<128xf32> to vector<1x128xf32>
    %31 = vector.broadcast %30 : vector<1x128xf32> to vector<8x128xf32>
    %32 = arith.mulf %27, %31 : vector<8x128xf32>
    %c0_10 = arith.constant 0 : index
    %c0_11 = arith.constant 0 : index
    %c0_12 = arith.constant 0 : index
    %33 = vector.load %arg4[%c0_10, %c0_11, %c0_12] : memref<1x1x128xf32, #tpu.memory_space<vmem>>, vector<1x1x128xf32>
    %34 = vector.shape_cast %33 : vector<1x1x128xf32> to vector<128xf32>
    %35 = vector.shape_cast %34 : vector<128xf32> to vector<1x128xf32>
    %36 = vector.broadcast %35 : vector<1x128xf32> to vector<8x128xf32>
    %37 = arith.addf %32, %36 : vector<8x128xf32>
    %c0_13 = arith.constant 0 : index
    %c0_14 = arith.constant 0 : index
    %c0_15 = arith.constant 0 : index
    %38 = vector.load %arg5[%c0_13, %c0_14, %c0_15] : memref<1x128x384xf32, #tpu.memory_space<vmem>>, vector<1x128x384xf32>
    %39 = vector.shape_cast %38 : vector<1x128x384xf32> to vector<128x384xf32>
    %cst_16 = arith.constant dense<0.000000e+00> : vector<8x384xf32>
    %40 = tpu.matmul %37, %39, %cst_16 {dimension_numbers = #tpu.dot_dimension_numbers<[1], [0], [0], [1], [0, 0, 1, 1], [], []>} : vector<8x128xf32>, vector<128x384xf32>, vector<8x384xf32> -> vector<8x384xf32>
    %c0_17 = arith.constant 0 : index
    %c0_18 = arith.constant 0 : index
    %c0_19 = arith.constant 0 : index
    %41 = vector.load %arg6[%c0_17, %c0_18, %c0_19] : memref<1x1x384xf32, #tpu.memory_space<vmem>>, vector<1x1x384xf32>
    %42 = vector.shape_cast %41 : vector<1x1x384xf32> to vector<384xf32>
    %43 = vector.shape_cast %42 : vector<384xf32> to vector<1x384xf32>
    %44 = vector.broadcast %43 : vector<1x384xf32> to vector<8x384xf32>
    %45 = arith.addf %40, %44 : vector<8x384xf32>
    %46 = vector.extract_strided_slice %45 {offsets = [0, 0], sizes = [8, 128], strides = [1, 1]} : vector<8x384xf32> to vector<8x128xf32>
    %47 = vector.shape_cast %46 : vector<8x128xf32> to vector<1x8x128xf32>
    %48 = vector.extract_strided_slice %47 {offsets = [0, 0, 0], sizes = [1, 8, 32], strides = [1, 1, 1]} : vector<1x8x128xf32> to vector<1x8x32xf32>
    %49 = vector.extract_strided_slice %47 {offsets = [0, 0, 32], sizes = [1, 8, 32], strides = [1, 1, 1]} : vector<1x8x128xf32> to vector<1x8x32xf32>
    %50 = vector.extract_strided_slice %47 {offsets = [0, 0, 64], sizes = [1, 8, 32], strides = [1, 1, 1]} : vector<1x8x128xf32> to vector<1x8x32xf32>
    %51 = vector.extract_strided_slice %47 {offsets = [0, 0, 96], sizes = [1, 8, 32], strides = [1, 1, 1]} : vector<1x8x128xf32> to vector<1x8x32xf32>
    %52 = vector.shape_cast %48 : vector<1x8x32xf32> to vector<1x1x8x32xf32>
    %53 = vector.shape_cast %49 : vector<1x8x32xf32> to vector<1x1x8x32xf32>
    %54 = vector.shape_cast %50 : vector<1x8x32xf32> to vector<1x1x8x32xf32>
    %55 = vector.shape_cast %51 : vector<1x8x32xf32> to vector<1x1x8x32xf32>
    %56 = tpu.concatenate %52, %53, %54, %55 in 0 : vector<1x1x8x32xf32>, vector<1x1x8x32xf32>, vector<1x1x8x32xf32>, vector<1x1x8x32xf32> -> vector<4x1x8x32xf32>
    %57 = vector.shape_cast %56 : vector<4x1x8x32xf32> to vector<4x8x32xf32>
    %58 = vector.extract_strided_slice %45 {offsets = [0, 128], sizes = [8, 128], strides = [1, 1]} : vector<8x384xf32> to vector<8x128xf32>
    %59 = vector.shape_cast %58 : vector<8x128xf32> to vector<1x8x128xf32>
    %60 = vector.extract_strided_slice %59 {offsets = [0, 0, 0], sizes = [1, 8, 32], strides = [1, 1, 1]} : vector<1x8x128xf32> to vector<1x8x32xf32>
    %61 = vector.extract_strided_slice %59 {offsets = [0, 0, 32], sizes = [1, 8, 32], strides = [1, 1, 1]} : vector<1x8x128xf32> to vector<1x8x32xf32>
    %62 = vector.extract_strided_slice %59 {offsets = [0, 0, 64], sizes = [1, 8, 32], strides = [1, 1, 1]} : vector<1x8x128xf32> to vector<1x8x32xf32>
    %63 = vector.extract_strided_slice %59 {offsets = [0, 0, 96], sizes = [1, 8, 32], strides = [1, 1, 1]} : vector<1x8x128xf32> to vector<1x8x32xf32>
    %64 = vector.shape_cast %60 : vector<1x8x32xf32> to vector<1x1x8x32xf32>
    %65 = vector.shape_cast %61 : vector<1x8x32xf32> to vector<1x1x8x32xf32>
    %66 = vector.shape_cast %62 : vector<1x8x32xf32> to vector<1x1x8x32xf32>
    %67 = vector.shape_cast %63 : vector<1x8x32xf32> to vector<1x1x8x32xf32>
    %68 = tpu.concatenate %64, %65, %66, %67 in 0 : vector<1x1x8x32xf32>, vector<1x1x8x32xf32>, vector<1x1x8x32xf32>, vector<1x1x8x32xf32> -> vector<4x1x8x32xf32>
    %69 = vector.shape_cast %68 : vector<4x1x8x32xf32> to vector<4x8x32xf32>
    %70 = vector.extract_strided_slice %45 {offsets = [0, 256], sizes = [8, 128], strides = [1, 1]} : vector<8x384xf32> to vector<8x128xf32>
    %71 = vector.shape_cast %70 : vector<8x128xf32> to vector<1x8x128xf32>
    %72 = vector.extract_strided_slice %71 {offsets = [0, 0, 0], sizes = [1, 8, 32], strides = [1, 1, 1]} : vector<1x8x128xf32> to vector<1x8x32xf32>
    %73 = vector.extract_strided_slice %71 {offsets = [0, 0, 32], sizes = [1, 8, 32], strides = [1, 1, 1]} : vector<1x8x128xf32> to vector<1x8x32xf32>
    %74 = vector.extract_strided_slice %71 {offsets = [0, 0, 64], sizes = [1, 8, 32], strides = [1, 1, 1]} : vector<1x8x128xf32> to vector<1x8x32xf32>
    %75 = vector.extract_strided_slice %71 {offsets = [0, 0, 96], sizes = [1, 8, 32], strides = [1, 1, 1]} : vector<1x8x128xf32> to vector<1x8x32xf32>
    %76 = vector.shape_cast %72 : vector<1x8x32xf32> to vector<1x1x8x32xf32>
    %77 = vector.shape_cast %73 : vector<1x8x32xf32> to vector<1x1x8x32xf32>
    %78 = vector.shape_cast %74 : vector<1x8x32xf32> to vector<1x1x8x32xf32>
    %79 = vector.shape_cast %75 : vector<1x8x32xf32> to vector<1x1x8x32xf32>
    %80 = tpu.concatenate %76, %77, %78, %79 in 0 : vector<1x1x8x32xf32>, vector<1x1x8x32xf32>, vector<1x1x8x32xf32>, vector<1x1x8x32xf32> -> vector<4x1x8x32xf32>
    %81 = vector.shape_cast %80 : vector<4x1x8x32xf32> to vector<4x8x32xf32>
    "tpu.trace_start"() <{level = 10 : i32, message = "bld,bmd->blm"}> : () -> ()
    %cst_20 = arith.constant dense<0.000000e+00> : vector<4x8x8xf32>
    %82 = tpu.matmul %57, %69, %cst_20 {dimension_numbers = #tpu.dot_dimension_numbers<[2], [2], [1], [1], [0, 0, 0, 1, 1, 1], [0], [0]>} : vector<4x8x32xf32>, vector<4x8x32xf32>, vector<4x8x8xf32> -> vector<4x8x8xf32>
    "tpu.trace_stop"() : () -> ()
    %cst_21 = arith.constant dense<0xFF800000> : vector<4x8xf32>
    %83 = vector.multi_reduction <maximumf>, %82, %cst_21 [2] : vector<4x8x8xf32> to vector<4x8xf32>
    %84 = vector.shape_cast %83 : vector<4x8xf32> to vector<4x8x1xf32>
    %85 = vector.broadcast %84 : vector<4x8x1xf32> to vector<4x8x8xf32>
    %86 = arith.subf %82, %85 : vector<4x8x8xf32>
    %87 = math.exp %86 : vector<4x8x8xf32>
    %cst_22 = arith.constant dense<0.000000e+00> : vector<4x8xf32>
    %88 = vector.multi_reduction <add>, %87, %cst_22 [2] : vector<4x8x8xf32> to vector<4x8xf32>
    %89 = vector.shape_cast %88 : vector<4x8xf32> to vector<4x8x1xf32>
    %90 = tpu.reciprocal %89 : vector<4x8x1xf32> -> vector<4x8x1xf32>
    %91 = vector.broadcast %90 : vector<4x8x1xf32> to vector<4x8x8xf32>
    %92 = arith.mulf %87, %91 : vector<4x8x8xf32>
    "tpu.trace_start"() <{level = 10 : i32, message = "blm,bmd->bld"}> : () -> ()
    %cst_23 = arith.constant dense<0.000000e+00> : vector<4x8x32xf32>
    %93 = tpu.matmul %92, %81, %cst_23 {dimension_numbers = #tpu.dot_dimension_numbers<[2], [1], [1], [2], [0, 0, 0, 1, 1, 2], [0], [0]>} : vector<4x8x8xf32>, vector<4x8x32xf32>, vector<4x8x32xf32> -> vector<4x8x32xf32>
    "tpu.trace_stop"() : () -> ()
    %94 = vector.shape_cast %93 : vector<4x8x32xf32> to vector<4x1x8x32xf32>
    %95 = vector.extract_strided_slice %94 {offsets = [0, 0, 0, 0], sizes = [1, 1, 8, 32], strides = [1, 1, 1, 1]} : vector<4x1x8x32xf32> to vector<1x1x8x32xf32>
    %96 = vector.shape_cast %95 : vector<1x1x8x32xf32> to vector<1x8x32xf32>
    %97 = vector.extract_strided_slice %94 {offsets = [1, 0, 0, 0], sizes = [1, 1, 8, 32], strides = [1, 1, 1, 1]} : vector<4x1x8x32xf32> to vector<1x1x8x32xf32>
    %98 = vector.shape_cast %97 : vector<1x1x8x32xf32> to vector<1x8x32xf32>
    %99 = vector.extract_strided_slice %94 {offsets = [2, 0, 0, 0], sizes = [1, 1, 8, 32], strides = [1, 1, 1, 1]} : vector<4x1x8x32xf32> to vector<1x1x8x32xf32>
    %100 = vector.shape_cast %99 : vector<1x1x8x32xf32> to vector<1x8x32xf32>
    %101 = vector.extract_strided_slice %94 {offsets = [3, 0, 0, 0], sizes = [1, 1, 8, 32], strides = [1, 1, 1, 1]} : vector<4x1x8x32xf32> to vector<1x1x8x32xf32>
    %102 = vector.shape_cast %101 : vector<1x1x8x32xf32> to vector<1x8x32xf32>
    %103 = tpu.concatenate %96, %98, %100, %102 in 2 : vector<1x8x32xf32>, vector<1x8x32xf32>, vector<1x8x32xf32>, vector<1x8x32xf32> -> vector<1x8x128xf32>
    %104 = vector.shape_cast %103 : vector<1x8x128xf32> to vector<8x128xf32>
    %c0_24 = arith.constant 0 : index
    %c0_25 = arith.constant 0 : index
    %c0_26 = arith.constant 0 : index
    %105 = vector.load %arg7[%c0_24, %c0_25, %c0_26] : memref<1x128x128xf32, #tpu.memory_space<vmem>>, vector<1x128x128xf32>
    %106 = vector.shape_cast %105 : vector<1x128x128xf32> to vector<128x128xf32>
    %cst_27 = arith.constant dense<0.000000e+00> : vector<8x128xf32>
    %107 = tpu.matmul %104, %106, %cst_27 {dimension_numbers = #tpu.dot_dimension_numbers<[1], [0], [0], [1], [0, 0, 1, 1], [], []>} : vector<8x128xf32>, vector<128x128xf32>, vector<8x128xf32> -> vector<8x128xf32>
    %c0_28 = arith.constant 0 : index
    %c0_29 = arith.constant 0 : index
    %c0_30 = arith.constant 0 : index
    %108 = vector.load %arg8[%c0_28, %c0_29, %c0_30] : memref<1x1x128xf32, #tpu.memory_space<vmem>>, vector<1x1x128xf32>
    %109 = vector.shape_cast %108 : vector<1x1x128xf32> to vector<128xf32>
    %110 = vector.shape_cast %109 : vector<128xf32> to vector<1x128xf32>
    %111 = vector.broadcast %110 : vector<1x128xf32> to vector<8x128xf32>
    %112 = arith.addf %107, %111 : vector<8x128xf32>
    %113 = arith.addf %4, %112 : vector<8x128xf32>
    %cst_31 = arith.constant dense<0.000000e+00> : vector<8xf32>
    %114 = vector.multi_reduction <add>, %113, %cst_31 [1] : vector<8x128xf32> to vector<8xf32>
    %115 = vector.shape_cast %114 : vector<8xf32> to vector<8x1xf32>
    %cst_32 = arith.constant 3.125000e-02 : f32
    %116 = vector.broadcast %cst_32 : f32 to vector<8x1xf32>
    %117 = arith.mulf %115, %116 : vector<8x1xf32>
    %118 = vector.broadcast %117 : vector<8x1xf32> to vector<8x128xf32>
    %119 = arith.subf %113, %118 : vector<8x128xf32>
    %120 = vector.broadcast %9 : vector<1x128xf32> to vector<8x128xf32>
    %121 = arith.mulf %119, %120 : vector<8x128xf32>
    %122 = arith.mulf %121, %121 : vector<8x128xf32>
    %cst_33 = arith.constant dense<0.000000e+00> : vector<8xf32>
    %123 = vector.multi_reduction <add>, %122, %cst_33 [1] : vector<8x128xf32> to vector<8xf32>
    %124 = vector.shape_cast %123 : vector<8xf32> to vector<8x1xf32>
    %cst_34 = arith.constant 3.125000e-02 : f32
    %125 = vector.broadcast %cst_34 : f32 to vector<8x1xf32>
    %126 = arith.mulf %124, %125 : vector<8x1xf32>
    %cst_35 = arith.constant 9.99999974E-6 : f32
    %127 = vector.broadcast %cst_35 : f32 to vector<8x1xf32>
    %128 = arith.addf %126, %127 : vector<8x1xf32>
    %129 = math.rsqrt %128 : vector<8x1xf32>
    %130 = vector.broadcast %129 : vector<8x1xf32> to vector<8x128xf32>
    %131 = arith.mulf %121, %130 : vector<8x128xf32>
    %c0_36 = arith.constant 0 : index
    %c0_37 = arith.constant 0 : index
    %c0_38 = arith.constant 0 : index
    %132 = vector.load %arg9[%c0_36, %c0_37, %c0_38] : memref<1x1x128xf32, #tpu.memory_space<vmem>>, vector<1x1x128xf32>
    %133 = vector.shape_cast %132 : vector<1x1x128xf32> to vector<128xf32>
    %134 = vector.shape_cast %133 : vector<128xf32> to vector<1x128xf32>
    %135 = vector.broadcast %134 : vector<1x128xf32> to vector<8x128xf32>
    %136 = arith.mulf %131, %135 : vector<8x128xf32>
    %c0_39 = arith.constant 0 : index
    %c0_40 = arith.constant 0 : index
    %c0_41 = arith.constant 0 : index
    %137 = vector.load %arg10[%c0_39, %c0_40, %c0_41] : memref<1x1x128xf32, #tpu.memory_space<vmem>>, vector<1x1x128xf32>
    %138 = vector.shape_cast %137 : vector<1x1x128xf32> to vector<128xf32>
    %139 = vector.shape_cast %138 : vector<128xf32> to vector<1x128xf32>
    %140 = vector.broadcast %139 : vector<1x128xf32> to vector<8x128xf32>
    %141 = arith.addf %136, %140 : vector<8x128xf32>
    %c0_42 = arith.constant 0 : index
    %c0_43 = arith.constant 0 : index
    %c0_44 = arith.constant 0 : index
    %142 = vector.load %arg11[%c0_42, %c0_43, %c0_44] : memref<1x128x128xf32, #tpu.memory_space<vmem>>, vector<1x128x128xf32>
    %143 = vector.shape_cast %142 : vector<1x128x128xf32> to vector<128x128xf32>
    %cst_45 = arith.constant dense<0.000000e+00> : vector<8x128xf32>
    %144 = tpu.matmul %141, %143, %cst_45 {dimension_numbers = #tpu.dot_dimension_numbers<[1], [0], [0], [1], [0, 0, 1, 1], [], []>} : vector<8x128xf32>, vector<128x128xf32>, vector<8x128xf32> -> vector<8x128xf32>
    %c0_46 = arith.constant 0 : index
    %c0_47 = arith.constant 0 : index
    %c0_48 = arith.constant 0 : index
    %145 = vector.load %arg12[%c0_46, %c0_47, %c0_48] : memref<1x1x128xf32, #tpu.memory_space<vmem>>, vector<1x1x128xf32>
    %146 = vector.shape_cast %145 : vector<1x1x128xf32> to vector<128xf32>
    %147 = vector.shape_cast %146 : vector<128xf32> to vector<1x128xf32>
    %148 = vector.broadcast %147 : vector<1x128xf32> to vector<8x128xf32>
    %149 = arith.addf %144, %148 : vector<8x128xf32>
    %cst_49 = arith.constant 1.702000e+00 : f32
    %150 = vector.broadcast %cst_49 : f32 to vector<8x128xf32>
    %151 = arith.mulf %150, %149 : vector<8x128xf32>
    %152 = arith.negf %151 : vector<8x128xf32>
    %153 = math.exp %152 : vector<8x128xf32>
    %cst_50 = arith.constant 1.000000e+00 : f32
    %154 = vector.broadcast %cst_50 : f32 to vector<8x128xf32>
    %155 = arith.addf %154, %153 : vector<8x128xf32>
    %156 = arith.divf %154, %155 : vector<8x128xf32>
    %157 = arith.mulf %149, %156 : vector<8x128xf32>
    %c0_51 = arith.constant 0 : index
    %c0_52 = arith.constant 0 : index
    %c0_53 = arith.constant 0 : index
    %158 = vector.load %arg13[%c0_51, %c0_52, %c0_53] : memref<1x128x128xf32, #tpu.memory_space<vmem>>, vector<1x128x128xf32>
    %159 = vector.shape_cast %158 : vector<1x128x128xf32> to vector<128x128xf32>
    %cst_54 = arith.constant dense<0.000000e+00> : vector<8x128xf32>
    %160 = tpu.matmul %157, %159, %cst_54 {dimension_numbers = #tpu.dot_dimension_numbers<[1], [0], [0], [1], [0, 0, 1, 1], [], []>} : vector<8x128xf32>, vector<128x128xf32>, vector<8x128xf32> -> vector<8x128xf32>
    %c0_55 = arith.constant 0 : index
    %c0_56 = arith.constant 0 : index
    %c0_57 = arith.constant 0 : index
    %161 = vector.load %arg14[%c0_55, %c0_56, %c0_57] : memref<1x1x128xf32, #tpu.memory_space<vmem>>, vector<1x1x128xf32>
    %162 = vector.shape_cast %161 : vector<1x1x128xf32> to vector<128xf32>
    %163 = vector.shape_cast %162 : vector<128xf32> to vector<1x128xf32>
    %164 = vector.broadcast %163 : vector<1x128xf32> to vector<8x128xf32>
    %165 = arith.addf %160, %164 : vector<8x128xf32>
    %166 = arith.addf %113, %165 : vector<8x128xf32>
    %167 = vector.shape_cast %166 : vector<8x128xf32> to vector<1x8x128xf32>
    %c0_58 = arith.constant 0 : index
    %c0_59 = arith.constant 0 : index
    %c0_60 = arith.constant 0 : index
    %168 = vector.load %arg16[%c0_58, %c0_59, %c0_60] : memref<1x8x128xf32, #tpu.memory_space<vmem>>, vector<1x8x128xf32>
    tpu.vector_store %arg16[%c0_58, %c0_59, %c0_60], %167 {strides = array<i32>} : memref<1x8x128xf32, #tpu.memory_space<vmem>>, vector<1x8x128xf32>,
    %c1_i32 = arith.constant 1 : i32
    %169 = arith.cmpi eq, %arg1, %c1_i32 : i32
    %170 = arith.extui %169 : i1 to i32
    %c0_i32_61 = arith.constant 0 : i32
    %171 = arith.cmpi ne, %170, %c0_i32_61 : i32
    scf.if %171 {
      %c0_62 = arith.constant 0 : index
      %c0_63 = arith.constant 0 : index
      %c0_64 = arith.constant 0 : index
      %172 = vector.load %arg16[%c0_62, %c0_63, %c0_64] : memref<1x8x128xf32, #tpu.memory_space<vmem>>, vector<1x8x128xf32>
      %c0_65 = arith.constant 0 : index
      %c0_66 = arith.constant 0 : index
      %c0_67 = arith.constant 0 : index
      %173 = vector.load %arg15[%c0_65, %c0_66, %c0_67] : memref<1x8x128xf32, #tpu.memory_space<vmem>>, vector<1x8x128xf32>
      tpu.vector_store %arg15[%c0_65, %c0_66, %c0_67], %172 {strides = array<i32>} : memref<1x8x128xf32, #tpu.memory_space<vmem>>, vector<1x8x128xf32>,
    } else {
    }
    return
  }
  func.func @transform_0(%arg0: i32, %arg1: i32) -> (i32, i32, i32) {
    %c0_i32 = arith.constant 0 : i32
    %c0_i32_0 = arith.constant 0 : i32
    %c0_i32_1 = arith.constant 0 : i32
    return %arg0, %c0_i32, %c0_i32_0 : i32, i32, i32
  }
  func.func @transform_1(%arg0: i32, %arg1: i32) -> (i32, i32, i32) {
    %c0_i32 = arith.constant 0 : i32
    %c0_i32_0 = arith.constant 0 : i32
    %c0_i32_1 = arith.constant 0 : i32
    return %arg1, %c0_i32, %c0_i32_0 : i32, i32, i32
  }
  func.func @transform_2(%arg0: i32, %arg1: i32) -> (i32, i32, i32) {
    %c0_i32 = arith.constant 0 : i32
    %c0_i32_0 = arith.constant 0 : i32
    %c0_i32_1 = arith.constant 0 : i32
    return %arg1, %c0_i32, %c0_i32_0 : i32, i32, i32
  }
  func.func @transform_3(%arg0: i32, %arg1: i32) -> (i32, i32, i32) {
    %c0_i32 = arith.constant 0 : i32
    %c0_i32_0 = arith.constant 0 : i32
    %c0_i32_1 = arith.constant 0 : i32
    return %arg1, %c0_i32, %c0_i32_0 : i32, i32, i32
  }
  func.func @transform_4(%arg0: i32, %arg1: i32) -> (i32, i32, i32) {
    %c0_i32 = arith.constant 0 : i32
    %c0_i32_0 = arith.constant 0 : i32
    %c0_i32_1 = arith.constant 0 : i32
    return %arg1, %c0_i32, %c0_i32_0 : i32, i32, i32
  }
  func.func @transform_5(%arg0: i32, %arg1: i32) -> (i32, i32, i32) {
    %c0_i32 = arith.constant 0 : i32
    %c0_i32_0 = arith.constant 0 : i32
    %c0_i32_1 = arith.constant 0 : i32
    return %arg1, %c0_i32, %c0_i32_0 : i32, i32, i32
  }
  func.func @transform_6(%arg0: i32, %arg1: i32) -> (i32, i32, i32) {
    %c0_i32 = arith.constant 0 : i32
    %c0_i32_0 = arith.constant 0 : i32
    %c0_i32_1 = arith.constant 0 : i32
    return %arg1, %c0_i32, %c0_i32_0 : i32, i32, i32
  }
  func.func @transform_7(%arg0: i32, %arg1: i32) -> (i32, i32, i32) {
    %c0_i32 = arith.constant 0 : i32
    %c0_i32_0 = arith.constant 0 : i32
    %c0_i32_1 = arith.constant 0 : i32
    return %arg1, %c0_i32, %c0_i32_0 : i32, i32, i32
  }
  func.func @transform_8(%arg0: i32, %arg1: i32) -> (i32, i32, i32) {
    %c0_i32 = arith.constant 0 : i32
    %c0_i32_0 = arith.constant 0 : i32
    %c0_i32_1 = arith.constant 0 : i32
    return %arg1, %c0_i32, %c0_i32_0 : i32, i32, i32
  }
  func.func @transform_9(%arg0: i32, %arg1: i32) -> (i32, i32, i32) {
    %c0_i32 = arith.constant 0 : i32
    %c0_i32_0 = arith.constant 0 : i32
    %c0_i32_1 = arith.constant 0 : i32
    return %arg1, %c0_i32, %c0_i32_0 : i32, i32, i32
  }
  func.func @transform_10(%arg0: i32, %arg1: i32) -> (i32, i32, i32) {
    %c0_i32 = arith.constant 0 : i32
    %c0_i32_0 = arith.constant 0 : i32
    %c0_i32_1 = arith.constant 0 : i32
    return %arg1, %c0_i32, %c0_i32_0 : i32, i32, i32
  }
  func.func @transform_11(%arg0: i32, %arg1: i32) -> (i32, i32, i32) {
    %c0_i32 = arith.constant 0 : i32
    %c0_i32_0 = arith.constant 0 : i32
    %c0_i32_1 = arith.constant 0 : i32
    return %arg1, %c0_i32, %c0_i32_0 : i32, i32, i32
  }
  func.func @transform_12(%arg0: i32, %arg1: i32) -> (i32, i32, i32) {
    %c0_i32 = arith.constant 0 : i32
    %c0_i32_0 = arith.constant 0 : i32
    %c0_i32_1 = arith.constant 0 : i32
    return %arg1, %c0_i32, %c0_i32_0 : i32, i32, i32
  }
  func.func @transform_13(%arg0: i32, %arg1: i32) -> (i32, i32, i32) {
    %c0_i32 = arith.constant 0 : i32
    %c0_i32_0 = arith.constant 0 : i32
    %c0_i32_1 = arith.constant 0 : i32
    return %arg0, %c0_i32, %c0_i32_0 : i32, i32, i32
  }
}

</mosaic_0001>

<bundles_post_ra>
// kernel: tpu_custom_call.1
= control target key start
LH: loop header
LB: loop body
LE: loop exit
PB: predicated region body
PF: predicated region fallthrough
CT: control target
= control target key end

     0   :  { %s4616_s0 = inlined_call_operand.hbm [shape: f32[2,8,128], index: 0, kind: input, shape index: {}]   ;;  %s4617_s1 = inlined_call_operand.vmem [shape: f32[2,1,128], index: 1, kind: input, shape index: {}]   ;;  %s4618_s2 = inlined_call_operand.vmem [shape: f32[2,1,128], index: 2, kind: input, shape index: {}]   ;;  %s4619_s3 = inlined_call_operand.hbm [shape: f32[2,128,384], index: 3, kind: input, shape index: {}]   ;;  %s4620_s4 = inlined_call_operand.vmem [shape: f32[2,1,384], index: 4, kind: input, shape index: {}]   ;;  %s4621_s5 = inlined_call_operand.hbm [shape: f32[2,128,128], index: 5, kind: input, shape index: {}]   ;;  %s4622_s6 = inlined_call_operand.vmem [shape: f32[2,1,128], index: 6, kind: input, shape index: {}]   ;;  %s4623_s7 = inlined_call_operand.vmem [shape: f32[2,1,128], index: 7, kind: input, shape index: {}]   ;;  %s4624_s8 = inlined_call_operand.vmem [shape: f32[2,1,128], index: 8, kind: input, shape index: {}]   ;;  %s4625_s9 = inlined_call_operand.hbm [shape: f32[2,128,128], index: 9, kind: input, shape index: {}]   ;;  %s4626_s10 = inlined_call_operand.vmem [shape: f32[2,1,128], index: 10, kind: input, shape index: {}]   ;;  %s4627_s11 = inlined_call_operand.hbm [shape: f32[2,128,128], index: 11, kind: input, shape index: {}]   ;;  %s4628_s12 = inlined_call_operand.vmem [shape: f32[2,1,128], index: 12, kind: input, shape index: {}]   ;;  %s4629_s13 = inlined_call_operand.hbm [shape: f32[2,8,128], index: 13, kind: output, shape index: {}]  }
   0x1   :  { %4659 = sst [smem:[#allocation33_spill]] %s4616_s0 }
   0x2   :  { %4660 = sst [smem:[#allocation34_spill]] %s4617_s1 }
   0x3   :  { %4661 = sst [smem:[#allocation35_spill]] %s4618_s2 }
   0x4   :  { %4662 = sst [smem:[#allocation36_spill]] %s4619_s3 }
   0x5   :  { %4663 = sst [smem:[#allocation37_spill]] %s4620_s4 }
   0x6   :  { %4664 = sst [smem:[#allocation38_spill]] %s4621_s5 }
   0x7   :  { %4665 = sst [smem:[#allocation39_spill]] %s4622_s6 }
   0x8   :  { %4666 = sst [smem:[#allocation40_spill]] %s4623_s7 }
   0x9   :  { %4667 = sst [smem:[#allocation41_spill]] %s4624_s8 }
   0xa   :  { %4668 = sst [smem:[#allocation42_spill]] %s4625_s9 }
   0xb   :  { %4669 = sst [smem:[#allocation43_spill]] %s4626_s10 }
   0xc   :  { %4670 = sst [smem:[#allocation44_spill]] %s4627_s11 }
   0xd   :  { %4671 = sst [smem:[#allocation45_spill]] %s4628_s12 }
   0xe   :  { %4672 = sst [smem:[#allocation46_spill]] %s4629_s13 }
   0xf   :  { %18 = vsyncpa [#allocation4], 0 }
  0x10   :  { %20 = vsyncpa [#allocation4 + $0x1], 0 }
  0x11   :  { %21 = vsyncpa [#allocation7], 0 }
  0x12   :  { %23 = vsyncpa [#allocation7 + $0x1], 0 }
  0x13   :  { %24 = vsyncpa [#allocation10], 0 }
  0x14   :  { %26 = vsyncpa [#allocation10 + $0x1], 0 }
  0x15   :  { %27 = vsyncpa [#allocation5], 0 }
  0x16   :  { %29 = vsyncpa [#allocation5 + $0x1], 0  ;;  %s3780_s25 = smov 0   ;;  %s3782_s26 = smov 0  }
  0x17   :  { %s3784_s27 = smov 0   ;;  %s3786_s28 = smov 0  }
  0x18   :  { %s3788_s29 = smov 0   ;;  %s3790_s30 = smov 0  }
  0x19   :  { %s3792_s14 = smov 0   ;;  %s3794_s15 = smov 0  }
  0x1a   :  { %s3796_s16 = smov 0   ;;  %s3798_s17 = smov 0  }
  0x1b   :  { %s3800_s18 = smov 0  }
  0x1c LB: > { %4673 = sst [smem:[#allocation17_spill]] %s3654_s26  ;;  %p4633_p0 = scmp.eq.s32.totalorder %s3690_s18, 0  ;;  %s3690_s18 = sphi %s3800_s18, %s35_s18   ;;  %s3686_s17 = sphi %s3798_s17, %s4759_s17   ;;  %s3682_s16 = sphi %s3796_s16, %s4758_s16   ;;  %s3678_s15 = sphi %s3794_s15, %s4757_s15   ;;  %s3674_s14 = sphi %s3792_s14, %s4756_s14   ;;  %s3670_s30 = sphi %s3790_s30, %s4755_s30   ;;  %s3666_s29 = sphi %s3788_s29, %s4754_s29   ;;  %s3662_s28 = sphi %s3786_s28, %s4753_s28   ;;  %s3658_s27 = sphi %s3784_s27, %s4752_s27   ;;  %s3654_s26 = sphi %s3782_s26, %s4751_s26   ;;  %s3650_s25 = sphi %s3780_s25, %s4750_s25  }
  0x1d   : > { %4674 = sst [smem:[#allocation18_spill]] %s3658_s27  ;;  %p139_p1 = scmp.ne.s32.totalorder %s3658_s27, %s3654_s26 }
  0x1e   : > { %4675 = sst [smem:[#allocation19_spill]] %s3662_s28  ;;  %p4632_p4 = scmp.lt.s32.totalorder %s3690_s18, 4 }
  0x1f   : > { %4676 = sst [smem:[#allocation20_spill]] %s3666_s29  ;;  %p141_p3 = por %p139_p1, %p4633_p0 }
  0x20   : > { %4677 = sst [smem:[#allocation21_spill]] %s3670_s30  ;;  %s4631_s22 = sand.u32 1, %s3658_s27  }
  0x21   : > { %4678 = sst [smem:[#allocation22_spill]] %s3674_s14  ;;  %s3248_s23 = smul.u32 384, %s4631_s22 }
  0x22   : > { %4679 = sst [smem:[#allocation23_spill]] %s3678_s15  ;;  %s3249_s24 = smul.u32 6144, %s3682_s16 }
  0x23   : > { %4680 = sst [smem:[#allocation24_spill]] %s3682_s16  ;;  %p3852_p5 = pnand %p4632_p4, %p141_p3 }
  0x24   : > { %4681 = sst [smem:[#allocation25_spill]] %s3686_s17  ;;  %s463_s21 = scalar_lea.vmem [#allocation6], %s3248_s23 }
  0x25   : > { %4682 = sst [smem:[#allocation26_spill]] %s3690_s18  ;;  %s470_s12 = sshll.u32 %s463_s21, 4  ;;  %s3861_s12 = int_to_ptr.vmem [resolvable:$true] %s470_s12 }
  0x26   : > { %s4683_s13 = scalar_select %p3852_p5, 1, 0 }
  0x27   : > { %s4684_s3 = sld [smem:[#allocation36_spill]]  ;;  %s4685_s22 = sand.u32 1, %s3690_s18  }
  0x28   : > { %s3866_s10 = scalar_lea.sflag [#allocation7], %s4685_s22  ;;  %p3872_p8 = pneg %p3852_p5 }
  0x2d   : > { %s3859_s20 = scalar_lea.hbm %s4684_s3, %s3249_s24  ;;  %s3415_s21 = scalar_lea.hbm %s4684_s3, 12288 }
  0x2e   : > { %s3410_s4 = scalar_lea.hbm %s3859_s20, 6144  ;;  %p3416_p11 = scmp.lt.u32.totalorder %s3859_s20, %s4684_s3 }
  0x2f   : > { %p3411_p7 = scmp.ne.s32.totalorder %s3859_s20, %s3410_s4  ;;  %p3417_p12 = scmp.lt.u32.totalorder %s3415_s21, %s3410_s4 }
  0x30   : > { %p3419_p1 = scmp.lt.u32.totalorder %s3410_s4, %s3859_s20 }
  0x31   : > { %p3413_p9 = pnand %p3872_p8, %p3411_p7  ;;  %p3418_p13 = por %p3417_p12, %p3416_p11 }
  0x33   : > { %p3414_p10 = pneg %p3413_p9  ;;  %p3420_p3 = por %p3419_p1, %p3418_p13 }
  0x35   : > { %p3421_p4 = pnand %p3420_p3, %p3414_p10 }
  0x37   : > { %3424 = shalt.err (!%p3421_p4)
}
  0x38   : > { %s3425_s22 = scalar_lea.vmem %s3861_s12, 6144  ;;  %s3692_s19 = smov [#allocation6]  }
  0x39   : > { %p3426_p7 = scmp.ne.s32.totalorder %s3861_s12, %s3425_s22  ;;  %s3430_s23 = sshll.u32 %s3692_s19, 4  ;;  %s3431_s23 = int_to_ptr.vmem [resolvable:$false] %s3430_s23 }
  0x3a   : > { %s3432_s8 = scalar_lea.vmem %s3431_s23, 12288  ;;  %p3433_p0 = scmp.lt.s32.totalorder %s3861_s12, %s3431_s23 }
  0x3b   : > { %p3428_p9 = pnand %p3426_p7, %p3872_p8  ;;  %p3434_p6 = scmp.lt.s32.totalorder %s3432_s8, %s3425_s22 }
  0x3d   : > { %p3429_p2 = pneg %p3428_p9  ;;  %p3435_p11 = por %p3434_p6, %p3433_p0 }
  0x3f   : > { %p3436_p12 = pnand %p3435_p11, %p3429_p2 }
  0x41   : > { %3439 = shalt.err (!%p3436_p12)
}
  0x42   : > { %s3693_s4 = smov 384   ;;  %s3694_s21 = smov 24  }
  0x43   : > { %3270 = dma.hbm_to_vmem [thread:$0]  (!%p3852_p5), %s3859_s20, 6144, %s3861_s12, %s3866_s10, %s3693_s4, %s3693_s4, %s3694_s21  }
  0x44   : > { %p578_p4 = scmp.lt.s32.totalorder %s3690_s18, 5  ;;  %s4687_s24 = sand.u32 1, %s3658_s27  }
  0x45   : > { %s3899_s22 = sshll.u32 %s4687_s24, 7  ;;  %s3902_s19 = sshll.u32 %s3682_s16, 11 }
  0x46   : > { %p4688_p0 = scmp.ge.s32.totalorder %s3690_s18, 1  ;;  %s4690_s9 = sld [smem:[#allocation42_spill]] }
  0x47   : > { %s530_s12 = scalar_lea.vmem [#allocation9], %s3899_s22  ;;  %s4691_s4 = sand.u32 1, %s3690_s18  }
  0x48   : > { %p3906_p2 = pnand %p4688_p0, %p578_p4  ;;  %s537_s20 = sshll.u32 %s530_s12, 4  ;;  %s3917_s20 = int_to_ptr.vmem [resolvable:$true] %s537_s20 }
  0x49   : > { %s3921_s21 = scalar_lea.sflag [#allocation10], %s4691_s4 }
  0x4a   : > { %s4689_s23 = scalar_select %p3906_p2, 1, 0 }
  0x4c   : > { %s3914_s7 = scalar_lea.hbm %s4690_s9, %s3902_s19  ;;  %s3445_s8 = scalar_lea.hbm %s4690_s9, 4096 }
  0x4d   : > { %s3440_s24 = scalar_lea.hbm %s3914_s7, 2048  ;;  %p3446_p1 = scmp.lt.u32.totalorder %s3914_s7, %s4690_s9 }
  0x4e   : > { %p3441_p6 = scmp.ne.s32.totalorder %s3914_s7, %s3440_s24  ;;  %p3447_p3 = scmp.lt.u32.totalorder %s3445_s8, %s3440_s24 }
  0x4f   : > { %p3449_p9 = scmp.lt.u32.totalorder %s3440_s24, %s3914_s7 }
  0x50   : > { %p3443_p10 = pnand %p3441_p6, %p3872_p8  ;;  %p3448_p7 = por %p3447_p3, %p3446_p1 }
  0x52   : > { %p3444_p13 = pneg %p3443_p10  ;;  %p3450_p11 = por %p3449_p9, %p3448_p7 }
  0x54   : > { %p3451_p12 = pnand %p3450_p11, %p3444_p13 }
  0x56   : > { %3454 = shalt.err (!%p3451_p12)
}
  0x57   : > { %s3455_s12 = scalar_lea.vmem %s3917_s20, 2048  ;;  %s3695_s6 = smov [#allocation9]  }
  0x58   : > { %p3456_p4 = scmp.ne.s32.totalorder %s3917_s20, %s3455_s12  ;;  %s3460_s4 = sshll.u32 %s3695_s6, 4  ;;  %s3461_s4 = int_to_ptr.vmem [resolvable:$false] %s3460_s4 }
  0x59   : > { %s3462_s1 = scalar_lea.vmem %s3461_s4, 4096  ;;  %p3463_p10 = scmp.lt.s32.totalorder %s3917_s20, %s3461_s4 }
  0x5a   : > { %p3458_p0 = pnand %p3456_p4, %p3872_p8  ;;  %p3464_p2 = scmp.lt.s32.totalorder %s3462_s1, %s3455_s12 }
  0x5c   : > { %p3459_p6 = pneg %p3458_p0  ;;  %p3465_p1 = por %p3464_p2, %p3463_p10 }
  0x5e   : > { %p3466_p3 = pnand %p3465_p1, %p3459_p6 }
  0x60   : > { %3469 = shalt.err (!%p3466_p3)
}
  0x61   : > { %s4634_s2 = smov 128   ;;  %s4636_s24 = smov 8  }
  0x62   : > { %3276 = dma.hbm_to_vmem [thread:$0]  (!%p3852_p5), %s3914_s7, 2048, %s3917_s20, %s3921_s21, %s4634_s2, %s4634_s2, %s4636_s24  }
  0x63   : > { %s3949_s3 = sadd.s32 4294967295, %s3690_s18   ;;  %s2797_s8 = sadd.s32 4294967294, %s3690_s18  }
  0x64   : > { %s4692_s12 = sadd.s32 1, %s3682_s16  ;;  %s47_s6 = sadd.s32 1, %s3686_s17 }
  0x65   : > { %p45_p2 = scmp.ge.s32.totalorder %s4692_s12, 2  ;;  %s54_s4 = sadd.s32 1, %s3670_s30 }
  0x66   : > { %s4693_s1 = smov %s4692_s12  ;;  %p61_p13 = scmp.ne.s32.totalorder %s3670_s30, %s3666_s29 }
  0x67   : > { %s4761_s1 = smov (%p45_p2, %s4693_s1), 0  ;;  %s4763_s6 = smov (!%p45_p2, %s47_s6), %s3686_s17 }
  0x68   : > { %4694 = sst [smem:[#allocation27_spill]] %s4761_s1  ;;  %p67_p7 = scmp.ne.s32.totalorder %s3666_s29, %s3662_s28 }
  0x69   : > { %p49_p9 = scmp.ge.s32.totalorder %s4763_s6, 2  ;;  %p68_p11 = scmp.eq.s32.totalorder %s3949_s3, 0 }
  0x6a   : > { %p4695_p12 = scmp.eq.s32.totalorder %s3690_s18, 0  ;;  %s129_s20 = ssub.s32 %s3682_s16, %s4761_s1 }
  0x6b   : > { %s4765_s6 = smov (%p49_p9, %s4763_s6), 0  ;;  %p3982_p0 = por %p68_p11, %p67_p7 }
  0x6c   : > { %p3971_p4 = por %p4695_p12, %p61_p13  ;;  %4697 = sst [smem:[#allocation28_spill]] %s4765_s6 }
  0x6d   : > { %s4698_s12 = scalar_select %p3982_p0, 1, 0 }
  0x6e   : > { %p130_p6 = scmp.eq.s32.totalorder %s129_s20, 0  ;;  %s51_s2 = ssub.s32 %s3686_s17, %s4765_s6 }
  0x6f   : > { %p4699_p10 = scmp.ne.s32.totalorder %s3654_s26, %s3650_s25  ;;  %p52_p3 = scmp.eq.s32.totalorder %s51_s2, 0 }
  0x70   : > { %p403_p2 = scmp.eq.s32.totalorder %s3949_s3, 3  ;;  %s4702_s9 = sadd.s32 1, %s3658_s27 }
  0x71   : > { %p3991_p1 = por %p4699_p10, %p68_p11  ;;  %p409_p12 = scmp.eq.s32.totalorder %s2797_s8, 3 }
  0x72   : > { %s3999_s1 = scalar_select %p130_p6, %s3658_s27, %s4702_s9  }
  0x73   : > { %s4700_s24 = scalar_select %p3991_p1, 1, 0 }
  0x74   : > { %4703 = sst [smem:[#allocation30_spill]] %s3999_s1  ;;  %p4007_p9 = por %p403_p2, %p61_p13 }
  0x75   : > { %4701 = sst [smem:[#allocation29_spill]] %s4700_s24  ;;  %s429_s20 = sand.u32 1, %s3670_s30  }
  0x76   : > { %s4002_s16 = scalar_select %p52_p3, %s3670_s30, %s54_s4  }
  0x77   : > { %s4705_s14 = scalar_select %p4007_p9, 1, 0 }
  0x78   : > { %4704 = sst [smem:[#allocation31_spill]] %s4002_s16  ;;  %s2801_s6 = sshll.u32 %s3686_s17, 7 }
  0x79   : > { %p4016_p11 = por %p409_p12, %p67_p7  ;;  %s2800_s2 = sshll.u32 %s429_s20, 3 }
  0x7a   : > { %s4708_s0 = sld [smem:[#allocation33_spill]]  ;;  %p4709_p6 = scmp.lt.s32.totalorder %s3690_s18, 4 }
  0x7b   : > { %s4706_s25 = scalar_select %p4016_p11, 1, 0 }
  0x7c   : > { %p4029_p13 = pnand %p4709_p6, %p3971_p4  ;;  %s433_s4 = scalar_lea.vmem [#allocation3], %s2800_s2 }
  0x7d   : > { %4707 = sst [smem:[#allocation32_spill]] %s4706_s25  ;;  %s440_s17 = sshll.u32 %s433_s4, 4  ;;  %s4033_s17 = int_to_ptr.vmem [resolvable:$true] %s440_s17 }
  0x7e   : > { %s430_s16 = scalar_lea.sflag [#allocation4], %s429_s20  ;;  %p3472_p10 = pneg %p4029_p13 }
  0x80   : > { %s4023_s9 = scalar_lea.hbm %s4708_s0, %s2801_s6  ;;  %s3475_s7 = scalar_lea.hbm %s4708_s0, 256 }
  0x81   : > { %s3470_s26 = scalar_lea.hbm %s4023_s9, 128  ;;  %p3476_p4 = scmp.lt.u32.totalorder %s4023_s9, %s4708_s0 }
  0x82   : > { %p3471_p7 = scmp.ne.s32.totalorder %s4023_s9, %s3470_s26  ;;  %p3477_p12 = scmp.lt.u32.totalorder %s3475_s7, %s3470_s26 }
  0x83   : > { %p3479_p11 = scmp.lt.u32.totalorder %s3470_s26, %s4023_s9 }
  0x84   : > { %p3473_p3 = pnand %p3472_p10, %p3471_p7  ;;  %p3478_p6 = por %p3477_p12, %p3476_p4 }
  0x86   : > { %p3474_p2 = pneg %p3473_p3  ;;  %p3480_p9 = por %p3479_p11, %p3478_p6 }
  0x88   : > { %p3481_p1 = pnand %p3480_p9, %p3474_p2 }
  0x8a   : > { %3484 = shalt.err (!%p3481_p1)
}
  0x8b   : > { %s3485_s20 = scalar_lea.vmem %s4033_s17, 128  ;;  %s3698_s2 = smov [#allocation3]  }
  0x8c   : > { %p3486_p7 = scmp.ne.s32.totalorder %s4033_s17, %s3485_s20  ;;  %s3490_s4 = sshll.u32 %s3698_s2, 4  ;;  %s3491_s4 = int_to_ptr.vmem [resolvable:$false] %s3490_s4 }
  0x8d   : > { %s3492_s30 = scalar_lea.vmem %s3491_s4, 256  ;;  %p3493_p5 = scmp.lt.s32.totalorder %s4033_s17, %s3491_s4 }
  0x8e   : > { %p3488_p3 = pnand %p3486_p7, %p3472_p10  ;;  %p3494_p4 = scmp.lt.s32.totalorder %s3492_s30, %s3485_s20 }
  0x90   : > { %p3489_p0 = pneg %p3488_p3  ;;  %p3495_p12 = por %p3494_p4, %p3493_p5 }
  0x92   : > { %p3496_p11 = pnand %p3495_p12, %p3489_p0 }
  0x94   : > { %3499 = shalt.err (!%p3496_p11)
}
  0x95   : > { %3267 = dma.hbm_to_vmem [thread:$0]  (!%p4029_p13), %s4023_s9, 128, %s4033_s17, %s430_s16  }
  0x96   : > { %s4711_s5 = sld [smem:[#allocation38_spill]]  ;;  %s491_s6 = scalar_lea.vmem [#allocation8], %s3899_s22 }
  0x97   : > { %s498_s7 = sshll.u32 %s491_s6, 4  ;;  %s4067_s7 = int_to_ptr.vmem [resolvable:$true] %s498_s7 }
  0x9c   : > { %s4064_s24 = scalar_lea.hbm %s4711_s5, %s3902_s19  ;;  %s3505_s17 = scalar_lea.hbm %s4711_s5, 4096 }
  0x9d   : > { %s3500_s8 = scalar_lea.hbm %s4064_s24, 2048  ;;  %p3506_p9 = scmp.lt.u32.totalorder %s4064_s24, %s4711_s5 }
  0x9e   : > { %p3501_p5 = scmp.ne.s32.totalorder %s4064_s24, %s3500_s8  ;;  %p3507_p13 = scmp.lt.u32.totalorder %s3505_s17, %s3500_s8 }
  0x9f   : > { %p3509_p2 = scmp.lt.u32.totalorder %s3500_s8, %s4064_s24 }
  0xa0   : > { %p3503_p0 = pnand %p3501_p5, %p3872_p8  ;;  %p3508_p10 = por %p3507_p13, %p3506_p9 }
  0xa2   : > { %p3504_p1 = pneg %p3503_p0  ;;  %p3510_p6 = por %p3509_p2, %p3508_p10 }
  0xa4   : > { %p3511_p7 = pnand %p3510_p6, %p3504_p1 }
  0xa6   : > { %3514 = shalt.err (!%p3511_p7)
}
  0xa7   : > { %s3515_s4 = scalar_lea.vmem %s4067_s7, 2048  ;;  %s3699_s30 = smov [#allocation8]  }
  0xa8   : > { %p3516_p3 = scmp.ne.s32.totalorder %s4067_s7, %s3515_s4  ;;  %s3520_s1 = sshll.u32 %s3699_s30, 4  ;;  %s3521_s1 = int_to_ptr.vmem [resolvable:$false] %s3520_s1 }
  0xa9   : > { %s3522_s26 = scalar_lea.vmem %s3521_s1, 4096  ;;  %p3523_p11 = scmp.lt.s32.totalorder %s4067_s7, %s3521_s1 }
  0xaa   : > { %p3518_p4 = pnand %p3516_p3, %p3872_p8  ;;  %p3524_p5 = scmp.lt.s32.totalorder %s3522_s26, %s3515_s4 }
  0xac   : > { %p3519_p12 = pneg %p3518_p4  ;;  %p3525_p0 = por %p3524_p5, %p3523_p11 }
  0xae   : > { %p3526_p9 = pnand %p3525_p0, %p3519_p12 }
  0xb0   : > { %3529 = shalt.err (!%p3526_p9)
}
  0xb1   : > { %p4712_p1 = scmp.ne.s32.totalorder %s4683_s13, 0  ;;  %s4713_s6 = smov 8  }
  0xb2   : > { %s4714_s8 = smov 128   ;;  %s4715_s11 = sld [smem:[#allocation44_spill]] }
  0xb3   : > { %3273 = dma.hbm_to_vmem [thread:$0]  (!%p4712_p1), %s4064_s24, 2048, %s4067_s7, %s3866_s10, %s4714_s8, %s4714_s8, %s4713_s6  }
  0xb4   : > { %s557_s9 = scalar_lea.vmem [#allocation11], %s3899_s22 }
  0xb5   : > { %s564_s2 = sshll.u32 %s557_s9, 4  ;;  %s4101_s2 = int_to_ptr.vmem [resolvable:$true] %s564_s2 }
  0xb8   : > { %s4098_s17 = scalar_lea.hbm %s4715_s11, %s3902_s19  ;;  %s3535_s24 = scalar_lea.hbm %s4715_s11, 4096 }
  0xb9   : > { %s3530_s4 = scalar_lea.hbm %s4098_s17, 2048  ;;  %p3536_p6 = scmp.lt.u32.totalorder %s4098_s17, %s4715_s11 }
  0xba   : > { %p3531_p13 = scmp.ne.s32.totalorder %s4098_s17, %s3530_s4  ;;  %p3537_p7 = scmp.lt.u32.totalorder %s3535_s24, %s3530_s4 }
  0xbb   : > { %p3539_p4 = scmp.lt.u32.totalorder %s3530_s4, %s4098_s17 }
  0xbc   : > { %p3533_p10 = pnand %p3531_p13, %p3872_p8  ;;  %p3538_p3 = por %p3537_p7, %p3536_p6 }
  0xbe   : > { %p3534_p2 = pneg %p3533_p10  ;;  %p3540_p12 = por %p3539_p4, %p3538_p3 }
  0xc0   : > { %p3541_p11 = pnand %p3540_p12, %p3534_p2 }
  0xc2   : > { %3544 = shalt.err (!%p3541_p11)
}
  0xc3   : > { %s3545_s22 = scalar_lea.vmem %s4101_s2, 2048  ;;  %s3700_s1 = smov [#allocation11]  }
  0xc4   : > { %p3546_p5 = scmp.ne.s32.totalorder %s4101_s2, %s3545_s22  ;;  %s3550_s26 = sshll.u32 %s3700_s1, 4  ;;  %s3551_s26 = int_to_ptr.vmem [resolvable:$false] %s3550_s26 }
  0xc5   : > { %s3552_s20 = scalar_lea.vmem %s3551_s26, 4096  ;;  %p3553_p13 = scmp.lt.s32.totalorder %s4101_s2, %s3551_s26 }
  0xc6   : > { %p3548_p0 = pnand %p3546_p5, %p3872_p8  ;;  %p3554_p10 = scmp.lt.s32.totalorder %s3552_s20, %s3545_s22 }
  0xc8   : > { %p3549_p9 = pneg %p3548_p0  ;;  %p3555_p6 = por %p3554_p10, %p3553_p13 }
  0xca   : > { %p3556_p7 = pnand %p3555_p6, %p3549_p9 }
  0xcc   : > { %3559 = shalt.err (!%p3556_p7)
}
  0xcd   : > { %3279 = dma.hbm_to_vmem [thread:$0]  (!%p4712_p1), %s4098_s17, 2048, %s4101_s2, %s3921_s21, %s4714_s8, %s4714_s8, %s4713_s6  }
  0xce   : > { %p4716_p8 = scmp.ne.s32.totalorder %s4689_s23, 0 }
  0xcf   : > { %s4131_s15 = sand.u32 (!%p4716_p8), 1, %s3666_s29   ;;  %p4717_p2 = scmp.ne.s32.totalorder (!%p4716_p8), %s4698_s12, 0 }
  0xd0   : > { %582 = sbr.rel (%p4716_p8) target bundleno = 2883 (0xb43), region = 72  ;;  %s4652_s16 = sshll.u32 (!%p4716_p8), %s4131_s15, 3 }
  0xd1   : > { %s585_s9 = scalar_lea.sflag (!%p4716_p8), [#allocation4], %s4131_s15  ;;  %s4137_s13 = scalar_lea.vmem (!%p4716_p8), [#allocation3], %s4652_s16 }
  0xd7   : > { %3633 = dma.done.wait (%p4717_p2), %s585_s9, 128  }
  0xd8   : > { %3635 = vsyncadd (%p4717_p2), %s585_s9, 4294967168  ;;  %s4718_s23 = sld [smem:[#allocation17_spill]]  ;;  %s4719_s21 = sld [smem:[#allocation29_spill]] }
  0xd9   : > { %s593_s6 = sand.u32 1, %s3949_s3  }
  0xda   : > { %s594_s2 = scalar_lea.sflag [#allocation7], %s593_s6 }
  0xde   : > { %s595_s8 = sand.u32 1, %s4718_s23   ;;  %p4720_p1 = scmp.ne.s32.totalorder %s4719_s21, 0 }
  0xdf   : > { %s3250_s17 = smul.u32 384, %s595_s8 }
  0xe1   : > { %s4145_s4 = scalar_lea.vmem [#allocation6], %s3250_s17 }
  0xe2   : > { %3637 = dma.done.wait (%p4720_p1), %s594_s2, 8192  }
  0xe3   : > { %3639 = vsyncadd (%p4720_p1), %s594_s2, 4294959104  ;;  %s2814_s30 = sshll.u32 %s595_s8, 7  ;;  %s612_s12 = scalar_lea.sflag [#allocation10], %s593_s6 }
  0xe4   : > { %s4151_s10 = scalar_lea.vmem [#allocation8], %s2814_s30  ;;  %s4153_s24 = scalar_lea.vmem [#allocation9], %s2814_s30 }
  0xe5   : > { %3641 = dma.done.wait (%p4720_p1), %s612_s12, 4096  }
  0xe6   : > { %3643 = vsyncadd (%p4720_p1), %s612_s12, 4294963200  ;;  %s4721_s3 = sld [smem:[#allocation22_spill]]  ;;  %s4725_s19 = sld [smem:[#allocation40_spill]] }
  0xe7   : > { %s4726_s29 = sld [smem:[#allocation41_spill]]  ;;  %s4727_s1 = sld [smem:[#allocation37_spill]] }
  0xe8   : > { %s4728_s23 = sld [smem:[#allocation43_spill]]  ;;  %s4729_s17 = sld [smem:[#allocation45_spill]] }
  0xe9   : > { %s4197_s12 = scalar_lea.vmem [#allocation11], %s2814_s30  ;;  %s4730_s0 = sshll.u32 %s4131_s15, 3 }
  0xea   : > { %s4201_s16 = scalar_lea.vmem [#allocation12], %s4730_s0 }
  0xec   : > { %p712_p3 = scmp.lt.s32.totalorder %s4721_s3, 1  ;;  %p2818_p4 = scmp.ne.s32.totalorder %s4721_s3, 0 }
  0xed   : > { %v741_v0 = vld [vmem:[%s4137_s13] sm:$0xff] (!%p2818_p4) }
  0xee   : > { %s4161_s7 = scalar_select %p712_p3, %s4721_s3, 1 }
  0xef   : > { %740 = sbr.rel (%p2818_p4) target bundleno = 246 (0xf6), region = 96  ;;  %742 = vst [vmem:[#allocation2] sm:$0xff] (!%p2818_p4), %v741_v0 }
  0xf0   : > { %s3251_s6 = smul.u32 3, %s4161_s7  ;;  %s727_s22 = scalar_lea.vmem %s4725_s19, %s4161_s7 }
  0xf1   : > { %s730_s27 = scalar_lea.vmem %s4726_s29, %s4161_s7  ;;  %s733_s21 = scalar_lea.vmem %s4728_s23, %s4161_s7 }
  0xf2   : > { %s4187_s26 = scalar_lea.vmem %s4727_s1, %s3251_s6  ;;  %s736_s2 = scalar_lea.vmem %s4729_s17, %s4161_s7 }
  0xf6 PF: > { %v4205_v1 = vld [vmem:[#allocation2] sm:$0xff]  ;;  %v3701_v2 = vmov 0.0   ;;  %v781_v4 = vld [vmem:[%s4145_s4 + $0x20] sm:$0xff]  ;;  %v3702_v7 = vmov 0.0|0.0   ;;  %v780_v8 = vld [vmem:[%s4145_s4 + $0x18] sm:$0xff]  ;;  %v744_v31 = vlaneseq  ;;  %vm3703_vm1 = vmmov 0  }
  0xf7   : > { %749 = vadd.xlane.f32.xlu0 %v4205_v1  ;;  %906 = vmatprep.mubr.f32.mxu0 %v3701_v2  ;;  %v778_v3 = vld [vmem:[%s4145_s4 + $0x8] sm:$0xff]  ;;  %v777_v5 = vld [vmem:[%s4145_s4] sm:$0xff]  ;;  %v779_v9 = vld [vmem:[%s4145_s4 + $0x10] sm:$0xff]  ;;  %s4731_s28 = sld [smem:[#allocation34_spill]]  ;;  %s4733_s13 = sld [smem:[#allocation35_spill]]  ;;  %vm1421_vm2 = vcmask 261120  }
  0xf8   : > { %v3120_v6 = vpack.c.bf16 %v781_v4, %v778_v3  ;;  %3152 = vmatprep.subr.bf16.mxu1 %v3702_v7  ;;  %v782_v10 = vld [vmem:[%s4145_s4 + $0x28] sm:$0xff]  ;;  %v3122_v11 = vpack.c.bf16 %v780_v8, %v777_v5  ;;  %v784_v13 = vld [vmem:[%s4145_s4 + $0x38] sm:$0xff]  ;;  %v787_v14 = vld [vmem:[%s4145_s4 + $0x50] sm:$0xff]  ;;  %v745_v32 = vand.u32 127, %v744_v31  ;;  %2972 = vmatprep.mubr.msk.f32.mxu1 %vm3703_vm1, %v3701_v2  ;;  %s3704_s30 = smov 32   ;;  %s3705_s3 = smov 96  }
  0xf9   : > { %v3153_v12 = vpack.c.bf16 %v782_v10, %v779_v9  ;;  %v783_v15 = vld [vmem:[%s4145_s4 + $0x30] sm:$0xff]  ;;  %v3124_v16 = vpack.c.bf16 %v787_v14, %v784_v13  ;;  %v786_v17 = vld [vmem:[%s4145_s4 + $0x48] sm:$0xff]  ;;  %v785_v18 = vld [vmem:[%s4145_s4 + $0x40] sm:$0xff]  ;;  %vm1726_vm3 = vcmask 64512   ;;  %vm2212_vm4 = vcmask 523264   ;;  %s4735_s19 = sld [smem:[#allocation39_spill]] }
  0xfa   : > { %3121 = vmatprep.subr.bf16.mxu0 %v3120_v6  ;;  %v788_v19 = vld [vmem:[%s4145_s4 + $0x58] sm:$0xff]  ;;  %v3126_v20 = vpack.c.bf16 %v786_v17, %v783_v15  ;;  %v790_v22 = vld [vmem:[%s4145_s4 + $0x68] sm:$0xff]  ;;  %v793_v23 = vld [vmem:[%s4145_s4 + $0x80] sm:$0xff]  ;;  %vm746_vm0 = vcmp.lt.s32.totalorder %v745_v32, 32  ;;  %vm2214_vm5 = vcmask 785408  }
  0xfb   : > { %3123 = vmatpush1.bf16.msra.mxu0 %v3122_v11  ;;  %3154 = vmatpush3.bf16.msra.mxu1 %v3153_v12  ;;  %v3156_v21 = vpack.c.bf16 %v788_v19, %v785_v18  ;;  %v789_v24 = vld [vmem:[%s4145_s4 + $0x60] sm:$0xff]  ;;  %v3128_v25 = vpack.c.bf16 %v793_v23, %v790_v22  ;;  %v792_v26 = vld [vmem:[%s4145_s4 + $0x78] sm:$0xff]  ;;  %v791_v27 = vld [vmem:[%s4145_s4 + $0x70] sm:$0xff]  ;;  %v4233_v35 = vsel %vm746_vm0, 1.0, %v3701_v2 }
  0xfc   : > { %3125 = vmatprep.subr.bf16.mxu0 %v3124_v16  ;;  %3155 = vmatprep.subr.bf16.mxu1 %v3702_v7  ;;  %v794_v28 = vld [vmem:[%s4145_s4 + $0x88] sm:$0xff]  ;;  %v3130_v29 = vpack.c.bf16 %v792_v26, %v789_v24  ;;  %v796_v39 = vld [vmem:[%s4145_s4 + $0x98] sm:$0xff]  ;;  %v799_v40 = vld [vmem:[%s4145_s4 + $0xb0] sm:$0xff] }
  0xfd   : > { %v3159_v30 = vpack.c.bf16 %v794_v28, %v791_v27  ;;  %v3132_v41 = vpack.c.bf16 %v799_v40, %v796_v39  ;;  %v795_v42 = vld [vmem:[%s4145_s4 + $0x90] sm:$0xff]  ;;  %v798_v43 = vld [vmem:[%s4145_s4 + $0xa8] sm:$0xff]  ;;  %v797_v44 = vld [vmem:[%s4145_s4 + $0xa0] sm:$0xff]  ;;  %s4732_s29 = scalar_lea.vmem %s4731_s28, %s4161_s7 }
  0xfe   : > { %v3134_v45 = vpack.c.bf16 %v798_v43, %v795_v42  ;;  %v800_v46 = vld [vmem:[%s4145_s4 + $0xb8] sm:$0xff]  ;;  %v802_v48 = vld [vmem:[%s4145_s4 + $0xc8] sm:$0xff]  ;;  %v805_v49 = vld [vmem:[%s4145_s4 + $0xe0] sm:$0xff] }
  0xff   : > { %3127 = vmatpush1.bf16.msra.mxu0 %v3126_v20  ;;  %3157 = vmatpush3.bf16.msra.mxu1 %v3156_v21  ;;  %v3162_v47 = vpack.c.bf16 %v800_v46, %v797_v44  ;;  %v3136_v50 = vpack.c.bf16 %v805_v49, %v802_v48  ;;  %v801_v51 = vld [vmem:[%s4145_s4 + $0xc0] sm:$0xff]  ;;  %v804_v52 = vld [vmem:[%s4145_s4 + $0xd8] sm:$0xff]  ;;  %v803_v53 = vld [vmem:[%s4145_s4 + $0xd0] sm:$0xff]  ;;  %s4736_s1 = scalar_lea.vmem %s4735_s19, %s4161_s7 }
 0x100   : > { %3129 = vmatprep.subr.bf16.mxu0 %v3128_v25  ;;  %3158 = vmatprep.subr.bf16.mxu1 %v3702_v7  ;;  %v3138_v54 = vpack.c.bf16 %v804_v52, %v801_v51  ;;  %v806_v55 = vld [vmem:[%s4145_s4 + $0xe8] sm:$0xff]  ;;  %v808_v56 = vld [vmem:[%s4145_s4 + $0xf8] sm:$0xff]  ;;  %v811_v57 = vld [vmem:[%s4145_s4 + $0x110] sm:$0xff] }
 0x101   : > { %v3165_v58 = vpack.c.bf16 %v806_v55, %v803_v53  ;;  %v3140_v59 = vpack.c.bf16 %v811_v57, %v808_v56  ;;  %v807_v60 = vld [vmem:[%s4145_s4 + $0xf0] sm:$0xff]  ;;  %v810_v61 = vld [vmem:[%s4145_s4 + $0x108] sm:$0xff]  ;;  %v809_v62 = vld [vmem:[%s4145_s4 + $0x100] sm:$0xff] }
 0x102   : > { %v3142_v63 = vpack.c.bf16 %v810_v61, %v807_v60  ;;  %v812_v0 = vld [vmem:[%s4145_s4 + $0x118] sm:$0xff]  ;;  %v814_v3 = vld [vmem:[%s4145_s4 + $0x128] sm:$0xff]  ;;  %v817_v4 = vld [vmem:[%s4145_s4 + $0x140] sm:$0xff] }
 0x103   : > { %3131 = vmatpush1.bf16.msra.mxu0 %v3130_v29  ;;  %3160 = vmatpush3.bf16.msra.mxu1 %v3159_v30  ;;  %v3168_v5 = vpack.c.bf16 %v812_v0, %v809_v62  ;;  %v3144_v6 = vpack.c.bf16 %v817_v4, %v814_v3  ;;  %v813_v8 = vld [vmem:[%s4145_s4 + $0x120] sm:$0xff]  ;;  %v816_v9 = vld [vmem:[%s4145_s4 + $0x138] sm:$0xff]  ;;  %v815_v10 = vld [vmem:[%s4145_s4 + $0x130] sm:$0xff] }
 0x104   : > { %3161 = vmatprep.subr.bf16.mxu1 %v3702_v7  ;;  %3133 = vmatprep.subr.bf16.mxu0 %v3132_v41  ;;  %v818_v11 = vld [vmem:[%s4145_s4 + $0x148] sm:$0xff]  ;;  %v820_v12 = vld [vmem:[%s4145_s4 + $0x158] sm:$0xff]  ;;  %v823_v13 = vld [vmem:[%s4145_s4 + $0x170] sm:$0xff]  ;;  %v3146_v14 = vpack.c.bf16 %v816_v9, %v813_v8 }
 0x105   : > { %v3171_v15 = vpack.c.bf16 %v818_v11, %v815_v10  ;;  %v3148_v16 = vpack.c.bf16 %v823_v13, %v820_v12  ;;  %v819_v17 = vld [vmem:[%s4145_s4 + $0x150] sm:$0xff]  ;;  %v822_v18 = vld [vmem:[%s4145_s4 + $0x168] sm:$0xff]  ;;  %v821_v19 = vld [vmem:[%s4145_s4 + $0x160] sm:$0xff] }
 0x106   : > { %v824_v20 = vld [vmem:[%s4145_s4 + $0x178] sm:$0xff]  ;;  %v3150_v21 = vpack.c.bf16 %v822_v18, %v819_v17  ;;  %v2820_v27 = vld [vmem:[%s4732_s29] ss:$0 sm:$0xff]  ;;  %s4734_s4 = scalar_lea.vmem %s4733_s13, %s4161_s7 }
 0x107   : > { %3135 = vmatpush1.bf16.msra.mxu0 %v3134_v45  ;;  %3163 = vmatpush3.bf16.msra.mxu1 %v3162_v47  ;;  %v3174_v22 = vpack.c.bf16 %v824_v20, %v821_v19  ;;  %v2821_v29 = vld [vmem:[%s4734_s4] ss:$0 sm:$0xff]  ;;  %v3707_v45 = vmov 1983009808   ;;  %v3708_v47 = vmov 1934713408  }
 0x108   : > { %3164 = vmatprep.subr.bf16.mxu1 %v3702_v7  ;;  %3137 = vmatprep.subr.bf16.mxu0 %v3136_v50  ;;  %v996_v46 = vunpack.c.l.s4 %v3707_v45  ;;  %v1028_v48 = vunpack.c.l.s4 %v3708_v47 }
 0x10a   : > { %v997_v49 = vunpack.c.0.s8 %v996_v46  ;;  %v1029_v52 = vunpack.c.0.s8 %v1028_v48 }
 0x10b   : > { %3139 = vmatpush1.bf16.msra.mxu0 %v3138_v54  ;;  %3166 = vmatpush3.bf16.msra.mxu1 %v3165_v58 }
 0x10c   : > { %3141 = vmatprep.subr.bf16.mxu0 %v3140_v59  ;;  %3167 = vmatprep.subr.bf16.mxu1 %v3702_v7 }
 0x10f   : > { %3143 = vmatpush1.bf16.msra.mxu0 %v3142_v63  ;;  %3169 = vmatpush3.bf16.msra.mxu1 %v3168_v5 }
 0x110   : > { %3145 = vmatprep.subr.bf16.mxu0 %v3144_v6  ;;  %3170 = vmatprep.subr.bf16.mxu1 %v3702_v7 }
 0x113   : > { %3147 = vmatpush1.bf16.msra.mxu0 %v3146_v14  ;;  %3172 = vmatpush3.bf16.msra.mxu1 %v3171_v15 }
 0x114   : > { %3149 = vmatprep.subr.bf16.mxu0 %v3148_v16  ;;  %3173 = vmatprep.subr.bf16.mxu1 %v3702_v7 }
 0x117   : > { %3151 = vmatpush1.bf16.msra.mxu0 %v3150_v21  ;;  %3175 = vmatpush3.bf16.msra.mxu1 %v3174_v22 }
 0x118   : > { %3176 = vmatprep.subr.bf16.mxu0 %v3702_v7  ;;  %2975 = vmatprep.subr.mxu1 %v3701_v2 }
 0x184   : > { %v750_v33 = vpop.xlane.xlu0 %749 }
 0x185   : > { %v751_v34 = vmul.f32 0.03125, %v750_v33  ;;  %v4295_v33 = vshrl.u32 %v744_v31, 7 }
 0x187   : > { %v752_v36 = vsub.f32 %v4205_v1, %v751_v34  ;;  %v833_v34 = vsub.s32 1, %v4295_v33  ;;  %v829_v42 = vsub.s32 0, %v4295_v33  ;;  %v4313_v53 = vsub.s32 %v997_v49, %v4295_v33 }
 0x188   : > { %v4316_v59 = vsub.s32 %v1029_v52, %v4295_v33 }
 0x189   : > { %v4237_v37 = vmul.f32 %v4233_v35, %v752_v36  ;;  %v4299_v36 = vld [vmem:[%s4187_s26] sm:$0x7]  ;;  %s3706_s26 = smov 64  }
 0x18a   : > { %v830_v31 = vrot.slane %v4299_v36, %v829_v42 }
 0x18b   : > { %v754_v38 = vmul.f32 %v4237_v37, %v4237_v37 }
 0x18d   : > { %755 = vadd.xlane.f32.xlu0 %v754_v38 }
 0x21a   : > { %v756_v23 = vpop.xlane.xlu0 %755 }
 0x21b   : > { %v757_v24 = vmul.f32 0.03125, %v756_v23 }
 0x21d   : > { %v758_v25 = vadd.f32 1e-05, %v757_v24 }
 0x21f   : > { %3386 = vrsqrt.f32 %v758_v25 }
 0x229   : > { %v3387_v26 = vpop.eup %3386 }
 0x22a   : > { %v760_v28 = vmul.f32 %v3387_v26, %v4237_v37  ;;  %v834_v37 = vrot.slane %v4299_v36, %v833_v34 }
 0x22c   : > { %v768_v30 = vmul.f32 %v2820_v27, %v760_v28 }
 0x22e   : > { %v776_v32 = vadd.f32 %v2821_v29, %v768_v30 }
 0x230   : > { %907 = vmatmul.mubr.f32.vlgmr.msra.gmra.mrb[0].mxu0 %v776_v32  ;;  %2973 = vmatmul.mubr.f32.vlgmr.msra.gmra.mrb[0].mxu1 %v776_v32 }
 0x231   : > { %2977 = vmatprep.mubr.msk.f32.mxu1 %vm3703_vm1, %v3701_v2  ;;  %3047 = vmatprep.mubr.msk.f32.mxu0 %vm3703_vm1, %v3701_v2 }
 0x303   : > { %v908_v38 = vpop.f32.mrb[0].mxu0  ;;  %v4302_v39 = vpop.f32.mrb[0].mxu1 }
 0x304   : > { %v910_v40 = vpop.f32.mrb[1].mxu0  ;;  %v2974_v41 = vpop.f32.mrb[1].mxu1  ;;  %v909_v44 = vadd.f32 %v908_v38, %v830_v31 }
 0x305   : > { %v911_v43 = vadd.f32 %v910_v40, %v834_v37 }
 0x307   : > { %1136 = vrot.lane.b32.xlu0 %v911_v43, %s3704_s30  ;;  %1130 = vrot.lane.b32.xlu1 %v911_v43, %s3705_s3 }
 0x30b   : > { %1133 = vrot.lane.b32.xlu1 %v911_v43, %s3706_s26 }
 0x30f   : > { %984 = vrot.lane.b32.xlu1 %v909_v44, %s3705_s3 }
 0x313   : > { %987 = vrot.lane.b32.xlu1 %v909_v44, %s3706_s26 }
 0x317   : > { %990 = vrot.lane.b32.xlu1 %v909_v44, %s3704_s30 }
 0x379   : > { %v1137_v50 = vpop.permute.xlu0 %1136  ;;  %v1131_v51 = vpop.permute.xlu1 %1130 }
 0x37a   : > { %v1155_v54 = vcombine.low %v1131_v51, %v1137_v50  ;;  %v1156_v55 = vcombine.high %v1131_v51, %v1137_v50 }
 0x37c   : > { %v1163_v60 = vrot.slane %v1155_v54, %v4313_v53  ;;  %v1170_v61 = vrot.slane %v1156_v55, %v4313_v53 }
 0x37d   : > { %v1134_v56 = vpop.permute.xlu1 %1133 }
 0x37e   : > { %v1139_v57 = vcombine.low %v911_v43, %v1134_v56  ;;  %v1140_v58 = vcombine.high %v911_v43, %v1134_v56 }
 0x380   : > { %v1147_v62 = vrot.slane %v1139_v57, %v4313_v53  ;;  %v1154_v63 = vrot.slane %v1140_v58, %v4313_v53 }
 0x381   : > { %v985_v0 = vpop.permute.xlu1 %984 }
 0x382   : > { %v1171_v3 = vcombine.low %v1147_v62, %v1163_v60  ;;  %v1172_v4 = vcombine.high %v1147_v62, %v1163_v60  ;;  %v1187_v5 = vcombine.low %v1154_v63, %v1170_v61  ;;  %v1188_v6 = vcombine.high %v1154_v63, %v1170_v61 }
 0x384   : > { %v1179_v8 = vrot.slane %v1171_v3, %v4316_v59  ;;  %v1186_v9 = vrot.slane %v1172_v4, %v4316_v59  ;;  %v1195_v10 = vrot.slane %v1187_v5, %v4316_v59  ;;  %v1202_v11 = vrot.slane %v1188_v6, %v4316_v59 }
 0x385   : > { %v988_v12 = vpop.permute.xlu1 %987 }
 0x386   : > { %v1207_v13 = vcombine.low %v1179_v8, %v1186_v9  ;;  %v2824_v14 = vcombine.high %v1179_v8, %v1186_v9  ;;  %v1223_v15 = vcombine.low %v1195_v10, %v1202_v11  ;;  %v2825_v16 = vcombine.high %v1195_v10, %v1202_v11 }
 0x387   : > { %v993_v21 = vcombine.low %v909_v44, %v988_v12  ;;  %v994_v22 = vcombine.high %v909_v44, %v988_v12 }
 0x388   : > { %v1214_v17 = vrot.slane %v1207_v13, %v4313_v53  ;;  %v1222_v18 = vrot.slane %v2824_v14, %v4313_v53  ;;  %v1230_v19 = vrot.slane %v1223_v15, %v4313_v53  ;;  %v1238_v20 = vrot.slane %v2825_v16, %v4313_v53 }
 0x389   : > { %v991_v23 = vpop.permute.xlu1 %990  ;;  %v1001_v30 = vrot.slane %v993_v21, %v4313_v53  ;;  %v1008_v32 = vrot.slane %v994_v22, %v4313_v53 }
 0x38a   : > { %v1239_v24 = vcombine.low %v1214_v17, %v1222_v18  ;;  %v1255_v25 = vcombine.low %v1230_v19, %v1238_v20  ;;  %v1009_v26 = vcombine.low %v985_v0, %v991_v23  ;;  %v1010_v27 = vcombine.high %v985_v0, %v991_v23 }
 0x38b   : > { %v1240_v58 = vcombine.high %v1214_v17, %v1222_v18  ;;  %v1256_v60 = vcombine.high %v1230_v19, %v1238_v20 }
 0x38c   : > { %v1247_v28 = vrot.slane %v1239_v24, %v4316_v59  ;;  %v1263_v29 = vrot.slane %v1255_v25, %v4316_v59  ;;  %v1017_v34 = vrot.slane %v1009_v26, %v4313_v53  ;;  %v1024_v37 = vrot.slane %v1010_v27, %v4313_v53 }
 0x38d   : > { %v1254_v5 = vrot.slane %v1240_v58, %v4316_v59  ;;  %v1270_v6 = vrot.slane %v1256_v60, %v4316_v59  ;;  %v837_v27 = vsub.s32 2, %v4295_v33 }
 0x38e   : > { %v1271_v38 = vcombine.low %v1247_v28, %v1263_v29  ;;  %v1025_v40 = vcombine.low %v1001_v30, %v1017_v34  ;;  %v1026_v41 = vcombine.high %v1001_v30, %v1017_v34  ;;  %v1041_v42 = vcombine.low %v1008_v32, %v1024_v37 }
 0x38f   : > { %v1042_v43 = vcombine.high %v1008_v32, %v1024_v37  ;;  %v1272_v4 = vcombine.high %v1247_v28, %v1263_v29  ;;  %v1273_v11 = vcombine.low %v1254_v5, %v1270_v6  ;;  %v1274_v13 = vcombine.high %v1254_v5, %v1270_v6 }
 0x390   : > { %2976 = vmatpush3.xpose.msk.msra.mxu1 %vm1421_vm2, %v1271_v38  ;;  %v1033_v31 = vrot.slane %v1025_v40, %v4316_v59  ;;  %v1040_v44 = vrot.slane %v1026_v41, %v4316_v59  ;;  %v1049_v45 = vrot.slane %v1041_v42, %v4316_v59  ;;  %v838_v28 = vrot.slane %v4299_v36, %v837_v27 }
 0x391   : > { %v1056_v46 = vrot.slane %v1042_v43, %v4316_v59  ;;  %2980 = vmatprep.subr.mxu1 %v3701_v2 }
 0x392   : > { %v1061_v47 = vcombine.low %v1033_v31, %v1040_v44  ;;  %v2822_v48 = vcombine.high %v1033_v31, %v1040_v44  ;;  %v980_v29 = vadd.f32 %v4302_v39, %v838_v28 }
 0x393   : > { %v1077_v49 = vcombine.low %v1049_v45, %v1056_v46  ;;  %v2823_v50 = vcombine.high %v1049_v45, %v1056_v46 }
 0x394   : > { %v1068_v51 = vrot.slane %v1061_v47, %v4313_v53  ;;  %v1076_v52 = vrot.slane %v2822_v48, %v4313_v53 }
 0x395   : > { %v1084_v54 = vrot.slane %v1077_v49, %v4313_v53  ;;  %v1092_v55 = vrot.slane %v2823_v50, %v4313_v53 }
 0x396   : > { %v1093_v56 = vcombine.low %v1068_v51, %v1076_v52  ;;  %v1094_v63 = vcombine.high %v1068_v51, %v1076_v52 }
 0x397   : > { %v1109_v57 = vcombine.low %v1084_v54, %v1092_v55  ;;  %v1110_v0 = vcombine.high %v1084_v54, %v1092_v55 }
 0x398   : > { %v1101_v61 = vrot.slane %v1093_v56, %v4316_v59  ;;  %v1108_v9 = vrot.slane %v1094_v63, %v4316_v59 }
 0x399   : > { %v1117_v62 = vrot.slane %v1109_v57, %v4316_v59  ;;  %v1124_v10 = vrot.slane %v1110_v0, %v4316_v59 }
 0x39b   : > { %v1125_v3 = vcombine.low %v1101_v61, %v1117_v62  ;;  %v1126_v8 = vcombine.high %v1101_v61, %v1117_v62  ;;  %v1127_v12 = vcombine.low %v1108_v9, %v1124_v10  ;;  %v1128_v14 = vcombine.high %v1108_v9, %v1124_v10 }
 0x39d   : > { %2978 = vmatmul.mubr.msk.f32.vlgmr.msra.gmra.mrb[2].mxu1 %vm1421_vm2, %v1125_v3 }
 0x39e   : > { %2981 = vmatpush3.xpose.msk.msra.mxu1 %vm1421_vm2, %v1272_v4  ;;  %2982 = vmatprep.mubr.msk.f32.mxu1 %vm3703_vm1, %v3701_v2 }
 0x39f   : > { %2985 = vmatprep.subr.mxu1 %v3701_v2 }
 0x3a1   : > { %2983 = vmatmul.mubr.msk.f32.vlgmr.msra.gmra.mrb[4].mxu1 %vm1421_vm2, %v1126_v8 }
 0x3a2   : > { %2986 = vmatpush3.xpose.msk.msra.mxu1 %vm1421_vm2, %v1273_v11  ;;  %2987 = vmatprep.mubr.msk.f32.mxu1 %vm3703_vm1, %v3701_v2 }
 0x3a3   : > { %2990 = vmatprep.subr.mxu1 %v3701_v2 }
 0x3a5   : > { %2988 = vmatmul.mubr.msk.f32.vlgmr.msra.gmra.mrb[6].mxu1 %vm1421_vm2, %v1127_v12 }
 0x3a6   : > { %2991 = vmatpush3.xpose.msk.msra.mxu1 %vm1421_vm2, %v1274_v13  ;;  %2992 = vmatprep.mubr.msk.f32.mxu1 %vm3703_vm1, %v3701_v2 }
 0x3a7   : > { %2995 = vmatprep.subr.mxu1 %v3701_v2 }
 0x3a9   : > { %2993 = vmatmul.mubr.msk.f32.vlgmr.msra.gmra.mrb[8].mxu1 %vm1421_vm2, %v1128_v14 }
 0x3aa   : > { %2997 = vmatprep.mubr.msk.f32.mxu1 %vm3703_vm1, %v3701_v2 }
 0x470   : > { %v1494_v15 = vpop.f32.mrb[2].mxu1 }
 0x471   : > { %v2979_v16 = vpop.f32.mrb[3].mxu1  ;;  %v1727_v17 = vsel %vm1726_vm3, %v1494_v15, -inf }
 0x472   : > { %1728 = vmax.xlane.f32.xlu1 %v1727_v17 }
 0x474   : > { %v1570_v18 = vpop.f32.mrb[4].mxu1 }
 0x475   : > { %v2984_v19 = vpop.f32.mrb[5].mxu1  ;;  %v1730_v20 = vsel %vm1726_vm3, %v1570_v18, -inf }
 0x476   : > { %1731 = vmax.xlane.f32.xlu0 %v1730_v20 }
 0x478   : > { %v1646_v21 = vpop.f32.mrb[6].mxu1 }
 0x479   : > { %v2989_v22 = vpop.f32.mrb[7].mxu1  ;;  %v1733_v23 = vsel %vm1726_vm3, %v1646_v21, -inf }
 0x47a   : > { %1734 = vmax.xlane.f32.xlu1 %v1733_v23 }
 0x47c   : > { %v1722_v24 = vpop.f32.mrb[8].mxu1 }
 0x47d   : > { %v2994_v25 = vpop.f32.mrb[9].mxu1  ;;  %v1736_v26 = vsel %vm1726_vm3, %v1722_v24, -inf }
 0x47e   : > { %1737 = vmax.xlane.f32.xlu1 %v1736_v26 }
 0x48f   : > { %1279 = vrot.lane.b32.xlu1 %v980_v29, %s3706_s26 }
 0x4ff   : > { %v1729_v30 = vpop.xlane.xlu1 %1728 }
 0x500   : > { %v1739_v32 = vsub.f32 %v1494_v15, %v1729_v30 }
 0x502   : > { %v1743_v34 = vmul.f32 1.442695, %v1739_v32 }
 0x503   : > { %v1732_v37 = vpop.xlane.xlu0 %1731 }
 0x504   : > { %3388 = vpow2.f32 %v1743_v34  ;;  %v1740_v38 = vsub.f32 %v1570_v18, %v1732_v37 }
 0x506   : > { %v1745_v40 = vmul.f32 1.442695, %v1740_v38 }
 0x507   : > { %v1735_v36 = vpop.xlane.xlu1 %1734 }
 0x508   : > { %3390 = vpow2.f32 %v1745_v40  ;;  %v1741_v39 = vsub.f32 %v1646_v21, %v1735_v36 }
 0x50a   : > { %v1747_v44 = vmul.f32 1.442695, %v1741_v39 }
 0x50b   : > { %v1738_v31 = vpop.xlane.xlu1 %1737 }
 0x50c   : > { %v1742_v45 = vsub.f32 %v1722_v24, %v1738_v31  ;;  %3392 = vpow2.f32 %v1747_v44  ;;  %v2216_v44 = vld [vmem:[%s4151_s10] sm:$0xff] }
 0x50e   : > { %v3389_v41 = vpop.eup %3388  ;;  %v1749_v46 = vmul.f32 1.442695, %v1742_v45  ;;  %v2217_v45 = vld [vmem:[%s4151_s10 + $0x8] sm:$0xff] }
 0x50f   : > { %v1751_v42 = vsel %vm1726_vm3, %v3389_v41, 0.0  ;;  %v1280_v51 = vpop.permute.xlu1 %1279 }
 0x510   : > { %1752 = vadd.xlane.f32.xlu0 %v1751_v42  ;;  %3394 = vpow2.f32 %v1749_v46  ;;  %v1285_v55 = vcombine.low %v980_v29, %v1280_v51  ;;  %v1286_v56 = vcombine.high %v980_v29, %v1280_v51  ;;  %v2218_v46 = vld [vmem:[%s4151_s10 + $0x10] sm:$0xff]  ;;  %v2221_v51 = vld [vmem:[%s4151_s10 + $0x28] sm:$0xff] }
 0x512   : > { %v4379_v43 = vpop.eup %3390  ;;  %v1293_v62 = vrot.slane %v1285_v55, %v4313_v53  ;;  %v1300_v63 = vrot.slane %v1286_v56, %v4313_v53  ;;  %v2223_v55 = vld [vmem:[%s4151_s10 + $0x38] sm:$0xff] }
 0x513   : > { %v1754_v33 = vsel %vm1726_vm3, %v4379_v43, 0.0 }
 0x514   : > { %1755 = vadd.xlane.f32.xlu1 %v1754_v33 }
 0x516   : > { %v4385_v47 = vpop.eup %3392 }
 0x517   : > { %v1757_v48 = vsel %vm1726_vm3, %v4385_v47, 0.0 }
 0x51a   : > { %v4389_v49 = vpop.eup %3394 }
 0x51b   : > { %v1760_v50 = vsel %vm1726_vm3, %v4389_v49, 0.0 }
 0x525   : > { %1282 = vrot.lane.b32.xlu1 %v980_v29, %s3704_s30 }
 0x526   : > { %1276 = vrot.lane.b32.xlu0 %v980_v29, %s3705_s3 }
 0x545   : > { %1758 = vadd.xlane.f32.xlu0 %v1757_v48  ;;  %v2219_v48 = vld [vmem:[%s4151_s10 + $0x18] sm:$0xff] }
 0x549   : > { %1761 = vadd.xlane.f32.xlu1 %v1760_v50  ;;  %v3180_v50 = vpack.c.bf16 %v2219_v48, %v2218_v46 }
 0x59d   : > { %v1753_v52 = vpop.xlane.xlu0 %1752 }
 0x59e   : > { %3396 = vrcp.f32 %v1753_v52 }
 0x5a1   : > { %v1756_v54 = vpop.xlane.xlu1 %1755  ;;  %v1277_v57 = vpop.permute.xlu0 %1276 }
 0x5a2   : > { %3398 = vrcp.f32 %v1756_v54  ;;  %v2222_v54 = vld [vmem:[%s4151_s10 + $0x30] sm:$0xff] }
 0x5a3   : > { %v3186_v56 = vpack.c.bf16 %v2223_v55, %v2222_v54 }
 0x5a5   : > { %v1283_v58 = vpop.permute.xlu1 %1282 }
 0x5a6   : > { %v1301_v60 = vcombine.low %v1277_v57, %v1283_v58  ;;  %v1302_v61 = vcombine.high %v1277_v57, %v1283_v58  ;;  %v2224_v57 = vld [vmem:[%s4151_s10 + $0x40] sm:$0xff]  ;;  %v2225_v58 = vld [vmem:[%s4151_s10 + $0x48] sm:$0xff] }
 0x5a8   : > { %v1309_v0 = vrot.slane %v1301_v60, %v4313_v53  ;;  %v1316_v3 = vrot.slane %v1302_v61, %v4313_v53  ;;  %v3397_v23 = vpop.eup %3396  ;;  %v3189_v60 = vpack.c.bf16 %v2225_v58, %v2224_v57  ;;  %v2226_v61 = vld [vmem:[%s4151_s10 + $0x50] sm:$0xff] }
 0x5a9   : > { %v1767_v30 = vmul.f32 %v3397_v23, %v3389_v41 }
 0x5aa   : > { %v1317_v4 = vcombine.low %v1293_v62, %v1309_v0  ;;  %v1318_v5 = vcombine.high %v1293_v62, %v1309_v0  ;;  %v1333_v6 = vcombine.low %v1300_v63, %v1316_v3  ;;  %v1334_v8 = vcombine.high %v1300_v63, %v1316_v3  ;;  %v2227_v62 = vld [vmem:[%s4151_s10 + $0x58] sm:$0xff]  ;;  %v2228_v0 = vld [vmem:[%s4151_s10 + $0x60] sm:$0xff]  ;;  %v2229_v3 = vld [vmem:[%s4151_s10 + $0x68] sm:$0xff] }
 0x5ab   : > { %v3192_v63 = vpack.c.bf16 %v2227_v62, %v2226_v61 }
 0x5ac   : > { %v1325_v9 = vrot.slane %v1317_v4, %v4316_v59  ;;  %v1332_v10 = vrot.slane %v1318_v5, %v4316_v59  ;;  %v1341_v11 = vrot.slane %v1333_v6, %v4316_v59  ;;  %v1348_v12 = vrot.slane %v1334_v8, %v4316_v59  ;;  %v3399_v29 = vpop.eup %3398 }
 0x5ad   : > { %v1768_v38 = vmul.f32 %v3399_v29, %v4379_v43  ;;  %v3195_v4 = vpack.c.bf16 %v2229_v3, %v2228_v0  ;;  %v2338_v3 = vld [vmem:[%s4153_s24] sm:$0xff] }
 0x5ae   : > { %v1353_v13 = vcombine.low %v1325_v9, %v1332_v10  ;;  %v2826_v14 = vcombine.high %v1325_v9, %v1332_v10  ;;  %v1369_v15 = vcombine.low %v1341_v11, %v1348_v12  ;;  %v2827_v16 = vcombine.high %v1341_v11, %v1348_v12 }
 0x5b0   : > { %v1360_v17 = vrot.slane %v1353_v13, %v4313_v53  ;;  %v1368_v18 = vrot.slane %v2826_v14, %v4313_v53  ;;  %v1376_v19 = vrot.slane %v1369_v15, %v4313_v53  ;;  %v1384_v20 = vrot.slane %v2827_v16, %v4313_v53 }
 0x5b2   : > { %v1385_v21 = vcombine.low %v1360_v17, %v1368_v18  ;;  %v1401_v22 = vcombine.low %v1376_v19, %v1384_v20  ;;  %v1386_v26 = vcombine.high %v1360_v17, %v1368_v18  ;;  %v1402_v27 = vcombine.high %v1376_v19, %v1384_v20 }
 0x5b4   : > { %v1393_v24 = vrot.slane %v1385_v21, %v4316_v59  ;;  %v1409_v25 = vrot.slane %v1401_v22, %v4316_v59  ;;  %v1400_v34 = vrot.slane %v1386_v26, %v4316_v59  ;;  %v1416_v37 = vrot.slane %v1402_v27, %v4316_v59  ;;  %v2230_v26 = vld [vmem:[%s4151_s10 + $0x70] sm:$0xff]  ;;  %v2231_v27 = vld [vmem:[%s4151_s10 + $0x78] sm:$0xff] }
 0x5b6   : > { %v1417_v28 = vcombine.low %v1393_v24, %v1409_v25  ;;  %v1418_v32 = vcombine.high %v1393_v24, %v1409_v25  ;;  %v1419_v40 = vcombine.low %v1400_v34, %v1416_v37  ;;  %v1420_v36 = vcombine.high %v1400_v34, %v1416_v37 }
 0x5b7   : > { %v3198_v34 = vpack.c.bf16 %v2231_v27, %v2230_v26  ;;  %v2352_v27 = vld [vmem:[%s4153_s24 + $0x70] sm:$0xff] }
 0x5b8   : > { %2996 = vmatpush3.msra.mxu1 %v1417_v28 }
 0x5b9   : > { %2998 = vmatmul.mubr.msk.f32.vlgmr.msra.gmra.mrb[10].mxu1 %vm1726_vm3, %v1767_v30  ;;  %3000 = vmatprep.subr.mxu1 %v3701_v2 }
 0x5ba   : > { %3001 = vmatpush3.msra.mxu1 %v1418_v32  ;;  %3002 = vmatprep.mubr.msk.f32.mxu1 %vm3703_vm1, %v3701_v2 }
 0x5bb   : > { %3005 = vmatprep.subr.mxu1 %v3701_v2 }
 0x5bd   : > { %3003 = vmatmul.mubr.msk.f32.vlgmr.msra.gmra.mrb[12].mxu1 %vm1726_vm3, %v1768_v38 }
 0x5be   : > { %3006 = vmatpush3.msra.mxu1 %v1419_v40  ;;  %3007 = vmatprep.mubr.msk.f32.mxu1 %vm3703_vm1, %v3701_v2 }
 0x5bf   : > { %3010 = vmatprep.subr.mxu1 %v3701_v2 }
 0x5d2   : > { %v1759_v41 = vpop.xlane.xlu0 %1758 }
 0x5d3   : > { %3400 = vrcp.f32 %v1759_v41 }
 0x5d6   : > { %v1762_v42 = vpop.xlane.xlu1 %1761 }
 0x5d7   : > { %3402 = vrcp.f32 %v1762_v42 }
 0x5dd   : > { %v3401_v43 = vpop.eup %3400 }
 0x5de   : > { %v1769_v33 = vmul.f32 %v3401_v43, %v4385_v47  ;;  %v3177_v47 = vpack.c.bf16 %v2217_v45, %v2216_v44 }
 0x5e0   : > { %3008 = vmatmul.mubr.msk.f32.vlgmr.msra.gmra.mrb[14].mxu1 %vm1726_vm3, %v1769_v33  ;;  %3178 = vmatpush3.bf16.msra.mxu0 %v3177_v47 }
 0x5e1   : > { %v3403_v39 = vpop.eup %3402  ;;  %3011 = vmatpush3.msra.mxu1 %v1420_v36  ;;  %3012 = vmatprep.mubr.msk.f32.mxu1 %vm3703_vm1, %v3701_v2 }
 0x5e2   : > { %v1770_v31 = vmul.f32 %v3403_v39, %v4389_v49  ;;  %3200 = vmatprep.subr.bf16.mxu1 %v3702_v7  ;;  %3179 = vmatprep.subr.bf16.mxu0 %v3702_v7  ;;  %v2220_v49 = vld [vmem:[%s4151_s10 + $0x20] sm:$0xff] }
 0x5e3   : > { %v3183_v52 = vpack.c.bf16 %v2221_v51, %v2220_v49 }
 0x5e4   : > { %3013 = vmatmul.mubr.msk.f32.vlgmr.msra.gmra.mrb[16].mxu1 %vm1726_vm3, %v1770_v31  ;;  %3181 = vmatpush3.bf16.msra.mxu0 %v3180_v50 }
 0x5e5   : > { %3082 = vmatprep.mubr.msk.f32.mxu1 %vm3703_vm1, %v3701_v2  ;;  %3182 = vmatprep.subr.bf16.mxu0 %v3702_v7 }
 0x5e8   : > { %3184 = vmatpush3.bf16.msra.mxu0 %v3183_v52 }
 0x5e9   : > { %3185 = vmatprep.subr.bf16.mxu0 %v3702_v7 }
 0x5ec   : > { %3187 = vmatpush3.bf16.msra.mxu0 %v3186_v56 }
 0x5ed   : > { %3188 = vmatprep.subr.bf16.mxu0 %v3702_v7 }
 0x5f0   : > { %3190 = vmatpush3.bf16.msra.mxu0 %v3189_v60  ;;  %v2842_v60 = vld [vmem:[%s4736_s1] ss:$0 sm:$0xff] }
 0x5f1   : > { %3191 = vmatprep.subr.bf16.mxu0 %v3702_v7 }
 0x5f4   : > { %3193 = vmatpush3.bf16.msra.mxu0 %v3192_v63 }
 0x5f5   : > { %3194 = vmatprep.subr.bf16.mxu0 %v3702_v7 }
 0x5f8   : > { %3196 = vmatpush3.bf16.msra.mxu0 %v3195_v4  ;;  %v2339_v4 = vld [vmem:[%s4153_s24 + $0x8] sm:$0xff] }
 0x5f9   : > { %3197 = vmatprep.subr.bf16.mxu0 %v3702_v7 }
 0x5fc   : > { %3199 = vmatpush3.bf16.msra.mxu0 %v3198_v34 }
 0x5fd   : > { %3224 = vmatprep.subr.bf16.mxu0 %v3702_v7 }
 0x68c   : > { %v1840_v5 = vpop.f32.mrb[10].mxu1 }
 0x68d   : > { %v2999_v6 = vpop.f32.mrb[11].mxu1 }
 0x68e   : > { %v3201_v6 = vpack.c.bf16 %v2339_v4, %v2338_v3  ;;  %v2845_v3 = vld [vmem:[%s733_s21] ss:$0 sm:$0xff]  ;;  %s4741_s21 = sld [smem:[#allocation22_spill]] }
 0x690   : > { %v1913_v8 = vpop.f32.mrb[12].mxu1  ;;  %3202 = vmatpush3.bf16.msra.mxu1 %v3201_v6 }
 0x691   : > { %v3004_v9 = vpop.f32.mrb[13].mxu1  ;;  %3203 = vmatprep.subr.bf16.mxu1 %v3702_v7 }
 0x692   : > { %v2342_v9 = vld [vmem:[%s4153_s24 + $0x20] sm:$0xff] }
 0x694   : > { %p2848_p12 = scmp.ne.s32.totalorder %s4741_s21, 1 }
 0x6b3   : > { %v1986_v10 = vpop.f32.mrb[14].mxu1 }
 0x6b4   : > { %v2063_v11 = vcombine.low %v1840_v5, %v1986_v10  ;;  %v2064_v12 = vcombine.high %v1840_v5, %v1986_v10  ;;  %v3009_v13 = vpop.f32.mrb[15].mxu1  ;;  %v2340_v5 = vld [vmem:[%s4153_s24 + $0x10] sm:$0xff]  ;;  %v2343_v10 = vld [vmem:[%s4153_s24 + $0x28] sm:$0xff] }
 0x6b6   : > { %v2071_v18 = vrot.slane %v2063_v11, %v4313_v53  ;;  %v2078_v19 = vrot.slane %v2064_v12, %v4313_v53  ;;  %v3207_v11 = vpack.c.bf16 %v2343_v10, %v2342_v9 }
 0x6b7   : > { %v2059_v14 = vpop.f32.mrb[16].mxu1 }
 0x6b8   : > { %v2079_v15 = vcombine.low %v1913_v8, %v2059_v14  ;;  %v2080_v16 = vcombine.high %v1913_v8, %v2059_v14  ;;  %v3014_v17 = vpop.f32.mrb[17].mxu1  ;;  %v2341_v8 = vld [vmem:[%s4153_s24 + $0x18] sm:$0xff] }
 0x6b9   : > { %v2345_v17 = vld [vmem:[%s4153_s24 + $0x38] sm:$0xff] }
 0x6ba   : > { %v2087_v20 = vrot.slane %v2079_v15, %v4313_v53  ;;  %v2094_v21 = vrot.slane %v2080_v16, %v4313_v53  ;;  %v2344_v16 = vld [vmem:[%s4153_s24 + $0x30] sm:$0xff] }
 0x6bc   : > { %v2095_v22 = vcombine.low %v2071_v18, %v2087_v20  ;;  %v2096_v23 = vcombine.high %v2071_v18, %v2087_v20  ;;  %v2111_v24 = vcombine.low %v2078_v19, %v2094_v21  ;;  %v2112_v25 = vcombine.high %v2078_v19, %v2094_v21  ;;  %v2346_v19 = vld [vmem:[%s4153_s24 + $0x40] sm:$0xff]  ;;  %v2347_v20 = vld [vmem:[%s4153_s24 + $0x48] sm:$0xff]  ;;  %v2348_v21 = vld [vmem:[%s4153_s24 + $0x50] sm:$0xff] }
 0x6bd   : > { %v3210_v18 = vpack.c.bf16 %v2345_v17, %v2344_v16 }
 0x6be   : > { %v2103_v28 = vrot.slane %v2095_v22, %v4316_v59  ;;  %v2110_v29 = vrot.slane %v2096_v23, %v4316_v59  ;;  %v2119_v30 = vrot.slane %v2111_v24, %v4316_v59  ;;  %v2126_v32 = vrot.slane %v2112_v25, %v4316_v59  ;;  %v2349_v23 = vld [vmem:[%s4153_s24 + $0x58] sm:$0xff]  ;;  %v2351_v25 = vld [vmem:[%s4153_s24 + $0x68] sm:$0xff] }
 0x6bf   : > { %v3213_v22 = vpack.c.bf16 %v2347_v20, %v2346_v19  ;;  %v3216_v24 = vpack.c.bf16 %v2349_v23, %v2348_v21 }
 0x6c0   : > { %v2131_v37 = vcombine.low %v2103_v28, %v2110_v29  ;;  %v2840_v38 = vcombine.high %v2103_v28, %v2110_v29  ;;  %v2147_v40 = vcombine.low %v2119_v30, %v2126_v32  ;;  %v2841_v41 = vcombine.high %v2119_v30, %v2126_v32  ;;  %v2353_v28 = vld [vmem:[%s4153_s24 + $0x78] sm:$0xff] }
 0x6c1   : > { %v3222_v29 = vpack.c.bf16 %v2353_v28, %v2352_v27 }
 0x6c2   : > { %v2138_v42 = vrot.slane %v2131_v37, %v4313_v53  ;;  %v2146_v43 = vrot.slane %v2840_v38, %v4313_v53  ;;  %v2154_v33 = vrot.slane %v2147_v40, %v4313_v53  ;;  %v2162_v36 = vrot.slane %v2841_v41, %v4313_v53  ;;  %v2843_v38 = vld [vmem:[%s727_s22] ss:$0 sm:$0xff] }
 0x6c3   : > { %v2844_v41 = vld [vmem:[%s730_s27] ss:$0 sm:$0xff] }
 0x6c4   : > { %v2164_v39 = vcombine.high %v2138_v42, %v2146_v43  ;;  %v2180_v31 = vcombine.high %v2154_v33, %v2162_v36  ;;  %v2163_v44 = vcombine.low %v2138_v42, %v2146_v43  ;;  %v2179_v45 = vcombine.low %v2154_v33, %v2162_v36  ;;  %v2439_v33 = vld [vmem:[%s4197_s12] sm:$0xff]  ;;  %v2440_v36 = vld [vmem:[%s4197_s12 + $0x8] sm:$0xff] }
 0x6c6   : > { %v2178_v46 = vrot.slane %v2164_v39, %v4316_v59  ;;  %v2194_v47 = vrot.slane %v2180_v31, %v4316_v59  ;;  %v2171_v48 = vrot.slane %v2163_v44, %v4316_v59  ;;  %v2187_v50 = vrot.slane %v2179_v45, %v4316_v59  ;;  %v2441_v31 = vld [vmem:[%s4197_s12 + $0x10] sm:$0xff]  ;;  %v2442_v44 = vld [vmem:[%s4197_s12 + $0x18] sm:$0xff] }
 0x6c7   : > { %v3225_v39 = vpack.c.bf16 %v2440_v36, %v2439_v33  ;;  %v3228_v45 = vpack.c.bf16 %v2442_v44, %v2441_v31 }
 0x6c8   : > { %v2197_v49 = vcombine.low %v2178_v46, %v2194_v47  ;;  %v2196_v51 = vcombine.high %v2171_v48, %v2187_v50  ;;  %v2198_v52 = vcombine.high %v2178_v46, %v2194_v47  ;;  %v2195_v54 = vcombine.low %v2171_v48, %v2187_v50  ;;  %v2443_v46 = vld [vmem:[%s4197_s12 + $0x20] sm:$0xff]  ;;  %v2444_v47 = vld [vmem:[%s4197_s12 + $0x28] sm:$0xff]  ;;  %v2445_v50 = vld [vmem:[%s4197_s12 + $0x30] sm:$0xff] }
 0x6c9   : > { %v3231_v48 = vpack.c.bf16 %v2444_v47, %v2443_v46 }
 0x6ca   : > { %2204 = vrot.lane.b32.xlu1 %v2197_v49, %s3706_s26  ;;  %2200 = vrot.lane.b32.xlu0 %v2196_v51, %s3704_s30  ;;  %v2446_v49 = vld [vmem:[%s4197_s12 + $0x38] sm:$0xff] }
 0x6cb   : > { %v3234_v51 = vpack.c.bf16 %v2446_v49, %v2445_v50 }
 0x6ce   : > { %2208 = vrot.lane.b32.xlu0 %v2198_v52, %s3705_s3  ;;  %v2447_v52 = vld [vmem:[%s4197_s12 + $0x40] sm:$0xff] }
 0x73c   : > { %v2201_v53 = vpop.permute.xlu0 %2200  ;;  %v2205_v55 = vpop.permute.xlu1 %2204 }
 0x73d   : > { %v2211_v56 = vsel %vm1421_vm2, %v2195_v54, %v2201_v53  ;;  %v2448_v54 = vld [vmem:[%s4197_s12 + $0x48] sm:$0xff] }
 0x73e   : > { %v2213_v57 = vsel %vm2212_vm4, %v2211_v56, %v2205_v55  ;;  %v3237_v53 = vpack.c.bf16 %v2448_v54, %v2447_v52  ;;  %v2449_v55 = vld [vmem:[%s4197_s12 + $0x50] sm:$0xff]  ;;  %v2450_v56 = vld [vmem:[%s4197_s12 + $0x58] sm:$0xff] }
 0x740   : > { %v2209_v59 = vpop.permute.xlu0 %2208 }
 0x741   : > { %v2215_v58 = vsel %vm2214_vm5, %v2213_v57, %v2209_v59  ;;  %v3240_v59 = vpack.c.bf16 %v2450_v56, %v2449_v55  ;;  %v2451_v57 = vld [vmem:[%s4197_s12 + $0x60] sm:$0xff] }
 0x742   : > { %3048 = vmatmul.mubr.f32.vlgmr.msra.gmra.mrb[2].mxu0 %v2215_v58  ;;  %v2452_v58 = vld [vmem:[%s4197_s12 + $0x68] sm:$0xff] }
 0x743   : > { %3117 = vmatprep.mubr.msk.f32.mxu0 %vm3703_vm1, %v3701_v2  ;;  %v3204_v2 = vpack.c.bf16 %v2341_v8, %v2340_v5  ;;  %3226 = vmatpush3.bf16.msra.mxu0 %v3225_v39 }
 0x744   : > { %3227 = vmatprep.subr.bf16.mxu0 %v3702_v7 }
 0x745   : > { %3205 = vmatpush3.bf16.msra.mxu1 %v3204_v2 }
 0x746   : > { %3206 = vmatprep.subr.bf16.mxu1 %v3702_v7 }
 0x747   : > { %3229 = vmatpush3.bf16.msra.mxu0 %v3228_v45 }
 0x748   : > { %3230 = vmatprep.subr.bf16.mxu0 %v3702_v7 }
 0x749   : > { %3208 = vmatpush3.bf16.msra.mxu1 %v3207_v11 }
 0x74a   : > { %3209 = vmatprep.subr.bf16.mxu1 %v3702_v7 }
 0x74b   : > { %3232 = vmatpush3.bf16.msra.mxu0 %v3231_v48 }
 0x74c   : > { %3233 = vmatprep.subr.bf16.mxu0 %v3702_v7 }
 0x74d   : > { %3211 = vmatpush3.bf16.msra.mxu1 %v3210_v18 }
 0x74e   : > { %3212 = vmatprep.subr.bf16.mxu1 %v3702_v7 }
 0x74f   : > { %3235 = vmatpush3.bf16.msra.mxu0 %v3234_v51 }
 0x750   : > { %3236 = vmatprep.subr.bf16.mxu0 %v3702_v7 }
 0x751   : > { %3214 = vmatpush3.bf16.msra.mxu1 %v3213_v22 }
 0x752   : > { %3215 = vmatprep.subr.bf16.mxu1 %v3702_v7 }
 0x753   : > { %3238 = vmatpush3.bf16.msra.mxu0 %v3237_v53 }
 0x754   : > { %3239 = vmatprep.subr.bf16.mxu0 %v3702_v7 }
 0x755   : > { %3217 = vmatpush3.bf16.msra.mxu1 %v3216_v24 }
 0x756   : > { %3218 = vmatprep.subr.bf16.mxu1 %v3702_v7 }
 0x757   : > { %3241 = vmatpush3.bf16.msra.mxu0 %v3240_v59 }
 0x758   : > { %3242 = vmatprep.subr.bf16.mxu0 %v3702_v7 }
 0x815   : > { %v2305_v61 = vpop.f32.mrb[2].mxu0 }
 0x816   : > { %v2306_v62 = vadd.f32 %v2842_v60, %v2305_v61  ;;  %v3049_v63 = vpop.f32.mrb[3].mxu0  ;;  %v3243_v60 = vpack.c.bf16 %v2452_v58, %v2451_v57  ;;  %v2453_v61 = vld [vmem:[%s4197_s12 + $0x70] sm:$0xff] }
 0x818   : > { %v4480_v0 = vadd.f32 %v2306_v62, %v4205_v1  ;;  %3244 = vmatpush3.bf16.msra.mxu0 %v3243_v60  ;;  %v2454_v62 = vld [vmem:[%s4197_s12 + $0x78] sm:$0xff] }
 0x819   : > { %3245 = vmatprep.subr.bf16.mxu0 %v3702_v7  ;;  %v3246_v63 = vpack.c.bf16 %v2454_v62, %v2453_v61 }
 0x81a   : > { %2310 = vadd.xlane.f32.xlu1 %v4480_v0 }
 0x81c   : > { %3247 = vmatpush3.bf16.msra.mxu0 %v3246_v63 }
 0x8a7   : > { %v2311_v1 = vpop.xlane.xlu1 %2310 }
 0x8a8   : > { %v2312_v12 = vmul.f32 0.03125, %v2311_v1  ;;  %v2847_v1 = vld [vmem:[%s736_s2] ss:$0 sm:$0xff] }
 0x8aa   : > { %v2313_v13 = vsub.f32 %v4480_v0, %v2312_v12 }
 0x8ac   : > { %v2314_v14 = vmul.f32 %v4233_v35, %v2313_v13  ;;  %v2350_v35 = vld [vmem:[%s4153_s24 + $0x60] sm:$0xff] }
 0x8ad   : > { %v3219_v26 = vpack.c.bf16 %v2351_v25, %v2350_v35 }
 0x8ae   : > { %v2315_v15 = vmul.f32 %v2314_v14, %v2314_v14 }
 0x8af   : > { %3220 = vmatpush3.bf16.msra.mxu1 %v3219_v26 }
 0x8b0   : > { %2316 = vadd.xlane.f32.xlu0 %v2315_v15  ;;  %3221 = vmatprep.subr.bf16.mxu1 %v3702_v7 }
 0x8b3   : > { %3223 = vmatpush3.bf16.msra.mxu1 %v3222_v29 }
 0x93d   : > { %v2317_v30 = vpop.xlane.xlu0 %2316 }
 0x93e   : > { %v2318_v32 = vmul.f32 0.03125, %v2317_v30 }
 0x940   : > { %v2319_v34 = vadd.f32 1e-05, %v2318_v32 }
 0x942   : > { %3404 = vrsqrt.f32 %v2319_v34 }
 0x94c   : > { %v3405_v37 = vpop.eup %3404 }
 0x94d   : > { %v2321_v40 = vmul.f32 %v3405_v37, %v2314_v14 }
 0x94f   : > { %v2329_v42 = vmul.f32 %v2843_v38, %v2321_v40 }
 0x951   : > { %v2337_v43 = vadd.f32 %v2844_v41, %v2329_v42 }
 0x953   : > { %3083 = vmatmul.mubr.f32.vlgmr.msra.gmra.mrb[18].mxu1 %v2337_v43 }
 0xa26   : > { %v2427_v4 = vpop.f32.mrb[18].mxu1 }
 0xa27   : > { %v2428_v5 = vadd.f32 %v2845_v3, %v2427_v4  ;;  %v3084_v6 = vpop.f32.mrb[19].mxu1 }
 0xa29   : > { %v2846_v8 = vmul.f32 -1.702, %v2428_v5 }
 0xa2b   : > { %v2433_v2 = vmul.f32 1.442695, %v2846_v8 }
 0xa2d   : > { %3406 = vpow2.f32 %v2433_v2 }
 0xa37   : > { %v3407_v9 = vpop.eup %3406 }
 0xa38   : > { %v2435_v10 = vadd.f32 1.0, %v3407_v9 }
 0xa3a   : > { %3408 = vrcp.f32 %v2435_v10 }
 0xa44   : > { %v3409_v7 = vpop.eup %3408 }
 0xa45   : > { %v2438_v11 = vmul.f32 %v3409_v7, %v2428_v5 }
 0xa47   : > { %3118 = vmatmul.mubr.f32.vlgmr.msra.gmra.mrb[4].mxu0 %v2438_v11 }
 0xb19   : > { %2537 = sbr.rel (%p2848_p12) target bundleno = 2856 (0xb28), region = 100 }
 0xb1a   : > { %v2528_v12 = vpop.f32.mrb[4].mxu0 }
 0xb1b   : > { %v2529_v13 = vadd.f32 %v2847_v1, %v2528_v12  ;;  %v3119_v14 = vpop.f32.mrb[5].mxu0 }
 0xb1d   : > { %v2532_v15 = vadd.f32 %v2529_v13, %v4480_v0 }
 0xb1f   : > { %2533 = vst [vmem:[#allocation2] sm:$0xff] %v2532_v15 }
 0xb26   : > { %v2538_v16 = vld [vmem:[#allocation2] sm:$0xff] }
 0xb27   : > { %2539 = vst [vmem:[%s4201_s16] sm:$0xff] %v2538_v16 }
 0xb28 PF: > { %s4742_s28 = sld [smem:[#allocation23_spill]]  ;;  %s4743_s18 = sld [smem:[#allocation46_spill]] }
 0xb29   : > { %s2554_s4 = sshll.u32 %s4201_s16, 4  ;;  %s2541_s30 = scalar_lea.sflag [#allocation5], %s4131_s15  ;;  %s2555_s4 = int_to_ptr.vmem [resolvable:$true] %s2554_s4 }
 0xb2a   : > { %s3560_s3 = scalar_lea.vmem %s2555_s4, 128  ;;  %p4745_p5 = scmp.ne.s32.totalorder %s4705_s14, 0 }
 0xb2b   : > { %p3561_p11 = scmp.ne.s32.totalorder %s2555_s4, %s3560_s3  ;;  %s3709_s26 = smov [#allocation12]  }
 0xb2c   : > { %s3564_s10 = sshll.u32 %s3709_s26, 4  ;;  %s3565_s10 = int_to_ptr.vmem [resolvable:$false] %s3564_s10 }
 0xb2d   : > { %p3562_p0 = pnand %p3561_p11, %p4745_p5  ;;  %s3566_s6 = scalar_lea.vmem %s3565_s10, 256 }
 0xb2e   : > { %s2850_s29 = sshll.u32 %s4742_s28, 7  ;;  %s4744_s13 = smov %s4743_s18 }
 0xb2f   : > { %s4558_s25 = scalar_lea.hbm %s4743_s18, %s2850_s29  ;;  %p3563_p9 = pneg %p3562_p0 }
 0xb30   : > { %p3567_p13 = scmp.lt.s32.totalorder %s2555_s4, %s3565_s10  ;;  %p3568_p10 = scmp.lt.s32.totalorder %s3566_s6, %s3560_s3 }
 0xb32   : > { %p3569_p6 = por %p3568_p10, %p3567_p13 }
 0xb34   : > { %p3570_p7 = pnand %p3569_p6, %p3563_p9 }
 0xb36   : > { %3573 = shalt.err (!%p3570_p7)
}
 0xb37   : > { %s3574_s15 = scalar_lea.hbm %s4558_s25, 128  ;;  %s3578_s1 = scalar_lea.hbm %s4744_s13, 256 }
 0xb38   : > { %p3575_p8 = scmp.ne.s32.totalorder %s4558_s25, %s3574_s15  ;;  %p3579_p3 = scmp.lt.u32.totalorder %s4558_s25, %s4744_s13 }
 0xb39   : > { %p3580_p4 = scmp.lt.u32.totalorder %s3578_s1, %s3574_s15  ;;  %p3582_p11 = scmp.lt.u32.totalorder %s3574_s15, %s4558_s25 }
 0xb3a   : > { %p3576_p2 = pnand %p3575_p8, %p4745_p5 }
 0xb3b   : > { %p3581_p12 = por %p3580_p4, %p3579_p3 }
 0xb3c   : > { %p3577_p1 = pneg %p3576_p2 }
 0xb3d   : > { %p3583_p0 = por %p3582_p11, %p3581_p12 }
 0xb3f   : > { %p3584_p9 = pnand %p3583_p0, %p3577_p1 }
 0xb41   : > { %3587 = shalt.err (!%p3584_p9)
}
 0xb42   : > { %3262 = dma.vmem_to_hbm [thread:$0]  (%p4745_p5), %s2555_s4, 128, %s4558_s25, %s2541_s30  }
 0xb43 PF: > { %s4746_s23 = sld [smem:[#allocation26_spill]]  ;;  %s4747_s24 = sld [smem:[#allocation19_spill]] }
 0xb44   : > { %s4748_s8 = sld [smem:[#allocation32_spill]] }
 0xb49   : > { %p3285_p13 = scmp.ge.s32.totalorder %s4746_s23, 2  ;;  %s2566_s17 = sand.u32 1, %s4747_s24  }
 0xb4a   : > { %p4749_p10 = scmp.ne.s32.totalorder %s4748_s8, 0  ;;  %s2567_s27 = scalar_lea.sflag [#allocation5], %s2566_s17 }
 0xb4c   : > { %p3281_p6 = pnand %p3285_p13, %p4749_p10 }
 0xb4e   : > { %3645 = dma.done.wait (!%p3281_p6), %s2567_s27, 128  }
 0xb4f   : > { %3647 = vsyncadd (!%p3281_p6), %s2567_s27, 4294967168  ;;  %s35_s18 = sadd.s32 1, %s4746_s23   ;;  %s4750_s25 = sld [smem:[#allocation17_spill]] }
 0xb50   : > { %p32_p7 = scmp.ge.s32.totalorder %s35_s18, 6   ;;  %s4751_s26 = sld [smem:[#allocation18_spill]] }
 0xb51   : > { %s4752_s27 = sld [smem:[#allocation30_spill]]  ;;  %s4753_s28 = sld [smem:[#allocation20_spill]] }
 0xb52   : > { %s4754_s29 = sld [smem:[#allocation21_spill]]  ;;  %s4755_s30 = sld [smem:[#allocation31_spill]] }
 0xb53   : > { %s4756_s14 = sld [smem:[#allocation24_spill]]  ;;  %s4757_s15 = sld [smem:[#allocation25_spill]] }
 0xb54   : > { %s4758_s16 = sld [smem:[#allocation27_spill]]  ;;  %s4759_s17 = sld [smem:[#allocation28_spill]] }
 0xb55   :  { %34 = sbr.rel (!%p32_p7) target bundleno = 28 (0x1c), region = 197 }
 0xb5c   :  { %2572 = vsyncpa [#allocation4], 1 }
 0xb5d   :  { %2574 = vsyncpa [#allocation4 + $0x1], 1 }
 0xb5e   :  { %2575 = vsyncpa [#allocation7], 1 }
 0xb5f   :  { %2577 = vsyncpa [#allocation7 + $0x1], 1 }
 0xb60   :  { %2578 = vsyncpa [#allocation10], 1 }
 0xb61   :  { %2580 = vsyncpa [#allocation10 + $0x1], 1 }
 0xb62   :  { %2581 = vsyncpa [#allocation5], 1 }
 0xb63   :  { %2583 = vsyncpa [#allocation5 + $0x1], 1 }

// kernel: tpu_custom_call.1
= control target key start
LH: loop header
LB: loop body
LE: loop exit
PB: predicated region body
PF: predicated region fallthrough
CT: control target
= control target key end

     0   :  { %s3951_s0 = inlined_call_operand.hbm [shape: f32[2,8,128], index: 0, kind: input, shape index: {}]   ;;  %s3952_s1 = inlined_call_operand.vmem [shape: f32[2,1,128], index: 1, kind: input, shape index: {}]   ;;  %s3953_s2 = inlined_call_operand.vmem [shape: f32[2,1,128], index: 2, kind: input, shape index: {}]   ;;  %s3954_s3 = inlined_call_operand.hbm [shape: f32[2,128,384], index: 3, kind: input, shape index: {}]   ;;  %s3955_s4 = inlined_call_operand.vmem [shape: f32[2,1,384], index: 4, kind: input, shape index: {}]   ;;  %s3956_s5 = inlined_call_operand.hbm [shape: f32[2,128,128], index: 5, kind: input, shape index: {}]   ;;  %s3957_s6 = inlined_call_operand.vmem [shape: f32[2,1,128], index: 6, kind: input, shape index: {}]   ;;  %s3958_s7 = inlined_call_operand.vmem [shape: f32[2,1,128], index: 7, kind: input, shape index: {}]   ;;  %s3959_s8 = inlined_call_operand.vmem [shape: f32[2,1,128], index: 8, kind: input, shape index: {}]   ;;  %s3960_s9 = inlined_call_operand.hbm [shape: f32[2,128,128], index: 9, kind: input, shape index: {}]   ;;  %s3961_s10 = inlined_call_operand.vmem [shape: f32[2,1,128], index: 10, kind: input, shape index: {}]   ;;  %s3962_s11 = inlined_call_operand.hbm [shape: f32[2,128,128], index: 11, kind: input, shape index: {}]   ;;  %s3963_s12 = inlined_call_operand.vmem [shape: f32[2,1,128], index: 12, kind: input, shape index: {}]   ;;  %s3964_s13 = inlined_call_operand.hbm [shape: f32[2,8,128], index: 13, kind: output, shape index: {}]  }
   0x1   :  { %3994 = sst [smem:[#allocation33_spill]] %s3951_s0 }
   0x2   :  { %3995 = sst [smem:[#allocation34_spill]] %s3952_s1 }
   0x3   :  { %3996 = sst [smem:[#allocation35_spill]] %s3953_s2 }
   0x4   :  { %3997 = sst [smem:[#allocation36_spill]] %s3954_s3 }
   0x5   :  { %3998 = sst [smem:[#allocation37_spill]] %s3955_s4 }
   0x6   :  { %3999 = sst [smem:[#allocation38_spill]] %s3956_s5 }
   0x7   :  { %4000 = sst [smem:[#allocation39_spill]] %s3957_s6 }
   0x8   :  { %4001 = sst [smem:[#allocation40_spill]] %s3958_s7 }
   0x9   :  { %4002 = sst [smem:[#allocation41_spill]] %s3959_s8 }
   0xa   :  { %4003 = sst [smem:[#allocation42_spill]] %s3960_s9 }
   0xb   :  { %4004 = sst [smem:[#allocation43_spill]] %s3961_s10 }
   0xc   :  { %4005 = sst [smem:[#allocation44_spill]] %s3962_s11 }
   0xd   :  { %4006 = sst [smem:[#allocation45_spill]] %s3963_s12 }
   0xe   :  { %4007 = sst [smem:[#allocation46_spill]] %s3964_s13 }
   0xf   :  { %18 = vsyncpa [#allocation4], 0 }
  0x10   :  { %20 = vsyncpa [#allocation4 + $0x1], 0 }
  0x11   :  { %21 = vsyncpa [#allocation7], 0 }
  0x12   :  { %23 = vsyncpa [#allocation7 + $0x1], 0 }
  0x13   :  { %24 = vsyncpa [#allocation10], 0 }
  0x14   :  { %26 = vsyncpa [#allocation10 + $0x1], 0 }
  0x15   :  { %27 = vsyncpa [#allocation5], 0 }
  0x16   :  { %29 = vsyncpa [#allocation5 + $0x1], 0  ;;  %s3210_s25 = smov 0   ;;  %s3212_s26 = smov 0  }
  0x17   :  { %s3214_s27 = smov 0   ;;  %s3216_s28 = smov 0  }
  0x18   :  { %s3218_s29 = smov 0   ;;  %s3220_s30 = smov 0  }
  0x19   :  { %s3222_s14 = smov 0   ;;  %s3224_s15 = smov 0  }
  0x1a   :  { %s3226_s16 = smov 0   ;;  %s3228_s17 = smov 0  }
  0x1b   :  { %s3230_s18 = smov 0  }
  0x1c LB: > { %4008 = sst [smem:[#allocation17_spill]] %s3086_s26  ;;  %p3968_p0 = scmp.eq.s32.totalorder %s3122_s18, 0  ;;  %s3122_s18 = sphi %s3230_s18, %s35_s18   ;;  %s3118_s17 = sphi %s3228_s17, %s4094_s17   ;;  %s3114_s16 = sphi %s3226_s16, %s4093_s16   ;;  %s3110_s15 = sphi %s3224_s15, %s4092_s15   ;;  %s3106_s14 = sphi %s3222_s14, %s4091_s14   ;;  %s3102_s30 = sphi %s3220_s30, %s4090_s30   ;;  %s3098_s29 = sphi %s3218_s29, %s4089_s29   ;;  %s3094_s28 = sphi %s3216_s28, %s4088_s28   ;;  %s3090_s27 = sphi %s3214_s27, %s4087_s27   ;;  %s3086_s26 = sphi %s3212_s26, %s4086_s26   ;;  %s3082_s25 = sphi %s3210_s25, %s4085_s25  }
  0x1d   : > { %4009 = sst [smem:[#allocation18_spill]] %s3090_s27  ;;  %p139_p1 = scmp.ne.s32.totalorder %s3090_s27, %s3086_s26 }
  0x1e   : > { %4010 = sst [smem:[#allocation19_spill]] %s3094_s28  ;;  %p3967_p4 = scmp.lt.s32.totalorder %s3122_s18, 4 }
  0x1f   : > { %4011 = sst [smem:[#allocation20_spill]] %s3098_s29  ;;  %p141_p3 = por %p139_p1, %p3968_p0 }
  0x20   : > { %4012 = sst [smem:[#allocation21_spill]] %s3102_s30  ;;  %s3966_s22 = sand.u32 1, %s3090_s27  }
  0x21   : > { %4013 = sst [smem:[#allocation22_spill]] %s3106_s14  ;;  %s2682_s23 = smul.u32 384, %s3966_s22 }
  0x22   : > { %4014 = sst [smem:[#allocation23_spill]] %s3110_s15  ;;  %s2683_s24 = smul.u32 6144, %s3114_s16 }
  0x23   : > { %4015 = sst [smem:[#allocation24_spill]] %s3114_s16  ;;  %p3282_p5 = pnand %p3967_p4, %p141_p3 }
  0x24   : > { %4016 = sst [smem:[#allocation25_spill]] %s3118_s17  ;;  %s463_s21 = scalar_lea.vmem [#allocation6], %s2682_s23 }
  0x25   : > { %4017 = sst [smem:[#allocation26_spill]] %s3122_s18  ;;  %s470_s12 = sshll.u32 %s463_s21, 4  ;;  %s3291_s12 = int_to_ptr.vmem [resolvable:$true] %s470_s12 }
  0x26   : > { %s4018_s13 = scalar_select %p3282_p5, 1, 0 }
  0x27   : > { %s4019_s3 = sld [smem:[#allocation36_spill]]  ;;  %s4020_s22 = sand.u32 1, %s3122_s18  }
  0x28   : > { %s3296_s10 = scalar_lea.sflag [#allocation7], %s4020_s22  ;;  %p3302_p8 = pneg %p3282_p5 }
  0x2d   : > { %s3289_s20 = scalar_lea.hbm %s4019_s3, %s2683_s24  ;;  %s2847_s21 = scalar_lea.hbm %s4019_s3, 12288 }
  0x2e   : > { %s2842_s4 = scalar_lea.hbm %s3289_s20, 6144  ;;  %p2848_p11 = scmp.lt.u32.totalorder %s3289_s20, %s4019_s3 }
  0x2f   : > { %p2843_p7 = scmp.ne.s32.totalorder %s3289_s20, %s2842_s4  ;;  %p2849_p12 = scmp.lt.u32.totalorder %s2847_s21, %s2842_s4 }
  0x30   : > { %p2851_p1 = scmp.lt.u32.totalorder %s2842_s4, %s3289_s20 }
  0x31   : > { %p2845_p9 = pnand %p3302_p8, %p2843_p7  ;;  %p2850_p13 = por %p2849_p12, %p2848_p11 }
  0x33   : > { %p2846_p10 = pneg %p2845_p9  ;;  %p2852_p3 = por %p2851_p1, %p2850_p13 }
  0x35   : > { %p2853_p4 = pnand %p2852_p3, %p2846_p10 }
  0x37   : > { %2856 = shalt.err (!%p2853_p4)
}
  0x38   : > { %s2857_s22 = scalar_lea.vmem %s3291_s12, 6144  ;;  %s3124_s19 = smov [#allocation6]  }
  0x39   : > { %p2858_p7 = scmp.ne.s32.totalorder %s3291_s12, %s2857_s22  ;;  %s2862_s23 = sshll.u32 %s3124_s19, 4  ;;  %s2863_s23 = int_to_ptr.vmem [resolvable:$false] %s2862_s23 }
  0x3a   : > { %s2864_s8 = scalar_lea.vmem %s2863_s23, 12288  ;;  %p2865_p0 = scmp.lt.s32.totalorder %s3291_s12, %s2863_s23 }
  0x3b   : > { %p2860_p9 = pnand %p2858_p7, %p3302_p8  ;;  %p2866_p6 = scmp.lt.s32.totalorder %s2864_s8, %s2857_s22 }
  0x3d   : > { %p2861_p2 = pneg %p2860_p9  ;;  %p2867_p11 = por %p2866_p6, %p2865_p0 }
  0x3f   : > { %p2868_p12 = pnand %p2867_p11, %p2861_p2 }
  0x41   : > { %2871 = shalt.err (!%p2868_p12)
}
  0x42   : > { %s3125_s4 = smov 384   ;;  %s3126_s21 = smov 24  }
  0x43   : > { %2704 = dma.hbm_to_vmem [thread:$0]  (!%p3282_p5), %s3289_s20, 6144, %s3291_s12, %s3296_s10, %s3125_s4, %s3125_s4, %s3126_s21  }
  0x44   : > { %p578_p4 = scmp.lt.s32.totalorder %s3122_s18, 5  ;;  %s4022_s24 = sand.u32 1, %s3090_s27  }
  0x45   : > { %s3329_s22 = sshll.u32 %s4022_s24, 7  ;;  %s3332_s19 = sshll.u32 %s3114_s16, 11 }
  0x46   : > { %p4023_p0 = scmp.ge.s32.totalorder %s3122_s18, 1  ;;  %s4025_s9 = sld [smem:[#allocation42_spill]] }
  0x47   : > { %s530_s12 = scalar_lea.vmem [#allocation9], %s3329_s22  ;;  %s4026_s4 = sand.u32 1, %s3122_s18  }
  0x48   : > { %p3336_p2 = pnand %p4023_p0, %p578_p4  ;;  %s537_s20 = sshll.u32 %s530_s12, 4  ;;  %s3347_s20 = int_to_ptr.vmem [resolvable:$true] %s537_s20 }
  0x49   : > { %s3351_s21 = scalar_lea.sflag [#allocation10], %s4026_s4 }
  0x4a   : > { %s4024_s23 = scalar_select %p3336_p2, 1, 0 }
  0x4c   : > { %s3344_s7 = scalar_lea.hbm %s4025_s9, %s3332_s19  ;;  %s2877_s8 = scalar_lea.hbm %s4025_s9, 4096 }
  0x4d   : > { %s2872_s24 = scalar_lea.hbm %s3344_s7, 2048  ;;  %p2878_p1 = scmp.lt.u32.totalorder %s3344_s7, %s4025_s9 }
  0x4e   : > { %p2873_p6 = scmp.ne.s32.totalorder %s3344_s7, %s2872_s24  ;;  %p2879_p3 = scmp.lt.u32.totalorder %s2877_s8, %s2872_s24 }
  0x4f   : > { %p2881_p9 = scmp.lt.u32.totalorder %s2872_s24, %s3344_s7 }
  0x50   : > { %p2875_p10 = pnand %p2873_p6, %p3302_p8  ;;  %p2880_p7 = por %p2879_p3, %p2878_p1 }
  0x52   : > { %p2876_p13 = pneg %p2875_p10  ;;  %p2882_p11 = por %p2881_p9, %p2880_p7 }
  0x54   : > { %p2883_p12 = pnand %p2882_p11, %p2876_p13 }
  0x56   : > { %2886 = shalt.err (!%p2883_p12)
}
  0x57   : > { %s2887_s12 = scalar_lea.vmem %s3347_s20, 2048  ;;  %s3127_s6 = smov [#allocation9]  }
  0x58   : > { %p2888_p4 = scmp.ne.s32.totalorder %s3347_s20, %s2887_s12  ;;  %s2892_s4 = sshll.u32 %s3127_s6, 4  ;;  %s2893_s4 = int_to_ptr.vmem [resolvable:$false] %s2892_s4 }
  0x59   : > { %s2894_s1 = scalar_lea.vmem %s2893_s4, 4096  ;;  %p2895_p10 = scmp.lt.s32.totalorder %s3347_s20, %s2893_s4 }
  0x5a   : > { %p2890_p0 = pnand %p2888_p4, %p3302_p8  ;;  %p2896_p2 = scmp.lt.s32.totalorder %s2894_s1, %s2887_s12 }
  0x5c   : > { %p2891_p6 = pneg %p2890_p0  ;;  %p2897_p1 = por %p2896_p2, %p2895_p10 }
  0x5e   : > { %p2898_p3 = pnand %p2897_p1, %p2891_p6 }
  0x60   : > { %2901 = shalt.err (!%p2898_p3)
}
  0x61   : > { %s3969_s2 = smov 128   ;;  %s3971_s24 = smov 8  }
  0x62   : > { %2710 = dma.hbm_to_vmem [thread:$0]  (!%p3282_p5), %s3344_s7, 2048, %s3347_s20, %s3351_s21, %s3969_s2, %s3969_s2, %s3971_s24  }
  0x63   : > { %s3379_s3 = sadd.s32 4294967295, %s3122_s18   ;;  %s2239_s8 = sadd.s32 4294967294, %s3122_s18  }
  0x64   : > { %s4027_s12 = sadd.s32 1, %s3114_s16  ;;  %s47_s6 = sadd.s32 1, %s3118_s17 }
  0x65   : > { %p45_p2 = scmp.ge.s32.totalorder %s4027_s12, 2  ;;  %s54_s4 = sadd.s32 1, %s3102_s30 }
  0x66   : > { %s4028_s1 = smov %s4027_s12  ;;  %p61_p13 = scmp.ne.s32.totalorder %s3102_s30, %s3098_s29 }
  0x67   : > { %s4096_s1 = smov (%p45_p2, %s4028_s1), 0  ;;  %s4098_s6 = smov (!%p45_p2, %s47_s6), %s3118_s17 }
  0x68   : > { %4029 = sst [smem:[#allocation27_spill]] %s4096_s1  ;;  %p67_p7 = scmp.ne.s32.totalorder %s3098_s29, %s3094_s28 }
  0x69   : > { %p49_p9 = scmp.ge.s32.totalorder %s4098_s6, 2  ;;  %p68_p11 = scmp.eq.s32.totalorder %s3379_s3, 0 }
  0x6a   : > { %p4030_p12 = scmp.eq.s32.totalorder %s3122_s18, 0  ;;  %s129_s20 = ssub.s32 %s3114_s16, %s4096_s1 }
  0x6b   : > { %s4100_s6 = smov (%p49_p9, %s4098_s6), 0  ;;  %p3412_p0 = por %p68_p11, %p67_p7 }
  0x6c   : > { %p3401_p4 = por %p4030_p12, %p61_p13  ;;  %4032 = sst [smem:[#allocation28_spill]] %s4100_s6 }
  0x6d   : > { %s4033_s12 = scalar_select %p3412_p0, 1, 0 }
  0x6e   : > { %p130_p6 = scmp.eq.s32.totalorder %s129_s20, 0  ;;  %s51_s2 = ssub.s32 %s3118_s17, %s4100_s6 }
  0x6f   : > { %p4034_p10 = scmp.ne.s32.totalorder %s3086_s26, %s3082_s25  ;;  %p52_p3 = scmp.eq.s32.totalorder %s51_s2, 0 }
  0x70   : > { %p403_p2 = scmp.eq.s32.totalorder %s3379_s3, 3  ;;  %s4037_s9 = sadd.s32 1, %s3090_s27 }
  0x71   : > { %p3421_p1 = por %p4034_p10, %p68_p11  ;;  %p409_p12 = scmp.eq.s32.totalorder %s2239_s8, 3 }
  0x72   : > { %s3429_s1 = scalar_select %p130_p6, %s3090_s27, %s4037_s9  }
  0x73   : > { %s4035_s24 = scalar_select %p3421_p1, 1, 0 }
  0x74   : > { %4038 = sst [smem:[#allocation30_spill]] %s3429_s1  ;;  %p3437_p9 = por %p403_p2, %p61_p13 }
  0x75   : > { %4036 = sst [smem:[#allocation29_spill]] %s4035_s24  ;;  %s429_s20 = sand.u32 1, %s3102_s30  }
  0x76   : > { %s3432_s16 = scalar_select %p52_p3, %s3102_s30, %s54_s4  }
  0x77   : > { %s4040_s14 = scalar_select %p3437_p9, 1, 0 }
  0x78   : > { %4039 = sst [smem:[#allocation31_spill]] %s3432_s16  ;;  %s2243_s6 = sshll.u32 %s3118_s17, 7 }
  0x79   : > { %p3446_p11 = por %p409_p12, %p67_p7  ;;  %s2242_s2 = sshll.u32 %s429_s20, 3 }
  0x7a   : > { %s4043_s0 = sld [smem:[#allocation33_spill]]  ;;  %p4044_p6 = scmp.lt.s32.totalorder %s3122_s18, 4 }
  0x7b   : > { %s4041_s25 = scalar_select %p3446_p11, 1, 0 }
  0x7c   : > { %p3459_p13 = pnand %p4044_p6, %p3401_p4  ;;  %s433_s4 = scalar_lea.vmem [#allocation3], %s2242_s2 }
  0x7d   : > { %4042 = sst [smem:[#allocation32_spill]] %s4041_s25  ;;  %s440_s17 = sshll.u32 %s433_s4, 4  ;;  %s3463_s17 = int_to_ptr.vmem [resolvable:$true] %s440_s17 }
  0x7e   : > { %s430_s16 = scalar_lea.sflag [#allocation4], %s429_s20  ;;  %p2904_p10 = pneg %p3459_p13 }
  0x80   : > { %s3453_s9 = scalar_lea.hbm %s4043_s0, %s2243_s6  ;;  %s2907_s7 = scalar_lea.hbm %s4043_s0, 256 }
  0x81   : > { %s2902_s26 = scalar_lea.hbm %s3453_s9, 128  ;;  %p2908_p4 = scmp.lt.u32.totalorder %s3453_s9, %s4043_s0 }
  0x82   : > { %p2903_p7 = scmp.ne.s32.totalorder %s3453_s9, %s2902_s26  ;;  %p2909_p12 = scmp.lt.u32.totalorder %s2907_s7, %s2902_s26 }
  0x83   : > { %p2911_p11 = scmp.lt.u32.totalorder %s2902_s26, %s3453_s9 }
  0x84   : > { %p2905_p3 = pnand %p2904_p10, %p2903_p7  ;;  %p2910_p6 = por %p2909_p12, %p2908_p4 }
  0x86   : > { %p2906_p2 = pneg %p2905_p3  ;;  %p2912_p9 = por %p2911_p11, %p2910_p6 }
  0x88   : > { %p2913_p1 = pnand %p2912_p9, %p2906_p2 }
  0x8a   : > { %2916 = shalt.err (!%p2913_p1)
}
  0x8b   : > { %s2917_s20 = scalar_lea.vmem %s3463_s17, 128  ;;  %s3130_s2 = smov [#allocation3]  }
  0x8c   : > { %p2918_p7 = scmp.ne.s32.totalorder %s3463_s17, %s2917_s20  ;;  %s2922_s4 = sshll.u32 %s3130_s2, 4  ;;  %s2923_s4 = int_to_ptr.vmem [resolvable:$false] %s2922_s4 }
  0x8d   : > { %s2924_s30 = scalar_lea.vmem %s2923_s4, 256  ;;  %p2925_p5 = scmp.lt.s32.totalorder %s3463_s17, %s2923_s4 }
  0x8e   : > { %p2920_p3 = pnand %p2918_p7, %p2904_p10  ;;  %p2926_p4 = scmp.lt.s32.totalorder %s2924_s30, %s2917_s20 }
  0x90   : > { %p2921_p0 = pneg %p2920_p3  ;;  %p2927_p12 = por %p2926_p4, %p2925_p5 }
  0x92   : > { %p2928_p11 = pnand %p2927_p12, %p2921_p0 }
  0x94   : > { %2931 = shalt.err (!%p2928_p11)
}
  0x95   : > { %2701 = dma.hbm_to_vmem [thread:$0]  (!%p3459_p13), %s3453_s9, 128, %s3463_s17, %s430_s16  }
  0x96   : > { %s4046_s5 = sld [smem:[#allocation38_spill]]  ;;  %s491_s6 = scalar_lea.vmem [#allocation8], %s3329_s22 }
  0x97   : > { %s498_s7 = sshll.u32 %s491_s6, 4  ;;  %s3497_s7 = int_to_ptr.vmem [resolvable:$true] %s498_s7 }
  0x9c   : > { %s3494_s24 = scalar_lea.hbm %s4046_s5, %s3332_s19  ;;  %s2937_s17 = scalar_lea.hbm %s4046_s5, 4096 }
  0x9d   : > { %s2932_s8 = scalar_lea.hbm %s3494_s24, 2048  ;;  %p2938_p9 = scmp.lt.u32.totalorder %s3494_s24, %s4046_s5 }
  0x9e   : > { %p2933_p5 = scmp.ne.s32.totalorder %s3494_s24, %s2932_s8  ;;  %p2939_p13 = scmp.lt.u32.totalorder %s2937_s17, %s2932_s8 }
  0x9f   : > { %p2941_p2 = scmp.lt.u32.totalorder %s2932_s8, %s3494_s24 }
  0xa0   : > { %p2935_p0 = pnand %p2933_p5, %p3302_p8  ;;  %p2940_p10 = por %p2939_p13, %p2938_p9 }
  0xa2   : > { %p2936_p1 = pneg %p2935_p0  ;;  %p2942_p6 = por %p2941_p2, %p2940_p10 }
  0xa4   : > { %p2943_p7 = pnand %p2942_p6, %p2936_p1 }
  0xa6   : > { %2946 = shalt.err (!%p2943_p7)
}
  0xa7   : > { %s2947_s4 = scalar_lea.vmem %s3497_s7, 2048  ;;  %s3131_s30 = smov [#allocation8]  }
  0xa8   : > { %p2948_p3 = scmp.ne.s32.totalorder %s3497_s7, %s2947_s4  ;;  %s2952_s1 = sshll.u32 %s3131_s30, 4  ;;  %s2953_s1 = int_to_ptr.vmem [resolvable:$false] %s2952_s1 }
  0xa9   : > { %s2954_s26 = scalar_lea.vmem %s2953_s1, 4096  ;;  %p2955_p11 = scmp.lt.s32.totalorder %s3497_s7, %s2953_s1 }
  0xaa   : > { %p2950_p4 = pnand %p2948_p3, %p3302_p8  ;;  %p2956_p5 = scmp.lt.s32.totalorder %s2954_s26, %s2947_s4 }
  0xac   : > { %p2951_p12 = pneg %p2950_p4  ;;  %p2957_p0 = por %p2956_p5, %p2955_p11 }
  0xae   : > { %p2958_p9 = pnand %p2957_p0, %p2951_p12 }
  0xb0   : > { %2961 = shalt.err (!%p2958_p9)
}
  0xb1   : > { %p4047_p1 = scmp.ne.s32.totalorder %s4018_s13, 0  ;;  %s4048_s6 = smov 8  }
  0xb2   : > { %s4049_s8 = smov 128   ;;  %s4050_s11 = sld [smem:[#allocation44_spill]] }
  0xb3   : > { %2707 = dma.hbm_to_vmem [thread:$0]  (!%p4047_p1), %s3494_s24, 2048, %s3497_s7, %s3296_s10, %s4049_s8, %s4049_s8, %s4048_s6  }
  0xb4   : > { %s557_s9 = scalar_lea.vmem [#allocation11], %s3329_s22 }
  0xb5   : > { %s564_s2 = sshll.u32 %s557_s9, 4  ;;  %s3531_s2 = int_to_ptr.vmem [resolvable:$true] %s564_s2 }
  0xb8   : > { %s3528_s17 = scalar_lea.hbm %s4050_s11, %s3332_s19  ;;  %s2967_s24 = scalar_lea.hbm %s4050_s11, 4096 }
  0xb9   : > { %s2962_s4 = scalar_lea.hbm %s3528_s17, 2048  ;;  %p2968_p6 = scmp.lt.u32.totalorder %s3528_s17, %s4050_s11 }
  0xba   : > { %p2963_p13 = scmp.ne.s32.totalorder %s3528_s17, %s2962_s4  ;;  %p2969_p7 = scmp.lt.u32.totalorder %s2967_s24, %s2962_s4 }
  0xbb   : > { %p2971_p4 = scmp.lt.u32.totalorder %s2962_s4, %s3528_s17 }
  0xbc   : > { %p2965_p10 = pnand %p2963_p13, %p3302_p8  ;;  %p2970_p3 = por %p2969_p7, %p2968_p6 }
  0xbe   : > { %p2966_p2 = pneg %p2965_p10  ;;  %p2972_p12 = por %p2971_p4, %p2970_p3 }
  0xc0   : > { %p2973_p11 = pnand %p2972_p12, %p2966_p2 }
  0xc2   : > { %2976 = shalt.err (!%p2973_p11)
}
  0xc3   : > { %s2977_s22 = scalar_lea.vmem %s3531_s2, 2048  ;;  %s3132_s1 = smov [#allocation11]  }
  0xc4   : > { %p2978_p5 = scmp.ne.s32.totalorder %s3531_s2, %s2977_s22  ;;  %s2982_s26 = sshll.u32 %s3132_s1, 4  ;;  %s2983_s26 = int_to_ptr.vmem [resolvable:$false] %s2982_s26 }
  0xc5   : > { %s2984_s20 = scalar_lea.vmem %s2983_s26, 4096  ;;  %p2985_p13 = scmp.lt.s32.totalorder %s3531_s2, %s2983_s26 }
  0xc6   : > { %p2980_p0 = pnand %p2978_p5, %p3302_p8  ;;  %p2986_p10 = scmp.lt.s32.totalorder %s2984_s20, %s2977_s22 }
  0xc8   : > { %p2981_p9 = pneg %p2980_p0  ;;  %p2987_p6 = por %p2986_p10, %p2985_p13 }
  0xca   : > { %p2988_p7 = pnand %p2987_p6, %p2981_p9 }
  0xcc   : > { %2991 = shalt.err (!%p2988_p7)
}
  0xcd   : > { %2713 = dma.hbm_to_vmem [thread:$0]  (!%p4047_p1), %s3528_s17, 2048, %s3531_s2, %s3351_s21, %s4049_s8, %s4049_s8, %s4048_s6  }
  0xce   : > { %p4051_p8 = scmp.ne.s32.totalorder %s4024_s23, 0 }
  0xcf   : > { %s3561_s15 = sand.u32 (!%p4051_p8), 1, %s3098_s29   ;;  %p4052_p2 = scmp.ne.s32.totalorder (!%p4051_p8), %s4033_s12, 0 }
  0xd0   : > { %582 = sbr.rel (%p4051_p8) target bundleno = 2828 (0xb0c), region = 72  ;;  %s3987_s16 = sshll.u32 (!%p4051_p8), %s3561_s15, 3 }
  0xd1   : > { %s585_s9 = scalar_lea.sflag (!%p4051_p8), [#allocation4], %s3561_s15  ;;  %s3567_s13 = scalar_lea.vmem (!%p4051_p8), [#allocation3], %s3987_s16 }
  0xd7   : > { %3065 = dma.done.wait (%p4052_p2), %s585_s9, 128  }
  0xd8   : > { %3067 = vsyncadd (%p4052_p2), %s585_s9, 4294967168  ;;  %s4053_s23 = sld [smem:[#allocation17_spill]]  ;;  %s4054_s21 = sld [smem:[#allocation29_spill]] }
  0xd9   : > { %s593_s6 = sand.u32 1, %s3379_s3  }
  0xda   : > { %s594_s2 = scalar_lea.sflag [#allocation7], %s593_s6 }
  0xde   : > { %s595_s8 = sand.u32 1, %s4053_s23   ;;  %p4055_p1 = scmp.ne.s32.totalorder %s4054_s21, 0 }
  0xdf   : > { %s2684_s17 = smul.u32 384, %s595_s8 }
  0xe1   : > { %s3575_s4 = scalar_lea.vmem [#allocation6], %s2684_s17 }
  0xe2   : > { %3069 = dma.done.wait (%p4055_p1), %s594_s2, 8192  }
  0xe3   : > { %3071 = vsyncadd (%p4055_p1), %s594_s2, 4294959104  ;;  %s2256_s30 = sshll.u32 %s595_s8, 7  ;;  %s612_s12 = scalar_lea.sflag [#allocation10], %s593_s6 }
  0xe4   : > { %s3581_s10 = scalar_lea.vmem [#allocation8], %s2256_s30  ;;  %s3583_s24 = scalar_lea.vmem [#allocation9], %s2256_s30 }
  0xe5   : > { %3073 = dma.done.wait (%p4055_p1), %s612_s12, 4096  }
  0xe6   : > { %3075 = vsyncadd (%p4055_p1), %s612_s12, 4294963200  ;;  %s4056_s3 = sld [smem:[#allocation22_spill]]  ;;  %s4060_s19 = sld [smem:[#allocation40_spill]] }
  0xe7   : > { %s4061_s29 = sld [smem:[#allocation41_spill]]  ;;  %s4062_s1 = sld [smem:[#allocation37_spill]] }
  0xe8   : > { %s4063_s23 = sld [smem:[#allocation43_spill]]  ;;  %s4064_s17 = sld [smem:[#allocation45_spill]] }
  0xe9   : > { %s3627_s12 = scalar_lea.vmem [#allocation11], %s2256_s30  ;;  %s4065_s0 = sshll.u32 %s3561_s15, 3 }
  0xea   : > { %s3631_s16 = scalar_lea.vmem [#allocation12], %s4065_s0 }
  0xec   : > { %p712_p3 = scmp.lt.s32.totalorder %s4056_s3, 1  ;;  %p2260_p4 = scmp.ne.s32.totalorder %s4056_s3, 0 }
  0xed   : > { %v741_v0 = vld [vmem:[%s3567_s13] sm:$0xff] (!%p2260_p4) }
  0xee   : > { %s3591_s7 = scalar_select %p712_p3, %s4056_s3, 1 }
  0xef   : > { %740 = sbr.rel (%p2260_p4) target bundleno = 246 (0xf6), region = 96  ;;  %742 = vst [vmem:[#allocation2] sm:$0xff] (!%p2260_p4), %v741_v0 }
  0xf0   : > { %s2685_s6 = smul.u32 3, %s3591_s7  ;;  %s727_s22 = scalar_lea.vmem %s4060_s19, %s3591_s7 }
  0xf1   : > { %s730_s27 = scalar_lea.vmem %s4061_s29, %s3591_s7  ;;  %s733_s21 = scalar_lea.vmem %s4063_s23, %s3591_s7 }
  0xf2   : > { %s3617_s26 = scalar_lea.vmem %s4062_s1, %s2685_s6  ;;  %s736_s2 = scalar_lea.vmem %s4064_s17, %s3591_s7 }
  0xf6 PF: > { %v3635_v1 = vld [vmem:[#allocation2] sm:$0xff]  ;;  %v3133_v2 = vmov 0.0   ;;  %v781_v4 = vld [vmem:[%s3575_s4 + $0x20] sm:$0xff]  ;;  %v3134_v7 = vmov 0.0|0.0   ;;  %v780_v8 = vld [vmem:[%s3575_s4 + $0x18] sm:$0xff]  ;;  %v744_v31 = vlaneseq  ;;  %vm3135_vm1 = vmmov 0  }
  0xf7   : > { %749 = vadd.xlane.f32.xlu0 %v3635_v1  ;;  %906 = vmatprep.mubr.f32.mxu0 %v3133_v2  ;;  %v778_v3 = vld [vmem:[%s3575_s4 + $0x8] sm:$0xff]  ;;  %v777_v5 = vld [vmem:[%s3575_s4] sm:$0xff]  ;;  %v779_v9 = vld [vmem:[%s3575_s4 + $0x10] sm:$0xff]  ;;  %s4066_s28 = sld [smem:[#allocation34_spill]]  ;;  %s4068_s13 = sld [smem:[#allocation35_spill]]  ;;  %vm1007_vm2 = vcmask 261120  }
  0xf8   : > { %v2554_v6 = vpack.c.bf16 %v781_v4, %v778_v3  ;;  %2586 = vmatprep.subr.bf16.mxu1 %v3134_v7  ;;  %v782_v10 = vld [vmem:[%s3575_s4 + $0x28] sm:$0xff]  ;;  %v2556_v11 = vpack.c.bf16 %v780_v8, %v777_v5  ;;  %v784_v13 = vld [vmem:[%s3575_s4 + $0x38] sm:$0xff]  ;;  %v787_v14 = vld [vmem:[%s3575_s4 + $0x50] sm:$0xff]  ;;  %v745_v32 = vand.u32 127, %v744_v31  ;;  %2406 = vmatprep.mubr.msk.f32.mxu1 %vm3135_vm1, %v3133_v2  ;;  %s3136_s30 = smov 96   ;;  %s3137_s3 = smov 64  }
  0xf9   : > { %v2587_v12 = vpack.c.bf16 %v782_v10, %v779_v9  ;;  %v783_v15 = vld [vmem:[%s3575_s4 + $0x30] sm:$0xff]  ;;  %v2558_v16 = vpack.c.bf16 %v787_v14, %v784_v13  ;;  %v786_v17 = vld [vmem:[%s3575_s4 + $0x48] sm:$0xff]  ;;  %v785_v18 = vld [vmem:[%s3575_s4 + $0x40] sm:$0xff]  ;;  %vm1304_vm3 = vcmask 64512   ;;  %vm1654_vm4 = vcmask 523264   ;;  %s4070_s19 = sld [smem:[#allocation39_spill]] }
  0xfa   : > { %2555 = vmatprep.subr.bf16.mxu0 %v2554_v6  ;;  %v788_v19 = vld [vmem:[%s3575_s4 + $0x58] sm:$0xff]  ;;  %v2560_v20 = vpack.c.bf16 %v786_v17, %v783_v15  ;;  %v790_v22 = vld [vmem:[%s3575_s4 + $0x68] sm:$0xff]  ;;  %v793_v23 = vld [vmem:[%s3575_s4 + $0x80] sm:$0xff]  ;;  %vm746_vm0 = vcmp.lt.s32.totalorder %v745_v32, 32  ;;  %vm1656_vm5 = vcmask 785408  }
  0xfb   : > { %2557 = vmatpush1.bf16.msra.mxu0 %v2556_v11  ;;  %2588 = vmatpush3.bf16.msra.mxu1 %v2587_v12  ;;  %v2590_v21 = vpack.c.bf16 %v788_v19, %v785_v18  ;;  %v789_v24 = vld [vmem:[%s3575_s4 + $0x60] sm:$0xff]  ;;  %v2562_v25 = vpack.c.bf16 %v793_v23, %v790_v22  ;;  %v792_v26 = vld [vmem:[%s3575_s4 + $0x78] sm:$0xff]  ;;  %v791_v27 = vld [vmem:[%s3575_s4 + $0x70] sm:$0xff]  ;;  %v3663_v35 = vsel %vm746_vm0, 1.0, %v3133_v2 }
  0xfc   : > { %2559 = vmatprep.subr.bf16.mxu0 %v2558_v16  ;;  %2589 = vmatprep.subr.bf16.mxu1 %v3134_v7  ;;  %v794_v28 = vld [vmem:[%s3575_s4 + $0x88] sm:$0xff]  ;;  %v2564_v29 = vpack.c.bf16 %v792_v26, %v789_v24  ;;  %v796_v39 = vld [vmem:[%s3575_s4 + $0x98] sm:$0xff]  ;;  %v799_v40 = vld [vmem:[%s3575_s4 + $0xb0] sm:$0xff] }
  0xfd   : > { %v2593_v30 = vpack.c.bf16 %v794_v28, %v791_v27  ;;  %v2566_v41 = vpack.c.bf16 %v799_v40, %v796_v39  ;;  %v795_v42 = vld [vmem:[%s3575_s4 + $0x90] sm:$0xff]  ;;  %v798_v43 = vld [vmem:[%s3575_s4 + $0xa8] sm:$0xff]  ;;  %v797_v44 = vld [vmem:[%s3575_s4 + $0xa0] sm:$0xff]  ;;  %s4067_s29 = scalar_lea.vmem %s4066_s28, %s3591_s7 }
  0xfe   : > { %v2568_v45 = vpack.c.bf16 %v798_v43, %v795_v42  ;;  %v800_v46 = vld [vmem:[%s3575_s4 + $0xb8] sm:$0xff]  ;;  %v802_v48 = vld [vmem:[%s3575_s4 + $0xc8] sm:$0xff]  ;;  %v805_v49 = vld [vmem:[%s3575_s4 + $0xe0] sm:$0xff] }
  0xff   : > { %2561 = vmatpush1.bf16.msra.mxu0 %v2560_v20  ;;  %2591 = vmatpush3.bf16.msra.mxu1 %v2590_v21  ;;  %v2596_v47 = vpack.c.bf16 %v800_v46, %v797_v44  ;;  %v2570_v50 = vpack.c.bf16 %v805_v49, %v802_v48  ;;  %v801_v51 = vld [vmem:[%s3575_s4 + $0xc0] sm:$0xff]  ;;  %v804_v52 = vld [vmem:[%s3575_s4 + $0xd8] sm:$0xff]  ;;  %v803_v53 = vld [vmem:[%s3575_s4 + $0xd0] sm:$0xff]  ;;  %s4071_s1 = scalar_lea.vmem %s4070_s19, %s3591_s7 }
 0x100   : > { %2563 = vmatprep.subr.bf16.mxu0 %v2562_v25  ;;  %2592 = vmatprep.subr.bf16.mxu1 %v3134_v7  ;;  %v2572_v54 = vpack.c.bf16 %v804_v52, %v801_v51  ;;  %v806_v55 = vld [vmem:[%s3575_s4 + $0xe8] sm:$0xff]  ;;  %v808_v56 = vld [vmem:[%s3575_s4 + $0xf8] sm:$0xff]  ;;  %v811_v57 = vld [vmem:[%s3575_s4 + $0x110] sm:$0xff] }
 0x101   : > { %v2599_v58 = vpack.c.bf16 %v806_v55, %v803_v53  ;;  %v2574_v59 = vpack.c.bf16 %v811_v57, %v808_v56  ;;  %v807_v60 = vld [vmem:[%s3575_s4 + $0xf0] sm:$0xff]  ;;  %v810_v61 = vld [vmem:[%s3575_s4 + $0x108] sm:$0xff]  ;;  %v809_v62 = vld [vmem:[%s3575_s4 + $0x100] sm:$0xff] }
 0x102   : > { %v2576_v63 = vpack.c.bf16 %v810_v61, %v807_v60  ;;  %v812_v0 = vld [vmem:[%s3575_s4 + $0x118] sm:$0xff]  ;;  %v814_v3 = vld [vmem:[%s3575_s4 + $0x128] sm:$0xff]  ;;  %v817_v4 = vld [vmem:[%s3575_s4 + $0x140] sm:$0xff] }
 0x103   : > { %2565 = vmatpush1.bf16.msra.mxu0 %v2564_v29  ;;  %2594 = vmatpush3.bf16.msra.mxu1 %v2593_v30  ;;  %v2602_v5 = vpack.c.bf16 %v812_v0, %v809_v62  ;;  %v2578_v6 = vpack.c.bf16 %v817_v4, %v814_v3  ;;  %v813_v8 = vld [vmem:[%s3575_s4 + $0x120] sm:$0xff]  ;;  %v816_v9 = vld [vmem:[%s3575_s4 + $0x138] sm:$0xff]  ;;  %v815_v10 = vld [vmem:[%s3575_s4 + $0x130] sm:$0xff] }
 0x104   : > { %2595 = vmatprep.subr.bf16.mxu1 %v3134_v7  ;;  %2567 = vmatprep.subr.bf16.mxu0 %v2566_v41  ;;  %v818_v11 = vld [vmem:[%s3575_s4 + $0x148] sm:$0xff]  ;;  %v820_v12 = vld [vmem:[%s3575_s4 + $0x158] sm:$0xff]  ;;  %v823_v13 = vld [vmem:[%s3575_s4 + $0x170] sm:$0xff]  ;;  %v2580_v14 = vpack.c.bf16 %v816_v9, %v813_v8 }
 0x105   : > { %v2605_v15 = vpack.c.bf16 %v818_v11, %v815_v10  ;;  %v2582_v16 = vpack.c.bf16 %v823_v13, %v820_v12  ;;  %v819_v17 = vld [vmem:[%s3575_s4 + $0x150] sm:$0xff]  ;;  %v822_v18 = vld [vmem:[%s3575_s4 + $0x168] sm:$0xff]  ;;  %v821_v19 = vld [vmem:[%s3575_s4 + $0x160] sm:$0xff] }
 0x106   : > { %v824_v20 = vld [vmem:[%s3575_s4 + $0x178] sm:$0xff]  ;;  %v2584_v21 = vpack.c.bf16 %v822_v18, %v819_v17  ;;  %v2262_v27 = vld [vmem:[%s4067_s29] ss:$0 sm:$0xff]  ;;  %s4069_s4 = scalar_lea.vmem %s4068_s13, %s3591_s7 }
 0x107   : > { %2569 = vmatpush1.bf16.msra.mxu0 %v2568_v45  ;;  %2597 = vmatpush3.bf16.msra.mxu1 %v2596_v47  ;;  %v2608_v22 = vpack.c.bf16 %v824_v20, %v821_v19  ;;  %v2263_v29 = vld [vmem:[%s4069_s4] ss:$0 sm:$0xff] }
 0x108   : > { %2598 = vmatprep.subr.bf16.mxu1 %v3134_v7  ;;  %2571 = vmatprep.subr.bf16.mxu0 %v2570_v50 }
 0x10b   : > { %2573 = vmatpush1.bf16.msra.mxu0 %v2572_v54  ;;  %2600 = vmatpush3.bf16.msra.mxu1 %v2599_v58 }
 0x10c   : > { %2575 = vmatprep.subr.bf16.mxu0 %v2574_v59  ;;  %2601 = vmatprep.subr.bf16.mxu1 %v3134_v7 }
 0x10f   : > { %2577 = vmatpush1.bf16.msra.mxu0 %v2576_v63  ;;  %2603 = vmatpush3.bf16.msra.mxu1 %v2602_v5 }
 0x110   : > { %2579 = vmatprep.subr.bf16.mxu0 %v2578_v6  ;;  %2604 = vmatprep.subr.bf16.mxu1 %v3134_v7 }
 0x113   : > { %2581 = vmatpush1.bf16.msra.mxu0 %v2580_v14  ;;  %2606 = vmatpush3.bf16.msra.mxu1 %v2605_v15 }
 0x114   : > { %2583 = vmatprep.subr.bf16.mxu0 %v2582_v16  ;;  %2607 = vmatprep.subr.bf16.mxu1 %v3134_v7 }
 0x117   : > { %2585 = vmatpush1.bf16.msra.mxu0 %v2584_v21  ;;  %2609 = vmatpush3.bf16.msra.mxu1 %v2608_v22 }
 0x118   : > { %2610 = vmatprep.subr.bf16.mxu0 %v3134_v7  ;;  %2409 = vmatprep.subr.mxu1 %v3133_v2 }
 0x184   : > { %v750_v33 = vpop.xlane.xlu0 %749 }
 0x185   : > { %v751_v34 = vmul.f32 0.03125, %v750_v33  ;;  %v828_v33 = vshrl.u32 %v744_v31, 7 }
 0x187   : > { %v752_v36 = vsub.f32 %v3635_v1, %v751_v34  ;;  %v829_v34 = vsub.s32 0, %v828_v33  ;;  %v837_v47 = vsub.s32 2, %v828_v33 }
 0x189   : > { %v3667_v37 = vmul.f32 %v3663_v35, %v752_v36  ;;  %v825_v36 = vld [vmem:[%s3617_s26] sm:$0x7]  ;;  %s3138_s26 = smov 32  }
 0x18a   : > { %v838_v50 = vrot.slane %v825_v36, %v837_v47  ;;  %v1661_v47 = vld [vmem:[%s3581_s10 + $0x18] sm:$0xff] }
 0x18b   : > { %v754_v38 = vmul.f32 %v3667_v37, %v3667_v37 }
 0x18d   : > { %755 = vadd.xlane.f32.xlu0 %v754_v38  ;;  %v830_v38 = vrot.slane %v825_v36, %v829_v34 }
 0x21a   : > { %v756_v23 = vpop.xlane.xlu0 %755 }
 0x21b   : > { %v757_v24 = vmul.f32 0.03125, %v756_v23 }
 0x21d   : > { %v758_v25 = vadd.f32 1e-05, %v757_v24 }
 0x21f   : > { %2818 = vrsqrt.f32 %v758_v25 }
 0x229   : > { %v2819_v26 = vpop.eup %2818 }
 0x22a   : > { %v760_v28 = vmul.f32 %v2819_v26, %v3667_v37  ;;  %v833_v37 = vsub.s32 1, %v828_v33 }
 0x22c   : > { %v768_v30 = vmul.f32 %v2262_v27, %v760_v28  ;;  %v834_v39 = vrot.slane %v825_v36, %v833_v37 }
 0x22e   : > { %v776_v32 = vadd.f32 %v2263_v29, %v768_v30 }
 0x230   : > { %907 = vmatmul.mubr.f32.vlgmr.msra.gmra.mrb[0].mxu0 %v776_v32  ;;  %2407 = vmatmul.mubr.f32.vlgmr.msra.gmra.mrb[0].mxu1 %v776_v32 }
 0x231   : > { %2411 = vmatprep.mubr.msk.f32.mxu1 %vm3135_vm1, %v3133_v2  ;;  %2481 = vmatprep.mubr.msk.f32.mxu0 %vm3135_vm1, %v3133_v2 }
 0x303   : > { %v908_v40 = vpop.f32.mrb[0].mxu0  ;;  %v979_v41 = vpop.f32.mrb[0].mxu1 }
 0x304   : > { %v909_v42 = vadd.f32 %v908_v40, %v830_v38  ;;  %v910_v43 = vpop.f32.mrb[1].mxu0  ;;  %v2408_v44 = vpop.f32.mrb[1].mxu1  ;;  %v980_v52 = vadd.f32 %v979_v41, %v838_v50  ;;  %v1663_v50 = vld [vmem:[%s3581_s10 + $0x28] sm:$0xff] }
 0x305   : > { %v911_v45 = vadd.f32 %v910_v43, %v834_v39  ;;  %v1658_v44 = vld [vmem:[%s3581_s10] sm:$0xff] }
 0x306   : > { %984 = vrot.lane.b32.xlu1 %v909_v42, %s3136_s30 }
 0x307   : > { %993 = vrot.lane.b32.xlu0 %v911_v45, %s3137_s3  ;;  %2410 = vmatpush3.xpose.msk.msra.mxu1 %vm1007_vm2, %v911_v45 }
 0x308   : > { %2414 = vmatprep.subr.mxu1 %v3133_v2 }
 0x30a   : > { %991 = vrot.lane.b32.xlu1 %v911_v45, %s3136_s30  ;;  %2412 = vmatmul.mubr.msk.f32.vlgmr.msra.gmra.mrb[2].mxu1 %vm1007_vm2, %v909_v42 }
 0x30b   : > { %2416 = vmatprep.mubr.msk.f32.mxu1 %vm3135_vm1, %v3133_v2 }
 0x30e   : > { %986 = vrot.lane.b32.xlu1 %v909_v42, %s3137_s3 }
 0x312   : > { %995 = vrot.lane.b32.xlu1 %v911_v45, %s3138_s26  ;;  %v1659_v45 = vld [vmem:[%s3581_s10 + $0x8] sm:$0xff] }
 0x316   : > { %988 = vrot.lane.b32.xlu1 %v909_v42, %s3138_s26 }
 0x378   : > { %v985_v31 = vpop.permute.xlu1 %984 }
 0x379   : > { %v994_v48 = vpop.permute.xlu0 %993 }
 0x37c   : > { %v992_v46 = vpop.permute.xlu1 %991 }
 0x37d   : > { %2415 = vmatpush3.xpose.msk.msra.mxu1 %vm1007_vm2, %v992_v46  ;;  %v2611_v46 = vpack.c.bf16 %v1659_v45, %v1658_v44  ;;  %v1791_v44 = vld [vmem:[%s3583_s24 + $0x58] sm:$0xff] }
 0x37e   : > { %2419 = vmatprep.subr.mxu1 %v3133_v2 }
 0x37f   : > { %2612 = vmatpush3.bf16.msra.mxu0 %v2611_v46 }
 0x380   : > { %v987_v49 = vpop.permute.xlu1 %986  ;;  %2417 = vmatmul.mubr.msk.f32.vlgmr.msra.gmra.mrb[4].mxu1 %vm1007_vm2, %v985_v31  ;;  %v1660_v31 = vld [vmem:[%s3581_s10 + $0x10] sm:$0xff]  ;;  %2613 = vmatprep.subr.bf16.mxu0 %v3134_v7 }
 0x381   : > { %2420 = vmatpush3.xpose.msk.msra.mxu1 %vm1007_vm2, %v994_v48  ;;  %2421 = vmatprep.mubr.msk.f32.mxu1 %vm3135_vm1, %v3133_v2  ;;  %v2614_v48 = vpack.c.bf16 %v1661_v47, %v1660_v31  ;;  %v1793_v31 = vld [vmem:[%s3583_s24 + $0x68] sm:$0xff]  ;;  %v1794_v47 = vld [vmem:[%s3583_s24 + $0x70] sm:$0xff] }
 0x382   : > { %2424 = vmatprep.subr.mxu1 %v3133_v2 }
 0x383   : > { %2615 = vmatpush3.bf16.msra.mxu0 %v2614_v48  ;;  %v1795_v48 = vld [vmem:[%s3583_s24 + $0x78] sm:$0xff] }
 0x384   : > { %v996_v51 = vpop.permute.xlu1 %995  ;;  %2422 = vmatmul.mubr.msk.f32.vlgmr.msra.gmra.mrb[6].mxu1 %vm1007_vm2, %v987_v49  ;;  %v1662_v49 = vld [vmem:[%s3581_s10 + $0x20] sm:$0xff]  ;;  %2616 = vmatprep.subr.bf16.mxu0 %v3134_v7 }
 0x385   : > { %2425 = vmatpush3.xpose.msk.msra.mxu1 %vm1007_vm2, %v996_v51  ;;  %2426 = vmatprep.mubr.msk.f32.mxu1 %vm3135_vm1, %v3133_v2  ;;  %v2617_v51 = vpack.c.bf16 %v1663_v50, %v1662_v49  ;;  %v2656_v49 = vpack.c.bf16 %v1795_v48, %v1794_v47 }
 0x386   : > { %2429 = vmatprep.subr.mxu1 %v3133_v2 }
 0x387   : > { %2618 = vmatpush3.bf16.msra.mxu0 %v2617_v51 }
 0x388   : > { %v989_v53 = vpop.permute.xlu1 %988  ;;  %2619 = vmatprep.subr.bf16.mxu0 %v3134_v7 }
 0x389   : > { %2427 = vmatmul.mubr.msk.f32.vlgmr.msra.gmra.mrb[8].mxu1 %vm1007_vm2, %v989_v53  ;;  %v1664_v53 = vld [vmem:[%s3581_s10 + $0x30] sm:$0xff] }
 0x38a   : > { %2430 = vmatpush3.msra.mxu1 %v980_v52  ;;  %2431 = vmatprep.mubr.msk.f32.mxu1 %vm3135_vm1, %v3133_v2 }
 0x38b   : > { %2434 = vmatprep.subr.mxu1 %v3133_v2 }
 0x3dd   : > { %v1078_v54 = vpop.f32.mrb[2].mxu1 }
 0x3de   : > { %v2413_v55 = vpop.f32.mrb[3].mxu1  ;;  %v1305_v56 = vsel %vm1304_vm3, %v1078_v54, -inf }
 0x3df   : > { %1306 = vmax.xlane.f32.xlu1 %v1305_v56 }
 0x453   : > { %v1152_v57 = vpop.f32.mrb[4].mxu1 }
 0x454   : > { %v2418_v58 = vpop.f32.mrb[5].mxu1  ;;  %v1308_v59 = vsel %vm1304_vm3, %v1152_v57, -inf }
 0x455   : > { %1309 = vmax.xlane.f32.xlu0 %v1308_v59  ;;  %v1666_v58 = vld [vmem:[%s3581_s10 + $0x40] sm:$0xff]  ;;  %v1667_v59 = vld [vmem:[%s3581_s10 + $0x48] sm:$0xff] }
 0x457   : > { %v1226_v60 = vpop.f32.mrb[6].mxu1 }
 0x458   : > { %v2423_v61 = vpop.f32.mrb[7].mxu1  ;;  %v1311_v62 = vsel %vm1304_vm3, %v1226_v60, -inf }
 0x459   : > { %1312 = vmax.xlane.f32.xlu1 %v1311_v62  ;;  %v2623_v61 = vpack.c.bf16 %v1667_v59, %v1666_v58  ;;  %v1668_v62 = vld [vmem:[%s3581_s10 + $0x50] sm:$0xff]  ;;  %v1881_v59 = vld [vmem:[%s3627_s12] sm:$0xff] }
 0x45c   : > { %v1300_v63 = vpop.f32.mrb[8].mxu1 }
 0x45d   : > { %v2428_v0 = vpop.f32.mrb[9].mxu1  ;;  %v1314_v3 = vsel %vm1304_vm3, %v1300_v63, -inf }
 0x45e   : > { %1315 = vmax.xlane.f32.xlu1 %v1314_v3  ;;  %v1670_v3 = vld [vmem:[%s3581_s10 + $0x60] sm:$0xff] }
 0x46c   : > { %v1307_v4 = vpop.xlane.xlu1 %1306 }
 0x46d   : > { %v1317_v5 = vsub.f32 %v1078_v54, %v1307_v4  ;;  %v1665_v54 = vld [vmem:[%s3581_s10 + $0x38] sm:$0xff]  ;;  %v1671_v4 = vld [vmem:[%s3581_s10 + $0x68] sm:$0xff] }
 0x46e   : > { %v2620_v56 = vpack.c.bf16 %v1665_v54, %v1664_v53  ;;  %v2277_v54 = vld [vmem:[%s727_s22] ss:$0 sm:$0xff] }
 0x46f   : > { %v1321_v6 = vmul.f32 1.442695, %v1317_v5  ;;  %v2629_v5 = vpack.c.bf16 %v1671_v4, %v1670_v3  ;;  %v1885_v3 = vld [vmem:[%s3627_s12 + $0x20] sm:$0xff]  ;;  %v1886_v4 = vld [vmem:[%s3627_s12 + $0x28] sm:$0xff] }
 0x470   : > { %2621 = vmatpush3.bf16.msra.mxu0 %v2620_v56  ;;  %v2278_v56 = vld [vmem:[%s730_s27] ss:$0 sm:$0xff] }
 0x471   : > { %2820 = vpow2.f32 %v1321_v6  ;;  %2622 = vmatprep.subr.bf16.mxu0 %v3134_v7  ;;  %v1672_v6 = vld [vmem:[%s3581_s10 + $0x70] sm:$0xff] }
 0x474   : > { %2624 = vmatpush3.bf16.msra.mxu0 %v2623_v61 }
 0x475   : > { %2625 = vmatprep.subr.bf16.mxu0 %v3134_v7 }
 0x47b   : > { %v2821_v8 = vpop.eup %2820 }
 0x47c   : > { %v1329_v9 = vsel %vm1304_vm3, %v2821_v8, 0.0 }
 0x47d   : > { %1330 = vadd.xlane.f32.xlu0 %v1329_v9 }
 0x4e2   : > { %v1310_v10 = vpop.xlane.xlu0 %1309 }
 0x4e3   : > { %v1318_v11 = vsub.f32 %v1152_v57, %v1310_v10 }
 0x4e5   : > { %v1323_v12 = vmul.f32 1.442695, %v1318_v11 }
 0x4e6   : > { %v1313_v13 = vpop.xlane.xlu1 %1312 }
 0x4e7   : > { %2822 = vpow2.f32 %v1323_v12  ;;  %v1319_v14 = vsub.f32 %v1226_v60, %v1313_v13 }
 0x4e9   : > { %v1325_v15 = vmul.f32 1.442695, %v1319_v14 }
 0x4eb   : > { %2824 = vpow2.f32 %v1325_v15  ;;  %v1316_v21 = vpop.xlane.xlu1 %1315 }
 0x4ec   : > { %v1320_v22 = vsub.f32 %v1300_v63, %v1316_v21  ;;  %v1669_v63 = vld [vmem:[%s3581_s10 + $0x58] sm:$0xff] }
 0x4ed   : > { %v2626_v0 = vpack.c.bf16 %v1669_v63, %v1668_v62  ;;  %v1883_v62 = vld [vmem:[%s3627_s12 + $0x10] sm:$0xff]  ;;  %v1884_v63 = vld [vmem:[%s3627_s12 + $0x18] sm:$0xff] }
 0x4ee   : > { %v1327_v24 = vmul.f32 1.442695, %v1320_v22 }
 0x4ef   : > { %2627 = vmatpush3.bf16.msra.mxu0 %v2626_v0  ;;  %v2662_v0 = vpack.c.bf16 %v1884_v63, %v1883_v62 }
 0x4f0   : > { %2628 = vmatprep.subr.bf16.mxu0 %v3134_v7 }
 0x4f1   : > { %v2823_v16 = vpop.eup %2822 }
 0x4f2   : > { %v1332_v17 = vsel %vm1304_vm3, %v2823_v16, 0.0 }
 0x4f3   : > { %1333 = vadd.xlane.f32.xlu1 %v1332_v17  ;;  %2630 = vmatpush3.bf16.msra.mxu0 %v2629_v5  ;;  %v2665_v5 = vpack.c.bf16 %v1886_v4, %v1885_v3 }
 0x4f4   : > { %2631 = vmatprep.subr.bf16.mxu0 %v3134_v7 }
 0x4f5   : > { %v2825_v18 = vpop.eup %2824 }
 0x4f6   : > { %v1335_v19 = vsel %vm1304_vm3, %v2825_v18, 0.0 }
 0x4f7   : > { %1336 = vadd.xlane.f32.xlu0 %v1335_v19 }
 0x504   : > { %1001 = vrot.lane.b32.xlu1 %v980_v52, %s3137_s3 }
 0x50a   : > { %v1331_v20 = vpop.xlane.xlu0 %1330 }
 0x50b   : > { %2826 = vrcp.f32 %v1331_v20 }
 0x50c   : > { %2828 = vpow2.f32 %v1327_v24  ;;  %v1781_v24 = vld [vmem:[%s3583_s24 + $0x8] sm:$0xff] }
 0x50d   : > { %998 = vrot.lane.b32.xlu0 %v980_v52, %s3136_s30 }
 0x515   : > { %v2827_v23 = vpop.eup %2826 }
 0x516   : > { %v1345_v25 = vmul.f32 %v2827_v23, %v2821_v8  ;;  %v2829_v26 = vpop.eup %2828  ;;  %v1673_v8 = vld [vmem:[%s3581_s10 + $0x78] sm:$0xff]  ;;  %v1780_v23 = vld [vmem:[%s3583_s24] sm:$0xff] }
 0x517   : > { %v1338_v27 = vsel %vm1304_vm3, %v2829_v26, 0.0  ;;  %v2632_v9 = vpack.c.bf16 %v1673_v8, %v1672_v6  ;;  %v1887_v6 = vld [vmem:[%s3627_s12 + $0x30] sm:$0xff]  ;;  %v1888_v8 = vld [vmem:[%s3627_s12 + $0x38] sm:$0xff] }
 0x518   : > { %2432 = vmatmul.mubr.msk.f32.vlgmr.msra.gmra.mrb[10].mxu1 %vm1304_vm3, %v1345_v25  ;;  %v1782_v25 = vld [vmem:[%s3583_s24 + $0x10] sm:$0xff] }
 0x519   : > { %2436 = vmatprep.mubr.msk.f32.mxu1 %vm3135_vm1, %v3133_v2  ;;  %2633 = vmatpush3.bf16.msra.mxu0 %v2632_v9  ;;  %v2668_v9 = vpack.c.bf16 %v1888_v8, %v1887_v6 }
 0x51a   : > { %2658 = vmatprep.subr.bf16.mxu0 %v3134_v7 }
 0x528   : > { %1339 = vadd.xlane.f32.xlu1 %v1338_v27  ;;  %v1783_v27 = vld [vmem:[%s3583_s24 + $0x18] sm:$0xff] }
 0x539   : > { %1004 = vrot.lane.b32.xlu1 %v980_v52, %s3138_s26 }
 0x580   : > { %v1334_v28 = vpop.xlane.xlu1 %1333 }
 0x581   : > { %2830 = vrcp.f32 %v1334_v28  ;;  %v1784_v28 = vld [vmem:[%s3583_s24 + $0x20] sm:$0xff] }
 0x584   : > { %v1337_v29 = vpop.xlane.xlu0 %1336  ;;  %v1002_v34 = vpop.permute.xlu1 %1001 }
 0x585   : > { %2832 = vrcp.f32 %v1337_v29  ;;  %v1785_v29 = vld [vmem:[%s3583_s24 + $0x28] sm:$0xff] }
 0x588   : > { %v999_v30 = vpop.permute.xlu0 %998 }
 0x589   : > { %2435 = vmatpush3.msra.mxu1 %v999_v30  ;;  %v2641_v30 = vpack.c.bf16 %v1785_v29, %v1784_v28 }
 0x58a   : > { %2439 = vmatprep.subr.mxu1 %v3133_v2 }
 0x58b   : > { %v2831_v32 = vpop.eup %2830 }
 0x58c   : > { %v1346_v33 = vmul.f32 %v2831_v32, %v2823_v16 }
 0x58e   : > { %2437 = vmatmul.mubr.msk.f32.vlgmr.msra.gmra.mrb[12].mxu1 %vm1304_vm3, %v1346_v33 }
 0x58f   : > { %v2833_v36 = vpop.eup %2832  ;;  %2440 = vmatpush3.msra.mxu1 %v1002_v34  ;;  %2441 = vmatprep.mubr.msk.f32.mxu1 %vm3135_vm1, %v3133_v2 }
 0x590   : > { %v1347_v37 = vmul.f32 %v2833_v36, %v2825_v18  ;;  %2444 = vmatprep.subr.mxu1 %v3133_v2  ;;  %v2276_v18 = vld [vmem:[%s4071_s1] ss:$0 sm:$0xff] }
 0x592   : > { %2442 = vmatmul.mubr.msk.f32.vlgmr.msra.gmra.mrb[14].mxu1 %vm1304_vm3, %v1347_v37  ;;  %v1786_v37 = vld [vmem:[%s3583_s24 + $0x30] sm:$0xff] }
 0x593   : > { %2446 = vmatprep.mubr.msk.f32.mxu1 %vm3135_vm1, %v3133_v2 }
 0x5b5   : > { %v1340_v38 = vpop.xlane.xlu1 %1339 }
 0x5b6   : > { %2834 = vrcp.f32 %v1340_v38  ;;  %v1787_v38 = vld [vmem:[%s3583_s24 + $0x38] sm:$0xff] }
 0x5b9   : > { %v1005_v39 = vpop.permute.xlu1 %1004 }
 0x5ba   : > { %2445 = vmatpush3.msra.mxu1 %v1005_v39  ;;  %v2644_v39 = vpack.c.bf16 %v1787_v38, %v1786_v37 }
 0x5bb   : > { %2634 = vmatprep.subr.bf16.mxu1 %v3134_v7 }
 0x5c0   : > { %v2835_v40 = vpop.eup %2834 }
 0x5c1   : > { %v1348_v41 = vmul.f32 %v2835_v40, %v2829_v26  ;;  %v2635_v26 = vpack.c.bf16 %v1781_v24, %v1780_v23  ;;  %v1788_v40 = vld [vmem:[%s3583_s24 + $0x40] sm:$0xff]  ;;  %v2279_v23 = vld [vmem:[%s733_s21] ss:$0 sm:$0xff]  ;;  %s4076_s21 = sld [smem:[#allocation22_spill]] }
 0x5c3   : > { %2447 = vmatmul.mubr.msk.f32.vlgmr.msra.gmra.mrb[16].mxu1 %vm1304_vm3, %v1348_v41  ;;  %v1789_v41 = vld [vmem:[%s3583_s24 + $0x48] sm:$0xff] }
 0x5c4   : > { %2516 = vmatprep.mubr.msk.f32.mxu1 %vm3135_vm1, %v3133_v2  ;;  %2636 = vmatpush3.bf16.msra.mxu1 %v2635_v26 }
 0x5c5   : > { %2637 = vmatprep.subr.bf16.mxu1 %v3134_v7 }
 0x5c7   : > { %p2282_p12 = scmp.ne.s32.totalorder %s4076_s21, 1 }
 0x5eb   : > { %v1418_v42 = vpop.f32.mrb[10].mxu1 }
 0x5ec   : > { %v2433_v43 = vpop.f32.mrb[11].mxu1 }
 0x5ed   : > { %v2647_v43 = vpack.c.bf16 %v1789_v41, %v1788_v40 }
 0x661   : > { %v1491_v52 = vpop.f32.mrb[12].mxu1 }
 0x662   : > { %1642 = vrot.lane.b32.xlu0 %v1491_v52, %s3138_s26  ;;  %v2438_v55 = vpop.f32.mrb[13].mxu1 }
 0x665   : > { %v1564_v57 = vpop.f32.mrb[14].mxu1 }
 0x666   : > { %1646 = vrot.lane.b32.xlu1 %v1564_v57, %s3137_s3  ;;  %v2443_v60 = vpop.f32.mrb[15].mxu1 }
 0x667   : > { %v1882_v60 = vld [vmem:[%s3627_s12 + $0x8] sm:$0xff] }
 0x668   : > { %v2659_v61 = vpack.c.bf16 %v1882_v60, %v1881_v59 }
 0x696   : > { %v1637_v10 = vpop.f32.mrb[16].mxu1 }
 0x697   : > { %1650 = vrot.lane.b32.xlu0 %v1637_v10, %s3136_s30  ;;  %v2448_v11 = vpop.f32.mrb[17].mxu1  ;;  %v1889_v10 = vld [vmem:[%s3627_s12 + $0x40] sm:$0xff] }
 0x698   : > { %v1890_v11 = vld [vmem:[%s3627_s12 + $0x48] sm:$0xff] }
 0x6d4   : > { %v1643_v12 = vpop.permute.xlu0 %1642 }
 0x6d5   : > { %v1653_v14 = vsel %vm1007_vm2, %v1418_v42, %v1643_v12  ;;  %v1790_v42 = vld [vmem:[%s3583_s24 + $0x50] sm:$0xff]  ;;  %v2671_v12 = vpack.c.bf16 %v1890_v11, %v1889_v10 }
 0x6d6   : > { %v2650_v45 = vpack.c.bf16 %v1791_v44, %v1790_v42 }
 0x6d8   : > { %v1647_v13 = vpop.permute.xlu1 %1646 }
 0x6d9   : > { %v1655_v15 = vsel %vm1654_vm4, %v1653_v14, %v1647_v13  ;;  %v1891_v13 = vld [vmem:[%s3627_s12 + $0x50] sm:$0xff]  ;;  %v1892_v14 = vld [vmem:[%s3627_s12 + $0x58] sm:$0xff] }
 0x709   : > { %v1651_v16 = vpop.permute.xlu0 %1650 }
 0x70a   : > { %v1657_v17 = vsel %vm1656_vm5, %v1655_v15, %v1651_v16  ;;  %v2674_v15 = vpack.c.bf16 %v1892_v14, %v1891_v13  ;;  %v1893_v16 = vld [vmem:[%s3627_s12 + $0x60] sm:$0xff] }
 0x70b   : > { %2482 = vmatmul.mubr.f32.vlgmr.msra.gmra.mrb[2].mxu0 %v1657_v17  ;;  %v1894_v17 = vld [vmem:[%s3627_s12 + $0x68] sm:$0xff] }
 0x70c   : > { %2551 = vmatprep.mubr.msk.f32.mxu0 %vm3135_vm1, %v3133_v2  ;;  %v2638_v2 = vpack.c.bf16 %v1783_v27, %v1782_v25  ;;  %2660 = vmatpush3.bf16.msra.mxu0 %v2659_v61 }
 0x70d   : > { %2661 = vmatprep.subr.bf16.mxu0 %v3134_v7 }
 0x70e   : > { %2639 = vmatpush3.bf16.msra.mxu1 %v2638_v2 }
 0x70f   : > { %2640 = vmatprep.subr.bf16.mxu1 %v3134_v7 }
 0x710   : > { %2663 = vmatpush3.bf16.msra.mxu0 %v2662_v0 }
 0x711   : > { %2664 = vmatprep.subr.bf16.mxu0 %v3134_v7 }
 0x712   : > { %2642 = vmatpush3.bf16.msra.mxu1 %v2641_v30 }
 0x713   : > { %2643 = vmatprep.subr.bf16.mxu1 %v3134_v7 }
 0x714   : > { %2666 = vmatpush3.bf16.msra.mxu0 %v2665_v5 }
 0x715   : > { %2667 = vmatprep.subr.bf16.mxu0 %v3134_v7 }
 0x716   : > { %2645 = vmatpush3.bf16.msra.mxu1 %v2644_v39 }
 0x717   : > { %2646 = vmatprep.subr.bf16.mxu1 %v3134_v7 }
 0x718   : > { %2669 = vmatpush3.bf16.msra.mxu0 %v2668_v9 }
 0x719   : > { %2670 = vmatprep.subr.bf16.mxu0 %v3134_v7 }
 0x71a   : > { %2648 = vmatpush3.bf16.msra.mxu1 %v2647_v43 }
 0x71b   : > { %2649 = vmatprep.subr.bf16.mxu1 %v3134_v7 }
 0x71c   : > { %2672 = vmatpush3.bf16.msra.mxu0 %v2671_v12 }
 0x71d   : > { %2673 = vmatprep.subr.bf16.mxu0 %v3134_v7 }
 0x71e   : > { %2651 = vmatpush3.bf16.msra.mxu1 %v2650_v45 }
 0x71f   : > { %2652 = vmatprep.subr.bf16.mxu1 %v3134_v7 }
 0x720   : > { %2675 = vmatpush3.bf16.msra.mxu0 %v2674_v15 }
 0x721   : > { %2676 = vmatprep.subr.bf16.mxu0 %v3134_v7 }
 0x7de   : > { %v1747_v19 = vpop.f32.mrb[2].mxu0 }
 0x7df   : > { %v1748_v20 = vadd.f32 %v2276_v18, %v1747_v19  ;;  %v2483_v21 = vpop.f32.mrb[3].mxu0  ;;  %v2677_v18 = vpack.c.bf16 %v1894_v17, %v1893_v16  ;;  %v1895_v19 = vld [vmem:[%s3627_s12 + $0x70] sm:$0xff] }
 0x7e1   : > { %v3815_v22 = vadd.f32 %v1748_v20, %v3635_v1  ;;  %2678 = vmatpush3.bf16.msra.mxu0 %v2677_v18  ;;  %v1896_v20 = vld [vmem:[%s3627_s12 + $0x78] sm:$0xff] }
 0x7e2   : > { %2679 = vmatprep.subr.bf16.mxu0 %v3134_v7  ;;  %v2680_v21 = vpack.c.bf16 %v1896_v20, %v1895_v19 }
 0x7e3   : > { %1752 = vadd.xlane.f32.xlu1 %v3815_v22 }
 0x7e5   : > { %2681 = vmatpush3.bf16.msra.mxu0 %v2680_v21 }
 0x870   : > { %v1753_v1 = vpop.xlane.xlu1 %1752 }
 0x871   : > { %v1754_v32 = vmul.f32 0.03125, %v1753_v1  ;;  %v2281_v1 = vld [vmem:[%s736_s2] ss:$0 sm:$0xff] }
 0x873   : > { %v1755_v33 = vsub.f32 %v3815_v22, %v1754_v32 }
 0x875   : > { %v1756_v34 = vmul.f32 %v3663_v35, %v1755_v33  ;;  %v1792_v35 = vld [vmem:[%s3583_s24 + $0x60] sm:$0xff] }
 0x876   : > { %v2653_v46 = vpack.c.bf16 %v1793_v31, %v1792_v35 }
 0x877   : > { %v1757_v36 = vmul.f32 %v1756_v34, %v1756_v34 }
 0x878   : > { %2654 = vmatpush3.bf16.msra.mxu1 %v2653_v46 }
 0x879   : > { %1758 = vadd.xlane.f32.xlu0 %v1757_v36  ;;  %2655 = vmatprep.subr.bf16.mxu1 %v3134_v7 }
 0x87c   : > { %2657 = vmatpush3.bf16.msra.mxu1 %v2656_v49 }
 0x906   : > { %v1759_v50 = vpop.xlane.xlu0 %1758 }
 0x907   : > { %v1760_v51 = vmul.f32 0.03125, %v1759_v50 }
 0x909   : > { %v1761_v52 = vadd.f32 1e-05, %v1760_v51 }
 0x90b   : > { %2836 = vrsqrt.f32 %v1761_v52 }
 0x915   : > { %v2837_v53 = vpop.eup %2836 }
 0x916   : > { %v1763_v55 = vmul.f32 %v2837_v53, %v1756_v34 }
 0x918   : > { %v1771_v57 = vmul.f32 %v2277_v54, %v1763_v55 }
 0x91a   : > { %v1779_v58 = vadd.f32 %v2278_v56, %v1771_v57 }
 0x91c   : > { %2517 = vmatmul.mubr.f32.vlgmr.msra.gmra.mrb[18].mxu1 %v1779_v58 }
 0x9ef   : > { %v1869_v24 = vpop.f32.mrb[18].mxu1 }
 0x9f0   : > { %v1870_v25 = vadd.f32 %v2279_v23, %v1869_v24  ;;  %v2518_v26 = vpop.f32.mrb[19].mxu1 }
 0x9f2   : > { %v2280_v27 = vmul.f32 -1.702, %v1870_v25 }
 0x9f4   : > { %v1875_v2 = vmul.f32 1.442695, %v2280_v27 }
 0x9f6   : > { %2838 = vpow2.f32 %v1875_v2 }
 0xa00   : > { %v2839_v28 = vpop.eup %2838 }
 0xa01   : > { %v1877_v29 = vadd.f32 1.0, %v2839_v28 }
 0xa03   : > { %2840 = vrcp.f32 %v1877_v29 }
 0xa0d   : > { %v2841_v7 = vpop.eup %2840 }
 0xa0e   : > { %v1880_v30 = vmul.f32 %v2841_v7, %v1870_v25 }
 0xa10   : > { %2552 = vmatmul.mubr.f32.vlgmr.msra.gmra.mrb[4].mxu0 %v1880_v30 }
 0xae2   : > { %1979 = sbr.rel (%p2282_p12) target bundleno = 2801 (0xaf1), region = 100 }
 0xae3   : > { %v1970_v32 = vpop.f32.mrb[4].mxu0 }
 0xae4   : > { %v1971_v33 = vadd.f32 %v2281_v1, %v1970_v32  ;;  %v2553_v34 = vpop.f32.mrb[5].mxu0 }
 0xae6   : > { %v1974_v36 = vadd.f32 %v1971_v33, %v3815_v22 }
 0xae8   : > { %1975 = vst [vmem:[#allocation2] sm:$0xff] %v1974_v36 }
 0xaef   : > { %v1980_v37 = vld [vmem:[#allocation2] sm:$0xff] }
 0xaf0   : > { %1981 = vst [vmem:[%s3631_s16] sm:$0xff] %v1980_v37 }
 0xaf1 PF: > { %s4077_s28 = sld [smem:[#allocation23_spill]]  ;;  %s4078_s18 = sld [smem:[#allocation46_spill]] }
 0xaf2   : > { %s1996_s4 = sshll.u32 %s3631_s16, 4  ;;  %s1983_s30 = scalar_lea.sflag [#allocation5], %s3561_s15  ;;  %s1997_s4 = int_to_ptr.vmem [resolvable:$true] %s1996_s4 }
 0xaf3   : > { %s2992_s3 = scalar_lea.vmem %s1997_s4, 128  ;;  %p4080_p5 = scmp.ne.s32.totalorder %s4040_s14, 0 }
 0xaf4   : > { %p2993_p11 = scmp.ne.s32.totalorder %s1997_s4, %s2992_s3  ;;  %s3139_s26 = smov [#allocation12]  }
 0xaf5   : > { %s2996_s10 = sshll.u32 %s3139_s26, 4  ;;  %s2997_s10 = int_to_ptr.vmem [resolvable:$false] %s2996_s10 }
 0xaf6   : > { %p2994_p0 = pnand %p2993_p11, %p4080_p5  ;;  %s2998_s6 = scalar_lea.vmem %s2997_s10, 256 }
 0xaf7   : > { %s2284_s29 = sshll.u32 %s4077_s28, 7  ;;  %s4079_s13 = smov %s4078_s18 }
 0xaf8   : > { %s3893_s25 = scalar_lea.hbm %s4078_s18, %s2284_s29  ;;  %p2995_p9 = pneg %p2994_p0 }
 0xaf9   : > { %p2999_p13 = scmp.lt.s32.totalorder %s1997_s4, %s2997_s10  ;;  %p3000_p10 = scmp.lt.s32.totalorder %s2998_s6, %s2992_s3 }
 0xafb   : > { %p3001_p6 = por %p3000_p10, %p2999_p13 }
 0xafd   : > { %p3002_p7 = pnand %p3001_p6, %p2995_p9 }
 0xaff   : > { %3005 = shalt.err (!%p3002_p7)
}
 0xb00   : > { %s3006_s15 = scalar_lea.hbm %s3893_s25, 128  ;;  %s3010_s1 = scalar_lea.hbm %s4079_s13, 256 }
 0xb01   : > { %p3007_p8 = scmp.ne.s32.totalorder %s3893_s25, %s3006_s15  ;;  %p3011_p3 = scmp.lt.u32.totalorder %s3893_s25, %s4079_s13 }
 0xb02   : > { %p3012_p4 = scmp.lt.u32.totalorder %s3010_s1, %s3006_s15  ;;  %p3014_p11 = scmp.lt.u32.totalorder %s3006_s15, %s3893_s25 }
 0xb03   : > { %p3008_p2 = pnand %p3007_p8, %p4080_p5 }
 0xb04   : > { %p3013_p12 = por %p3012_p4, %p3011_p3 }
 0xb05   : > { %p3009_p1 = pneg %p3008_p2 }
 0xb06   : > { %p3015_p0 = por %p3014_p11, %p3013_p12 }
 0xb08   : > { %p3016_p9 = pnand %p3015_p0, %p3009_p1 }
 0xb0a   : > { %3019 = shalt.err (!%p3016_p9)
}
 0xb0b   : > { %2696 = dma.vmem_to_hbm [thread:$0]  (%p4080_p5), %s1997_s4, 128, %s3893_s25, %s1983_s30  }
 0xb0c PF: > { %s4081_s23 = sld [smem:[#allocation26_spill]]  ;;  %s4082_s24 = sld [smem:[#allocation19_spill]] }
 0xb0d   : > { %s4083_s8 = sld [smem:[#allocation32_spill]] }
 0xb12   : > { %p2719_p13 = scmp.ge.s32.totalorder %s4081_s23, 2  ;;  %s2008_s17 = sand.u32 1, %s4082_s24  }
 0xb13   : > { %p4084_p10 = scmp.ne.s32.totalorder %s4083_s8, 0  ;;  %s2009_s27 = scalar_lea.sflag [#allocation5], %s2008_s17 }
 0xb15   : > { %p2715_p6 = pnand %p2719_p13, %p4084_p10 }
 0xb17   : > { %3077 = dma.done.wait (!%p2715_p6), %s2009_s27, 128  }
 0xb18   : > { %3079 = vsyncadd (!%p2715_p6), %s2009_s27, 4294967168  ;;  %s35_s18 = sadd.s32 1, %s4081_s23   ;;  %s4085_s25 = sld [smem:[#allocation17_spill]] }
 0xb19   : > { %p32_p7 = scmp.ge.s32.totalorder %s35_s18, 6   ;;  %s4086_s26 = sld [smem:[#allocation18_spill]] }
 0xb1a   : > { %s4087_s27 = sld [smem:[#allocation30_spill]]  ;;  %s4088_s28 = sld [smem:[#allocation20_spill]] }
 0xb1b   : > { %s4089_s29 = sld [smem:[#allocation21_spill]]  ;;  %s4090_s30 = sld [smem:[#allocation31_spill]] }
 0xb1c   : > { %s4091_s14 = sld [smem:[#allocation24_spill]]  ;;  %s4092_s15 = sld [smem:[#allocation25_spill]] }
 0xb1d   : > { %s4093_s16 = sld [smem:[#allocation27_spill]]  ;;  %s4094_s17 = sld [smem:[#allocation28_spill]] }
 0xb1e   :  { %34 = sbr.rel (!%p32_p7) target bundleno = 28 (0x1c), region = 197 }
 0xb25   :  { %2014 = vsyncpa [#allocation4], 1 }
 0xb26   :  { %2016 = vsyncpa [#allocation4 + $0x1], 1 }
 0xb27   :  { %2017 = vsyncpa [#allocation7], 1 }
 0xb28   :  { %2019 = vsyncpa [#allocation7 + $0x1], 1 }
 0xb29   :  { %2020 = vsyncpa [#allocation10], 1 }
 0xb2a   :  { %2022 = vsyncpa [#allocation10 + $0x1], 1 }
 0xb2b   :  { %2023 = vsyncpa [#allocation5], 1 }
 0xb2c   :  { %2025 = vsyncpa [#allocation5 + $0x1], 1 }

</bundles_post_ra>
